<compile_context>
chip_gen: v6e
topology: v6e:2x2x1
jax: 0.10.0
libtpu: 0.0.40
codegen_flags: <defaults>
</compile_context>

<pallas_src>
import jax
import jax.numpy as jnp
from jax.experimental import pallas as pl
from jax.experimental.pallas import tpu as pltpu

EPS = 1e-5          # nn.BatchNorm3d default eps
NEG_SLOPE = 0.2     # LeakyReLU(0.2)


# ----------------------------- Pallas kernels ------------------------------ #

def _conv_stats_kernel(x_ref, w_ref, y_ref, stats_ref):
    """Pass 1: bf16 matmul tile (f32 accum) + per-channel sum / sum-of-squares.

    x_ref:     (tm, K)   bf16 im2col rows
    w_ref:     (K, Cp)   bf16 weights, Cout padded to Cp (multiple of 128)
    y_ref:     (tm, Cp)  f32 raw conv output tile (lane-dense store)
    stats_ref: (1, 2, Cp) f32 [sum; sum of squares] for this tile
    """
    y = jnp.dot(x_ref[...], w_ref[...], preferred_element_type=jnp.float32)
    y_ref[...] = y
    s = jnp.sum(y, axis=0, keepdims=True)          # (1, Cp)
    ss = jnp.sum(y * y, axis=0, keepdims=True)     # (1, Cp)
    stats_ref[...] = jnp.concatenate([s, ss], axis=0).reshape(stats_ref.shape)


def _bn_lrelu_kernel(y_ref, scale_ref, shift_ref, o_ref):
    """Pass 2: y*scale + shift then LeakyReLU(0.2); f32 math, bf16 store.

    y_ref: (tm, Cp) f32, scale/shift: (1, Cp) f32, o_ref: (tm, Cp) bf16.
    """
    z = y_ref[...] * scale_ref[...] + shift_ref[...]
    o_ref[...] = jnp.where(z >= 0, z, NEG_SLOPE * z).astype(o_ref.dtype)


def _linear_sigmoid_kernel(x_ref, w_ref, o_ref):
    """Fused Linear(bias=False) + Sigmoid.  x:(N,F) bf16, w:(F,128) bf16 (col 0 real)."""
    y = jnp.dot(x_ref[...], w_ref[...], preferred_element_type=jnp.float32)
    o_ref[...] = 1.0 / (1.0 + jnp.exp(-y))


# ------------------------------- glue (JAX) -------------------------------- #

def _round_up(v, m):
    return ((v + m - 1) // m) * m


def _pick_tile(m):
    """Largest M-tile <= 512 that divides M (sublane-friendly); else full M."""
    for t in (512, 256, 128, 64, 32, 16, 8):
        if m % t == 0:
            return t
    return m


def _im2col_ndhwc(x, k=4, s=2, p=1):
    """x: (N, D, H, W, C) channels-last -> (M, K).

    M = N*Do*Ho*Wo ordered (n, do, ho, wo); K = k^3*C ordered (kd, kh, kw, c).
    No full-tensor transposes (stays channels-last).
    """
    n, d, h, w, c = x.shape
    do = (d + 2 * p - k) // s + 1
    ho = (h + 2 * p - k) // s + 1
    wo = (w + 2 * p - k) // s + 1
    xp = jnp.pad(x, ((0, 0), (p, p), (p, p), (p, p), (0, 0)))
    slabs = []
    for kd in range(k):
        for kh in range(k):
            for kw in range(k):
                slabs.append(
                    xp[:, kd:kd + s * do:s, kh:kh + s * ho:s, kw:kw + s * wo:s, :])
    pat = jnp.stack(slabs, axis=4)                     # (N, Do, Ho, Wo, k^3, C)
    return pat.reshape(n * do * ho * wo, k * k * k * c), (n, do, ho, wo)


def conv_bn_lrelu(x, w2d, gamma_p, beta_p, cout):
    """One Conv3d(k=4,s=2,p=1,bias=False)+BN(train)+LeakyReLU layer.

    x:       (N, D, H, W, Cin) channels-last (any float dtype)
    w2d:     (K, Cp) bf16, K=(kd,kh,kw,cin), Cout padded to Cp
    gamma_p: (Cp,) f32, beta_p: (Cp,) f32
    returns  (N, Do, Ho, Wo, Cout) bf16 channels-last
    """
    x2d, (n, do, ho, wo) = _im2col_ndhwc(x)
    x2d = x2d.astype(jnp.bfloat16)
    m, k = x2d.shape
    cp = w2d.shape[1]
    tm = _pick_tile(m)
    nt = m // tm

    # Pass 1: tiled matmul + per-tile statistics (parallel over M tiles).
    y, stats = pl.pallas_call(
        _conv_stats_kernel,
        out_shape=(jax.ShapeDtypeStruct((m, cp), jnp.float32),
                   jax.ShapeDtypeStruct((nt, 2, cp), jnp.float32)),
        grid=(nt,),
        in_specs=[
            pl.BlockSpec((tm, k), lambda i: (i, 0)),
            pl.BlockSpec((k, cp), lambda i: (0, 0)),
        ],
        out_specs=(
            pl.BlockSpec((tm, cp), lambda i: (i, 0)),
            pl.BlockSpec((1, 2, cp), lambda i: (i, 0, 0)),
        ),
        compiler_params=pltpu.CompilerParams(dimension_semantics=("parallel",)),
    )(x2d, w2d)

    # Tiny host-side reduction: full-M mean / biased variance -> scale & shift.
    tot = jnp.sum(stats, axis=0)                       # (2, Cp)
    mean = tot[0] / m
    var = jnp.maximum(tot[1] / m - mean * mean, 0.0)
    rstd = jax.lax.rsqrt(var + EPS)
    scale = (gamma_p * rstd).reshape(1, cp)
    shift = (beta_p - mean * gamma_p * rstd).reshape(1, cp)

    # Pass 2: normalize + LeakyReLU (parallel over M tiles), bf16 activations out.
    out = pl.pallas_call(
        _bn_lrelu_kernel,
        out_shape=jax.ShapeDtypeStruct((m, cp), jnp.bfloat16),
        grid=(nt,),
        in_specs=[
            pl.BlockSpec((tm, cp), lambda i: (i, 0)),
            pl.BlockSpec((1, cp), lambda i: (0, 0)),
            pl.BlockSpec((1, cp), lambda i: (0, 0)),
        ],
        out_specs=pl.BlockSpec((tm, cp), lambda i: (i, 0)),
        compiler_params=pltpu.CompilerParams(dimension_semantics=("parallel",)),
    )(y, scale, shift)

    return out[:, :cout].reshape(n, do, ho, wo, cout)


def linear_sigmoid(x, w_pad):
    """x: (N, F), w_pad: (F, 128) bf16 with real weights in column 0. Returns (N, 1)."""
    n, f = x.shape
    cp = w_pad.shape[1]
    out = pl.pallas_call(
        _linear_sigmoid_kernel,
        out_shape=jax.ShapeDtypeStruct((n, cp), jnp.float32),
        grid=(1,),
        in_specs=[
            pl.BlockSpec((n, f), lambda i: (0, 0)),
            pl.BlockSpec((f, cp), lambda i: (0, 0)),
        ],
        out_specs=pl.BlockSpec((n, cp), lambda i: (0, 0)),
    )(x.astype(jnp.bfloat16), w_pad)
    return out[:, :1]


# ------------------------------ model wrapper ------------------------------ #

def init_discriminator_params(key, in_channels=3, dim=16, out_conv_channels=64):
    """PyTorch-layout parameters (Conv3d: (Cout,Cin,4,4,4); Linear: (1,F))."""
    c1, c2, c3 = out_conv_channels // 8, out_conv_channels // 4, out_conv_channels // 2
    out_dim = dim // 16
    chans = [in_channels, c1, c2, c3, out_conv_channels]
    keys = jax.random.split(key, 5)
    params = {}
    for i in range(4):
        cin, cout = chans[i], chans[i + 1]
        fan_in = cin * 4 * 4 * 4
        params[f"conv{i + 1}_w"] = (
            jax.random.normal(keys[i], (cout, cin, 4, 4, 4), jnp.float32)
            * (1.0 / jnp.sqrt(fan_in)))
        params[f"bn{i + 1}_gamma"] = jnp.ones((cout,), jnp.float32)   # PyTorch default
        params[f"bn{i + 1}_beta"] = jnp.zeros((cout,), jnp.float32)   # PyTorch default
    feat = out_conv_channels * out_dim ** 3
    params["fc_w"] = (jax.random.normal(keys[4], (1, feat), jnp.float32)
                      * (1.0 / jnp.sqrt(feat)))
    return params


def prepare_params(params, out_conv_channels, dim):
    """One-time conversion of PyTorch-layout params into kernel layout."""
    out_dim = dim // 16
    prep = {}
    for i in range(1, 5):
        w = params[f"conv{i}_w"]                       # (Cout, Cin, 4, 4, 4)
        cout, cin = w.shape[0], w.shape[1]
        cp = _round_up(cout, 128)
        # (kd, kh, kw, cin, cout) flatten -> (K, Cout), then lane-pad to Cp, bf16.
        w2d = jnp.transpose(w, (2, 3, 4, 1, 0)).reshape(cin * 64, cout)
        prep[f"conv{i}_w2d"] = jnp.pad(
            w2d, ((0, 0), (0, cp - cout))).astype(jnp.bfloat16)
        prep[f"bn{i}_gamma"] = jnp.pad(
            params[f"bn{i}_gamma"], (0, cp - cout), constant_values=1.0)
        prep[f"bn{i}_beta"] = jnp.pad(params[f"bn{i}_beta"], (0, cp - cout))
    # FC weight: PyTorch features are ordered (cout, d, h, w); our layer-4
    # activations flatten as (d, h, w, cout) -> permute once, lane-pad to 128.
    fc = params["fc_w"].reshape(out_conv_channels, out_dim, out_dim, out_dim)
    fc = jnp.transpose(fc, (1, 2, 3, 0)).reshape(-1, 1)          # (F, 1)
    prep["fc_w2d"] = jnp.pad(fc, ((0, 0), (0, 127))).astype(jnp.bfloat16)
    return prep


def discriminator_forward(prep, x_ncdhw, out_conv_channels):
    """x_ncdhw: (N, C, D, H, W) — matches PyTorch Conv3d input layout."""
    x = jnp.transpose(x_ncdhw, (0, 2, 3, 4, 1))        # NCDHW -> NDHWC, once
    couts = [out_conv_channels // 8, out_conv_channels // 4,
             out_conv_channels // 2, out_conv_channels]
    for i in range(1, 5):
        x = conv_bn_lrelu(x, prep[f"conv{i}_w2d"],
                          prep[f"bn{i}_gamma"], prep[f"bn{i}_beta"], couts[i - 1])
    n = x.shape[0]
    x = x.reshape(n, -1)   # (N, out_dim^3 * Cout), matches permuted fc weight
    return linear_sigmoid(x, prep["fc_w2d"])


# ----------------------------------- main ----------------------------------- #

if __name__ == "__main__":
    key = jax.random.PRNGKey(0)
    k_param, k_x = jax.random.split(key)

    # Small, consistent config: in_channels=3, dim=16 (so out_dim=1),
    # out_conv_channels=64, batch=2.  Input is NCDHW: (2, 3, 16, 16, 16).
    in_channels, dim, out_conv_channels, batch = 3, 16, 64, 2
    params = init_discriminator_params(
        k_param, in_channels=in_channels, dim=dim,
        out_conv_channels=out_conv_channels)
    prep = prepare_params(params, out_conv_channels, dim)

    x = jax.random.normal(k_x, (batch, in_channels, dim, dim, dim), jnp.float32)

    fwd = jax.jit(lambda p, xx: discriminator_forward(p, xx, out_conv_channels))
    y = fwd(prep, x)
    jax.block_until_ready(y)

    assert y.shape == (batch, 1), y.shape
    assert bool(jnp.all(jnp.isfinite(y))) and bool(jnp.all((y >= 0) & (y <= 1)))
    print("KERNEL_OK")
</pallas_src>

<mosaic_0001>
module attributes {stable_mosaic.version = 11 : i64} {
  func.func @_conv_stats_kernel(%arg0: i32, %arg1: memref<512x192xbf16, #tpu.memory_space<vmem>>, %arg2: memref<192x128xbf16, #tpu.memory_space<vmem>>, %arg3: memref<512x128xf32, #tpu.memory_space<vmem>>, %arg4: memref<1x2x128xf32, #tpu.memory_space<vmem>>) attributes {dimension_semantics = [#tpu.dimension_semantics<parallel>], iteration_bounds = array<i64: 2>, scalar_prefetch = 0 : i64, scratch_operands = 0 : i64, tpu.core_type = #tpu.core_type<tc>, window_params = [{transform_indices = @transform_0, window_bounds = array<i64: 512, 192>}, {pipeline_mode = #tpu.pipeline_mode<synchronous>, transform_indices = @transform_1, window_bounds = array<i64: 192, 128>}, {transform_indices = @transform_2, window_bounds = array<i64: 512, 128>}, {transform_indices = @transform_3, window_bounds = array<i64: 1, 2, 128>}]} {
    %c0 = arith.constant 0 : index
    %c0_0 = arith.constant 0 : index
    %0 = vector.load %arg1[%c0, %c0_0] : memref<512x192xbf16, #tpu.memory_space<vmem>>, vector<512x192xbf16>
    %c0_1 = arith.constant 0 : index
    %c0_2 = arith.constant 0 : index
    %1 = vector.load %arg2[%c0_1, %c0_2] : memref<192x128xbf16, #tpu.memory_space<vmem>>, vector<192x128xbf16>
    %cst = arith.constant dense<0.000000e+00> : vector<512x128xf32>
    %2 = tpu.matmul %0, %1, %cst {dimension_numbers = #tpu.dot_dimension_numbers<[1], [0], [0], [1], [0, 0, 1, 1], [], []>} : vector<512x192xbf16>, vector<192x128xbf16>, vector<512x128xf32> -> vector<512x128xf32>
    %c0_3 = arith.constant 0 : index
    %c0_4 = arith.constant 0 : index
    %3 = vector.load %arg3[%c0_3, %c0_4] : memref<512x128xf32, #tpu.memory_space<vmem>>, vector<512x128xf32>
    tpu.vector_store %arg3[%c0_3, %c0_4], %2 {strides = array<i32>} : memref<512x128xf32, #tpu.memory_space<vmem>>, vector<512x128xf32>,
    %cst_5 = arith.constant dense<0.000000e+00> : vector<128xf32>
    %4 = vector.multi_reduction <add>, %2, %cst_5 [0] : vector<512x128xf32> to vector<128xf32>
    %5 = vector.shape_cast %4 : vector<128xf32> to vector<1x128xf32>
    %6 = arith.mulf %2, %2 : vector<512x128xf32>
    %cst_6 = arith.constant dense<0.000000e+00> : vector<128xf32>
    %7 = vector.multi_reduction <add>, %6, %cst_6 [0] : vector<512x128xf32> to vector<128xf32>
    %8 = vector.shape_cast %7 : vector<128xf32> to vector<1x128xf32>
    %9 = tpu.concatenate %5, %8 in 0 : vector<1x128xf32>, vector<1x128xf32> -> vector<2x128xf32>
    %10 = vector.shape_cast %9 : vector<2x128xf32> to vector<1x2x128xf32>
    %c0_7 = arith.constant 0 : index
    %c0_8 = arith.constant 0 : index
    %c0_9 = arith.constant 0 : index
    %11 = vector.load %arg4[%c0_7, %c0_8, %c0_9] : memref<1x2x128xf32, #tpu.memory_space<vmem>>, vector<1x2x128xf32>
    tpu.vector_store %arg4[%c0_7, %c0_8, %c0_9], %10 {strides = array<i32>} : memref<1x2x128xf32, #tpu.memory_space<vmem>>, vector<1x2x128xf32>,
    return
  }
  func.func @transform_0(%arg0: i32) -> (i32, i32) {
    %c0_i32 = arith.constant 0 : i32
    %c0_i32_0 = arith.constant 0 : i32
    return %arg0, %c0_i32 : i32, i32
  }
  func.func @transform_1(%arg0: i32) -> (i32, i32) {
    %c0_i32 = arith.constant 0 : i32
    %c0_i32_0 = arith.constant 0 : i32
    %c0_i32_1 = arith.constant 0 : i32
    return %c0_i32, %c0_i32_0 : i32, i32
  }
  func.func @transform_2(%arg0: i32) -> (i32, i32) {
    %c0_i32 = arith.constant 0 : i32
    %c0_i32_0 = arith.constant 0 : i32
    return %arg0, %c0_i32 : i32, i32
  }
  func.func @transform_3(%arg0: i32) -> (i32, i32, i32) {
    %c0_i32 = arith.constant 0 : i32
    %c0_i32_0 = arith.constant 0 : i32
    %c0_i32_1 = arith.constant 0 : i32
    return %arg0, %c0_i32, %c0_i32_0 : i32, i32, i32
  }
}

module attributes {stable_mosaic.version = 11 : i64} {
  func.func @_bn_lrelu_kernel(%arg0: i32, %arg1: memref<512x128xf32, #tpu.memory_space<vmem>>, %arg2: memref<1x128xf32, #tpu.memory_space<vmem>>, %arg3: memref<1x128xf32, #tpu.memory_space<vmem>>, %arg4: memref<512x128xbf16, #tpu.memory_space<vmem>>) attributes {dimension_semantics = [#tpu.dimension_semantics<parallel>], iteration_bounds = array<i64: 2>, scalar_prefetch = 0 : i64, scratch_operands = 0 : i64, tpu.core_type = #tpu.core_type<tc>, window_params = [{transform_indices = @transform_0, window_bounds = array<i64: 512, 128>}, {pipeline_mode = #tpu.pipeline_mode<synchronous>, transform_indices = @transform_1, window_bounds = array<i64: 1, 128>}, {pipeline_mode = #tpu.pipeline_mode<synchronous>, transform_indices = @transform_2, window_bounds = array<i64: 1, 128>}, {transform_indices = @transform_3, window_bounds = array<i64: 512, 128>}]} {
    %c0 = arith.constant 0 : index
    %c0_0 = arith.constant 0 : index
    %0 = vector.load %arg1[%c0, %c0_0] : memref<512x128xf32, #tpu.memory_space<vmem>>, vector<512x128xf32>
    %c0_1 = arith.constant 0 : index
    %c0_2 = arith.constant 0 : index
    %1 = vector.load %arg2[%c0_1, %c0_2] : memref<1x128xf32, #tpu.memory_space<vmem>>, vector<1x128xf32>
    %2 = vector.broadcast %1 : vector<1x128xf32> to vector<512x128xf32>
    %3 = arith.mulf %0, %2 : vector<512x128xf32>
    %c0_3 = arith.constant 0 : index
    %c0_4 = arith.constant 0 : index
    %4 = vector.load %arg3[%c0_3, %c0_4] : memref<1x128xf32, #tpu.memory_space<vmem>>, vector<1x128xf32>
    %5 = vector.broadcast %4 : vector<1x128xf32> to vector<512x128xf32>
    %6 = arith.addf %3, %5 : vector<512x128xf32>
    %cst = arith.constant 0.000000e+00 : f32
    %7 = vector.broadcast %cst : f32 to vector<512x128xf32>
    %8 = arith.cmpf oge, %6, %7 : vector<512x128xf32>
    %cst_5 = arith.constant 2.000000e-01 : f32
    %9 = vector.broadcast %cst_5 : f32 to vector<512x128xf32>
    %10 = arith.mulf %9, %6 : vector<512x128xf32>
    %11 = arith.select %8, %6, %10 : vector<512x128xi1>, vector<512x128xf32>
    %12 = arith.truncf %11 : vector<512x128xf32> to vector<512x128xbf16>
    %c0_6 = arith.constant 0 : index
    %c0_7 = arith.constant 0 : index
    %13 = vector.load %arg4[%c0_6, %c0_7] : memref<512x128xbf16, #tpu.memory_space<vmem>>, vector<512x128xbf16>
    tpu.vector_store %arg4[%c0_6, %c0_7], %12 {strides = array<i32>} : memref<512x128xbf16, #tpu.memory_space<vmem>>, vector<512x128xbf16>,
    return
  }
  func.func @transform_0(%arg0: i32) -> (i32, i32) {
    %c0_i32 = arith.constant 0 : i32
    %c0_i32_0 = arith.constant 0 : i32
    return %arg0, %c0_i32 : i32, i32
  }
  func.func @transform_1(%arg0: i32) -> (i32, i32) {
    %c0_i32 = arith.constant 0 : i32
    %c0_i32_0 = arith.constant 0 : i32
    %c0_i32_1 = arith.constant 0 : i32
    return %c0_i32, %c0_i32_0 : i32, i32
  }
  func.func @transform_2(%arg0: i32) -> (i32, i32) {
    %c0_i32 = arith.constant 0 : i32
    %c0_i32_0 = arith.constant 0 : i32
    %c0_i32_1 = arith.constant 0 : i32
    return %c0_i32, %c0_i32_0 : i32, i32
  }
  func.func @transform_3(%arg0: i32) -> (i32, i32) {
    %c0_i32 = arith.constant 0 : i32
    %c0_i32_0 = arith.constant 0 : i32
    return %arg0, %c0_i32 : i32, i32
  }
}

module attributes {stable_mosaic.version = 11 : i64} {
  func.func @_conv_stats_kernel(%arg0: i32, %arg1: memref<128x512xbf16, #tpu.memory_space<vmem>>, %arg2: memref<512x128xbf16, #tpu.memory_space<vmem>>, %arg3: memref<128x128xf32, #tpu.memory_space<vmem>>, %arg4: memref<1x2x128xf32, #tpu.memory_space<vmem>>) attributes {dimension_semantics = [#tpu.dimension_semantics<parallel>], iteration_bounds = array<i64: 1>, scalar_prefetch = 0 : i64, scratch_operands = 0 : i64, tpu.core_type = #tpu.core_type<tc>, window_params = [{transform_indices = @transform_0, window_bounds = array<i64: 128, 512>}, {pipeline_mode = #tpu.pipeline_mode<synchronous>, transform_indices = @transform_1, window_bounds = array<i64: 512, 128>}, {transform_indices = @transform_2, window_bounds = array<i64: 128, 128>}, {transform_indices = @transform_3, window_bounds = array<i64: 1, 2, 128>}]} {
    %c0 = arith.constant 0 : index
    %c0_0 = arith.constant 0 : index
    %0 = vector.load %arg1[%c0, %c0_0] : memref<128x512xbf16, #tpu.memory_space<vmem>>, vector<128x512xbf16>
    %c0_1 = arith.constant 0 : index
    %c0_2 = arith.constant 0 : index
    %1 = vector.load %arg2[%c0_1, %c0_2] : memref<512x128xbf16, #tpu.memory_space<vmem>>, vector<512x128xbf16>
    %cst = arith.constant dense<0.000000e+00> : vector<128x128xf32>
    %2 = tpu.matmul %0, %1, %cst {dimension_numbers = #tpu.dot_dimension_numbers<[1], [0], [0], [1], [0, 0, 1, 1], [], []>} : vector<128x512xbf16>, vector<512x128xbf16>, vector<128x128xf32> -> vector<128x128xf32>
    %c0_3 = arith.constant 0 : index
    %c0_4 = arith.constant 0 : index
    %3 = vector.load %arg3[%c0_3, %c0_4] : memref<128x128xf32, #tpu.memory_space<vmem>>, vector<128x128xf32>
    tpu.vector_store %arg3[%c0_3, %c0_4], %2 {strides = array<i32>} : memref<128x128xf32, #tpu.memory_space<vmem>>, vector<128x128xf32>,
    %cst_5 = arith.constant dense<0.000000e+00> : vector<128xf32>
    %4 = vector.multi_reduction <add>, %2, %cst_5 [0] : vector<128x128xf32> to vector<128xf32>
    %5 = vector.shape_cast %4 : vector<128xf32> to vector<1x128xf32>
    %6 = arith.mulf %2, %2 : vector<128x128xf32>
    %cst_6 = arith.constant dense<0.000000e+00> : vector<128xf32>
    %7 = vector.multi_reduction <add>, %6, %cst_6 [0] : vector<128x128xf32> to vector<128xf32>
    %8 = vector.shape_cast %7 : vector<128xf32> to vector<1x128xf32>
    %9 = tpu.concatenate %5, %8 in 0 : vector<1x128xf32>, vector<1x128xf32> -> vector<2x128xf32>
    %10 = vector.shape_cast %9 : vector<2x128xf32> to vector<1x2x128xf32>
    %c0_7 = arith.constant 0 : index
    %c0_8 = arith.constant 0 : index
    %c0_9 = arith.constant 0 : index
    %11 = vector.load %arg4[%c0_7, %c0_8, %c0_9] : memref<1x2x128xf32, #tpu.memory_space<vmem>>, vector<1x2x128xf32>
    tpu.vector_store %arg4[%c0_7, %c0_8, %c0_9], %10 {strides = array<i32>} : memref<1x2x128xf32, #tpu.memory_space<vmem>>, vector<1x2x128xf32>,
    return
  }
  func.func @transform_0(%arg0: i32) -> (i32, i32) {
    %c0_i32 = arith.constant 0 : i32
    %c0_i32_0 = arith.constant 0 : i32
    return %arg0, %c0_i32 : i32, i32
  }
  func.func @transform_1(%arg0: i32) -> (i32, i32) {
    %c0_i32 = arith.constant 0 : i32
    %c0_i32_0 = arith.constant 0 : i32
    %c0_i32_1 = arith.constant 0 : i32
    return %c0_i32, %c0_i32_0 : i32, i32
  }
  func.func @transform_2(%arg0: i32) -> (i32, i32) {
    %c0_i32 = arith.constant 0 : i32
    %c0_i32_0 = arith.constant 0 : i32
    return %arg0, %c0_i32 : i32, i32
  }
  func.func @transform_3(%arg0: i32) -> (i32, i32, i32) {
    %c0_i32 = arith.constant 0 : i32
    %c0_i32_0 = arith.constant 0 : i32
    %c0_i32_1 = arith.constant 0 : i32
    return %arg0, %c0_i32, %c0_i32_0 : i32, i32, i32
  }
}

module attributes {stable_mosaic.version = 11 : i64} {
  func.func @_bn_lrelu_kernel(%arg0: i32, %arg1: memref<128x128xf32, #tpu.memory_space<vmem>>, %arg2: memref<1x128xf32, #tpu.memory_space<vmem>>, %arg3: memref<1x128xf32, #tpu.memory_space<vmem>>, %arg4: memref<128x128xbf16, #tpu.memory_space<vmem>>) attributes {dimension_semantics = [#tpu.dimension_semantics<parallel>], iteration_bounds = array<i64: 1>, scalar_prefetch = 0 : i64, scratch_operands = 0 : i64, tpu.core_type = #tpu.core_type<tc>, window_params = [{transform_indices = @transform_0, window_bounds = array<i64: 128, 128>}, {pipeline_mode = #tpu.pipeline_mode<synchronous>, transform_indices = @transform_1, window_bounds = array<i64: 1, 128>}, {pipeline_mode = #tpu.pipeline_mode<synchronous>, transform_indices = @transform_2, window_bounds = array<i64: 1, 128>}, {transform_indices = @transform_3, window_bounds = array<i64: 128, 128>}]} {
    %c0 = arith.constant 0 : index
    %c0_0 = arith.constant 0 : index
    %0 = vector.load %arg1[%c0, %c0_0] : memref<128x128xf32, #tpu.memory_space<vmem>>, vector<128x128xf32>
    %c0_1 = arith.constant 0 : index
    %c0_2 = arith.constant 0 : index
    %1 = vector.load %arg2[%c0_1, %c0_2] : memref<1x128xf32, #tpu.memory_space<vmem>>, vector<1x128xf32>
    %2 = vector.broadcast %1 : vector<1x128xf32> to vector<128x128xf32>
    %3 = arith.mulf %0, %2 : vector<128x128xf32>
    %c0_3 = arith.constant 0 : index
    %c0_4 = arith.constant 0 : index
    %4 = vector.load %arg3[%c0_3, %c0_4] : memref<1x128xf32, #tpu.memory_space<vmem>>, vector<1x128xf32>
    %5 = vector.broadcast %4 : vector<1x128xf32> to vector<128x128xf32>
    %6 = arith.addf %3, %5 : vector<128x128xf32>
    %cst = arith.constant 0.000000e+00 : f32
    %7 = vector.broadcast %cst : f32 to vector<128x128xf32>
    %8 = arith.cmpf oge, %6, %7 : vector<128x128xf32>
    %cst_5 = arith.constant 2.000000e-01 : f32
    %9 = vector.broadcast %cst_5 : f32 to vector<128x128xf32>
    %10 = arith.mulf %9, %6 : vector<128x128xf32>
    %11 = arith.select %8, %6, %10 : vector<128x128xi1>, vector<128x128xf32>
    %12 = arith.truncf %11 : vector<128x128xf32> to vector<128x128xbf16>
    %c0_6 = arith.constant 0 : index
    %c0_7 = arith.constant 0 : index
    %13 = vector.load %arg4[%c0_6, %c0_7] : memref<128x128xbf16, #tpu.memory_space<vmem>>, vector<128x128xbf16>
    tpu.vector_store %arg4[%c0_6, %c0_7], %12 {strides = array<i32>} : memref<128x128xbf16, #tpu.memory_space<vmem>>, vector<128x128xbf16>,
    return
  }
  func.func @transform_0(%arg0: i32) -> (i32, i32) {
    %c0_i32 = arith.constant 0 : i32
    %c0_i32_0 = arith.constant 0 : i32
    return %arg0, %c0_i32 : i32, i32
  }
  func.func @transform_1(%arg0: i32) -> (i32, i32) {
    %c0_i32 = arith.constant 0 : i32
    %c0_i32_0 = arith.constant 0 : i32
    %c0_i32_1 = arith.constant 0 : i32
    return %c0_i32, %c0_i32_0 : i32, i32
  }
  func.func @transform_2(%arg0: i32) -> (i32, i32) {
    %c0_i32 = arith.constant 0 : i32
    %c0_i32_0 = arith.constant 0 : i32
    %c0_i32_1 = arith.constant 0 : i32
    return %c0_i32, %c0_i32_0 : i32, i32
  }
  func.func @transform_3(%arg0: i32) -> (i32, i32) {
    %c0_i32 = arith.constant 0 : i32
    %c0_i32_0 = arith.constant 0 : i32
    return %arg0, %c0_i32 : i32, i32
  }
}

module attributes {stable_mosaic.version = 11 : i64} {
  func.func @_conv_stats_kernel(%arg0: i32, %arg1: memref<16x1024xbf16, #tpu.memory_space<vmem>>, %arg2: memref<1024x128xbf16, #tpu.memory_space<vmem>>, %arg3: memref<16x128xf32, #tpu.memory_space<vmem>>, %arg4: memref<1x2x128xf32, #tpu.memory_space<vmem>>) attributes {dimension_semantics = [#tpu.dimension_semantics<parallel>], iteration_bounds = array<i64: 1>, scalar_prefetch = 0 : i64, scratch_operands = 0 : i64, tpu.core_type = #tpu.core_type<tc>, window_params = [{transform_indices = @transform_0, window_bounds = array<i64: 16, 1024>}, {pipeline_mode = #tpu.pipeline_mode<synchronous>, transform_indices = @transform_1, window_bounds = array<i64: 1024, 128>}, {transform_indices = @transform_2, window_bounds = array<i64: 16, 128>}, {transform_indices = @transform_3, window_bounds = array<i64: 1, 2, 128>}]} {
    %c0 = arith.constant 0 : index
    %c0_0 = arith.constant 0 : index
    %0 = vector.load %arg1[%c0, %c0_0] : memref<16x1024xbf16, #tpu.memory_space<vmem>>, vector<16x1024xbf16>
    %c0_1 = arith.constant 0 : index
    %c0_2 = arith.constant 0 : index
    %1 = vector.load %arg2[%c0_1, %c0_2] : memref<1024x128xbf16, #tpu.memory_space<vmem>>, vector<1024x128xbf16>
    %cst = arith.constant dense<0.000000e+00> : vector<16x128xf32>
    %2 = tpu.matmul %0, %1, %cst {dimension_numbers = #tpu.dot_dimension_numbers<[1], [0], [0], [1], [0, 0, 1, 1], [], []>} : vector<16x1024xbf16>, vector<1024x128xbf16>, vector<16x128xf32> -> vector<16x128xf32>
    %c0_3 = arith.constant 0 : index
    %c0_4 = arith.constant 0 : index
    %3 = vector.load %arg3[%c0_3, %c0_4] : memref<16x128xf32, #tpu.memory_space<vmem>>, vector<16x128xf32>
    tpu.vector_store %arg3[%c0_3, %c0_4], %2 {strides = array<i32>} : memref<16x128xf32, #tpu.memory_space<vmem>>, vector<16x128xf32>,
    %cst_5 = arith.constant dense<0.000000e+00> : vector<128xf32>
    %4 = vector.multi_reduction <add>, %2, %cst_5 [0] : vector<16x128xf32> to vector<128xf32>
    %5 = vector.shape_cast %4 : vector<128xf32> to vector<1x128xf32>
    %6 = arith.mulf %2, %2 : vector<16x128xf32>
    %cst_6 = arith.constant dense<0.000000e+00> : vector<128xf32>
    %7 = vector.multi_reduction <add>, %6, %cst_6 [0] : vector<16x128xf32> to vector<128xf32>
    %8 = vector.shape_cast %7 : vector<128xf32> to vector<1x128xf32>
    %9 = tpu.concatenate %5, %8 in 0 : vector<1x128xf32>, vector<1x128xf32> -> vector<2x128xf32>
    %10 = vector.shape_cast %9 : vector<2x128xf32> to vector<1x2x128xf32>
    %c0_7 = arith.constant 0 : index
    %c0_8 = arith.constant 0 : index
    %c0_9 = arith.constant 0 : index
    %11 = vector.load %arg4[%c0_7, %c0_8, %c0_9] : memref<1x2x128xf32, #tpu.memory_space<vmem>>, vector<1x2x128xf32>
    tpu.vector_store %arg4[%c0_7, %c0_8, %c0_9], %10 {strides = array<i32>} : memref<1x2x128xf32, #tpu.memory_space<vmem>>, vector<1x2x128xf32>,
    return
  }
  func.func @transform_0(%arg0: i32) -> (i32, i32) {
    %c0_i32 = arith.constant 0 : i32
    %c0_i32_0 = arith.constant 0 : i32
    return %arg0, %c0_i32 : i32, i32
  }
  func.func @transform_1(%arg0: i32) -> (i32, i32) {
    %c0_i32 = arith.constant 0 : i32
    %c0_i32_0 = arith.constant 0 : i32
    %c0_i32_1 = arith.constant 0 : i32
    return %c0_i32, %c0_i32_0 : i32, i32
  }
  func.func @transform_2(%arg0: i32) -> (i32, i32) {
    %c0_i32 = arith.constant 0 : i32
    %c0_i32_0 = arith.constant 0 : i32
    return %arg0, %c0_i32 : i32, i32
  }
  func.func @transform_3(%arg0: i32) -> (i32, i32, i32) {
    %c0_i32 = arith.constant 0 : i32
    %c0_i32_0 = arith.constant 0 : i32
    %c0_i32_1 = arith.constant 0 : i32
    return %arg0, %c0_i32, %c0_i32_0 : i32, i32, i32
  }
}

module attributes {stable_mosaic.version = 11 : i64} {
  func.func @_bn_lrelu_kernel(%arg0: i32, %arg1: memref<16x128xf32, #tpu.memory_space<vmem>>, %arg2: memref<1x128xf32, #tpu.memory_space<vmem>>, %arg3: memref<1x128xf32, #tpu.memory_space<vmem>>, %arg4: memref<16x128xbf16, #tpu.memory_space<vmem>>) attributes {dimension_semantics = [#tpu.dimension_semantics<parallel>], iteration_bounds = array<i64: 1>, scalar_prefetch = 0 : i64, scratch_operands = 0 : i64, tpu.core_type = #tpu.core_type<tc>, window_params = [{transform_indices = @transform_0, window_bounds = array<i64: 16, 128>}, {pipeline_mode = #tpu.pipeline_mode<synchronous>, transform_indices = @transform_1, window_bounds = array<i64: 1, 128>}, {pipeline_mode = #tpu.pipeline_mode<synchronous>, transform_indices = @transform_2, window_bounds = array<i64: 1, 128>}, {transform_indices = @transform_3, window_bounds = array<i64: 16, 128>}]} {
    %c0 = arith.constant 0 : index
    %c0_0 = arith.constant 0 : index
    %0 = vector.load %arg1[%c0, %c0_0] : memref<16x128xf32, #tpu.memory_space<vmem>>, vector<16x128xf32>
    %c0_1 = arith.constant 0 : index
    %c0_2 = arith.constant 0 : index
    %1 = vector.load %arg2[%c0_1, %c0_2] : memref<1x128xf32, #tpu.memory_space<vmem>>, vector<1x128xf32>
    %2 = vector.broadcast %1 : vector<1x128xf32> to vector<16x128xf32>
    %3 = arith.mulf %0, %2 : vector<16x128xf32>
    %c0_3 = arith.constant 0 : index
    %c0_4 = arith.constant 0 : index
    %4 = vector.load %arg3[%c0_3, %c0_4] : memref<1x128xf32, #tpu.memory_space<vmem>>, vector<1x128xf32>
    %5 = vector.broadcast %4 : vector<1x128xf32> to vector<16x128xf32>
    %6 = arith.addf %3, %5 : vector<16x128xf32>
    %cst = arith.constant 0.000000e+00 : f32
    %7 = vector.broadcast %cst : f32 to vector<16x128xf32>
    %8 = arith.cmpf oge, %6, %7 : vector<16x128xf32>
    %cst_5 = arith.constant 2.000000e-01 : f32
    %9 = vector.broadcast %cst_5 : f32 to vector<16x128xf32>
    %10 = arith.mulf %9, %6 : vector<16x128xf32>
    %11 = arith.select %8, %6, %10 : vector<16x128xi1>, vector<16x128xf32>
    %12 = arith.truncf %11 : vector<16x128xf32> to vector<16x128xbf16>
    %c0_6 = arith.constant 0 : index
    %c0_7 = arith.constant 0 : index
    %13 = vector.load %arg4[%c0_6, %c0_7] : memref<16x128xbf16, #tpu.memory_space<vmem>>, vector<16x128xbf16>
    tpu.vector_store %arg4[%c0_6, %c0_7], %12 {strides = array<i32>} : memref<16x128xbf16, #tpu.memory_space<vmem>>, vector<16x128xbf16>,
    return
  }
  func.func @transform_0(%arg0: i32) -> (i32, i32) {
    %c0_i32 = arith.constant 0 : i32
    %c0_i32_0 = arith.constant 0 : i32
    return %arg0, %c0_i32 : i32, i32
  }
  func.func @transform_1(%arg0: i32) -> (i32, i32) {
    %c0_i32 = arith.constant 0 : i32
    %c0_i32_0 = arith.constant 0 : i32
    %c0_i32_1 = arith.constant 0 : i32
    return %c0_i32, %c0_i32_0 : i32, i32
  }
  func.func @transform_2(%arg0: i32) -> (i32, i32) {
    %c0_i32 = arith.constant 0 : i32
    %c0_i32_0 = arith.constant 0 : i32
    %c0_i32_1 = arith.constant 0 : i32
    return %c0_i32, %c0_i32_0 : i32, i32
  }
  func.func @transform_3(%arg0: i32) -> (i32, i32) {
    %c0_i32 = arith.constant 0 : i32
    %c0_i32_0 = arith.constant 0 : i32
    return %arg0, %c0_i32 : i32, i32
  }
}

module attributes {stable_mosaic.version = 11 : i64} {
  func.func @_conv_stats_kernel(%arg0: i32, %arg1: memref<2x2048xbf16, #tpu.memory_space<vmem>>, %arg2: memref<2048x128xbf16, #tpu.memory_space<vmem>>, %arg3: memref<2x128xf32, #tpu.memory_space<vmem>>, %arg4: memref<1x2x128xf32, #tpu.memory_space<vmem>>) attributes {dimension_semantics = [#tpu.dimension_semantics<parallel>], iteration_bounds = array<i64: 1>, scalar_prefetch = 0 : i64, scratch_operands = 0 : i64, tpu.core_type = #tpu.core_type<tc>, window_params = [{transform_indices = @transform_0, window_bounds = array<i64: 2, 2048>}, {pipeline_mode = #tpu.pipeline_mode<synchronous>, transform_indices = @transform_1, window_bounds = array<i64: 2048, 128>}, {transform_indices = @transform_2, window_bounds = array<i64: 2, 128>}, {transform_indices = @transform_3, window_bounds = array<i64: 1, 2, 128>}]} {
    %c0 = arith.constant 0 : index
    %c0_0 = arith.constant 0 : index
    %0 = vector.load %arg1[%c0, %c0_0] : memref<2x2048xbf16, #tpu.memory_space<vmem>>, vector<2x2048xbf16>
    %c0_1 = arith.constant 0 : index
    %c0_2 = arith.constant 0 : index
    %1 = vector.load %arg2[%c0_1, %c0_2] : memref<2048x128xbf16, #tpu.memory_space<vmem>>, vector<2048x128xbf16>
    %cst = arith.constant dense<0.000000e+00> : vector<2x128xf32>
    %2 = tpu.matmul %0, %1, %cst {dimension_numbers = #tpu.dot_dimension_numbers<[1], [0], [0], [1], [0, 0, 1, 1], [], []>} : vector<2x2048xbf16>, vector<2048x128xbf16>, vector<2x128xf32> -> vector<2x128xf32>
    %c0_3 = arith.constant 0 : index
    %c0_4 = arith.constant 0 : index
    %3 = vector.load %arg3[%c0_3, %c0_4] : memref<2x128xf32, #tpu.memory_space<vmem>>, vector<2x128xf32>
    tpu.vector_store %arg3[%c0_3, %c0_4], %2 {strides = array<i32>} : memref<2x128xf32, #tpu.memory_space<vmem>>, vector<2x128xf32>,
    %cst_5 = arith.constant dense<0.000000e+00> : vector<128xf32>
    %4 = vector.multi_reduction <add>, %2, %cst_5 [0] : vector<2x128xf32> to vector<128xf32>
    %5 = vector.shape_cast %4 : vector<128xf32> to vector<1x128xf32>
    %6 = arith.mulf %2, %2 : vector<2x128xf32>
    %cst_6 = arith.constant dense<0.000000e+00> : vector<128xf32>
    %7 = vector.multi_reduction <add>, %6, %cst_6 [0] : vector<2x128xf32> to vector<128xf32>
    %8 = vector.shape_cast %7 : vector<128xf32> to vector<1x128xf32>
    %9 = tpu.concatenate %5, %8 in 0 : vector<1x128xf32>, vector<1x128xf32> -> vector<2x128xf32>
    %10 = vector.shape_cast %9 : vector<2x128xf32> to vector<1x2x128xf32>
    %c0_7 = arith.constant 0 : index
    %c0_8 = arith.constant 0 : index
    %c0_9 = arith.constant 0 : index
    %11 = vector.load %arg4[%c0_7, %c0_8, %c0_9] : memref<1x2x128xf32, #tpu.memory_space<vmem>>, vector<1x2x128xf32>
    tpu.vector_store %arg4[%c0_7, %c0_8, %c0_9], %10 {strides = array<i32>} : memref<1x2x128xf32, #tpu.memory_space<vmem>>, vector<1x2x128xf32>,
    return
  }
  func.func @transform_0(%arg0: i32) -> (i32, i32) {
    %c0_i32 = arith.constant 0 : i32
    %c0_i32_0 = arith.constant 0 : i32
    return %arg0, %c0_i32 : i32, i32
  }
  func.func @transform_1(%arg0: i32) -> (i32, i32) {
    %c0_i32 = arith.constant 0 : i32
    %c0_i32_0 = arith.constant 0 : i32
    %c0_i32_1 = arith.constant 0 : i32
    return %c0_i32, %c0_i32_0 : i32, i32
  }
  func.func @transform_2(%arg0: i32) -> (i32, i32) {
    %c0_i32 = arith.constant 0 : i32
    %c0_i32_0 = arith.constant 0 : i32
    return %arg0, %c0_i32 : i32, i32
  }
  func.func @transform_3(%arg0: i32) -> (i32, i32, i32) {
    %c0_i32 = arith.constant 0 : i32
    %c0_i32_0 = arith.constant 0 : i32
    %c0_i32_1 = arith.constant 0 : i32
    return %arg0, %c0_i32, %c0_i32_0 : i32, i32, i32
  }
}

module attributes {stable_mosaic.version = 11 : i64} {
  func.func @_linear_sigmoid_kernel(%arg0: i32, %arg1: memref<2x64xbf16, #tpu.memory_space<vmem>>, %arg2: memref<64x128xbf16, #tpu.memory_space<vmem>>, %arg3: memref<2x128xf32, #tpu.memory_space<vmem>>) attributes {dimension_semantics = [#tpu.dimension_semantics<arbitrary>], iteration_bounds = array<i64: 1>, scalar_prefetch = 0 : i64, scratch_operands = 0 : i64, tpu.core_type = #tpu.core_type<tc>, window_params = [{pipeline_mode = #tpu.pipeline_mode<synchronous>, transform_indices = @transform_0, window_bounds = array<i64: 2, 64>}, {pipeline_mode = #tpu.pipeline_mode<synchronous>, transform_indices = @transform_1, window_bounds = array<i64: 64, 128>}, {pipeline_mode = #tpu.pipeline_mode<synchronous>, transform_indices = @transform_2, window_bounds = array<i64: 2, 128>}]} {
    %c0 = arith.constant 0 : index
    %c0_0 = arith.constant 0 : index
    %0 = vector.load %arg1[%c0, %c0_0] : memref<2x64xbf16, #tpu.memory_space<vmem>>, vector<2x64xbf16>
    %c0_1 = arith.constant 0 : index
    %c0_2 = arith.constant 0 : index
    %1 = vector.load %arg2[%c0_1, %c0_2] : memref<64x128xbf16, #tpu.memory_space<vmem>>, vector<64x128xbf16>
    %cst = arith.constant dense<0.000000e+00> : vector<2x128xf32>
    %2 = tpu.matmul %0, %1, %cst {dimension_numbers = #tpu.dot_dimension_numbers<[1], [0], [0], [1], [0, 0, 1, 1], [], []>} : vector<2x64xbf16>, vector<64x128xbf16>, vector<2x128xf32> -> vector<2x128xf32>
    %cst_3 = arith.constant 0.000000e+00 : f32
    %3 = vector.broadcast %cst_3 : f32 to vector<2x128xf32>
    %4 = arith.subf %3, %2 : vector<2x128xf32>
    %5 = math.exp %4 : vector<2x128xf32>
    %cst_4 = arith.constant 1.000000e+00 : f32
    %6 = vector.broadcast %cst_4 : f32 to vector<2x128xf32>
    %7 = arith.addf %6, %5 : vector<2x128xf32>
    %cst_5 = arith.constant 1.000000e+00 : f32
    %8 = vector.broadcast %cst_5 : f32 to vector<2x128xf32>
    %9 = arith.divf %8, %7 : vector<2x128xf32>
    %c0_6 = arith.constant 0 : index
    %c0_7 = arith.constant 0 : index
    %10 = vector.load %arg3[%c0_6, %c0_7] : memref<2x128xf32, #tpu.memory_space<vmem>>, vector<2x128xf32>
    tpu.vector_store %arg3[%c0_6, %c0_7], %9 {strides = array<i32>} : memref<2x128xf32, #tpu.memory_space<vmem>>, vector<2x128xf32>,
    return
  }
  func.func @transform_0(%arg0: i32) -> (i32, i32) {
    %c0_i32 = arith.constant 0 : i32
    %c0_i32_0 = arith.constant 0 : i32
    %c0_i32_1 = arith.constant 0 : i32
    return %c0_i32, %c0_i32_0 : i32, i32
  }
  func.func @transform_1(%arg0: i32) -> (i32, i32) {
    %c0_i32 = arith.constant 0 : i32
    %c0_i32_0 = arith.constant 0 : i32
    %c0_i32_1 = arith.constant 0 : i32
    return %c0_i32, %c0_i32_0 : i32, i32
  }
  func.func @transform_2(%arg0: i32) -> (i32, i32) {
    %c0_i32 = arith.constant 0 : i32
    %c0_i32_0 = arith.constant 0 : i32
    %c0_i32_1 = arith.constant 0 : i32
    return %c0_i32, %c0_i32_0 : i32, i32
  }
}

module attributes {stable_mosaic.version = 11 : i64} {
  func.func @_bn_lrelu_kernel(%arg0: i32, %arg1: memref<2x128xf32, #tpu.memory_space<vmem>>, %arg2: memref<1x128xf32, #tpu.memory_space<vmem>>, %arg3: memref<1x128xf32, #tpu.memory_space<vmem>>, %arg4: memref<2x128xbf16, #tpu.memory_space<vmem>>) attributes {dimension_semantics = [#tpu.dimension_semantics<parallel>], iteration_bounds = array<i64: 1>, scalar_prefetch = 0 : i64, scratch_operands = 0 : i64, tpu.core_type = #tpu.core_type<tc>, window_params = [{transform_indices = @transform_0, window_bounds = array<i64: 2, 128>}, {pipeline_mode = #tpu.pipeline_mode<synchronous>, transform_indices = @transform_1, window_bounds = array<i64: 1, 128>}, {pipeline_mode = #tpu.pipeline_mode<synchronous>, transform_indices = @transform_2, window_bounds = array<i64: 1, 128>}, {transform_indices = @transform_3, window_bounds = array<i64: 2, 128>}]} {
    %c0 = arith.constant 0 : index
    %c0_0 = arith.constant 0 : index
    %0 = vector.load %arg1[%c0, %c0_0] : memref<2x128xf32, #tpu.memory_space<vmem>>, vector<2x128xf32>
    %c0_1 = arith.constant 0 : index
    %c0_2 = arith.constant 0 : index
    %1 = vector.load %arg2[%c0_1, %c0_2] : memref<1x128xf32, #tpu.memory_space<vmem>>, vector<1x128xf32>
    %2 = vector.broadcast %1 : vector<1x128xf32> to vector<2x128xf32>
    %3 = arith.mulf %0, %2 : vector<2x128xf32>
    %c0_3 = arith.constant 0 : index
    %c0_4 = arith.constant 0 : index
    %4 = vector.load %arg3[%c0_3, %c0_4] : memref<1x128xf32, #tpu.memory_space<vmem>>, vector<1x128xf32>
    %5 = vector.broadcast %4 : vector<1x128xf32> to vector<2x128xf32>
    %6 = arith.addf %3, %5 : vector<2x128xf32>
    %cst = arith.constant 0.000000e+00 : f32
    %7 = vector.broadcast %cst : f32 to vector<2x128xf32>
    %8 = arith.cmpf oge, %6, %7 : vector<2x128xf32>
    %cst_5 = arith.constant 2.000000e-01 : f32
    %9 = vector.broadcast %cst_5 : f32 to vector<2x128xf32>
    %10 = arith.mulf %9, %6 : vector<2x128xf32>
    %11 = arith.select %8, %6, %10 : vector<2x128xi1>, vector<2x128xf32>
    %12 = arith.truncf %11 : vector<2x128xf32> to vector<2x128xbf16>
    %c0_6 = arith.constant 0 : index
    %c0_7 = arith.constant 0 : index
    %13 = vector.load %arg4[%c0_6, %c0_7] : memref<2x128xbf16, #tpu.memory_space<vmem>>, vector<2x128xbf16>
    tpu.vector_store %arg4[%c0_6, %c0_7], %12 {strides = array<i32>} : memref<2x128xbf16, #tpu.memory_space<vmem>>, vector<2x128xbf16>,
    return
  }
  func.func @transform_0(%arg0: i32) -> (i32, i32) {
    %c0_i32 = arith.constant 0 : i32
    %c0_i32_0 = arith.constant 0 : i32
    return %arg0, %c0_i32 : i32, i32
  }
  func.func @transform_1(%arg0: i32) -> (i32, i32) {
    %c0_i32 = arith.constant 0 : i32
    %c0_i32_0 = arith.constant 0 : i32
    %c0_i32_1 = arith.constant 0 : i32
    return %c0_i32, %c0_i32_0 : i32, i32
  }
  func.func @transform_2(%arg0: i32) -> (i32, i32) {
    %c0_i32 = arith.constant 0 : i32
    %c0_i32_0 = arith.constant 0 : i32
    %c0_i32_1 = arith.constant 0 : i32
    return %c0_i32, %c0_i32_0 : i32, i32
  }
  func.func @transform_3(%arg0: i32) -> (i32, i32) {
    %c0_i32 = arith.constant 0 : i32
    %c0_i32_0 = arith.constant 0 : i32
    return %arg0, %c0_i32 : i32, i32
  }
}

</mosaic_0001>

<bundles_post_ra>
// kernel: _lambda_.9
= control target key start
LH: loop header
LB: loop body
LE: loop exit
PB: predicated region body
PF: predicated region fallthrough
CT: control target
= control target key end

     0   :  { %s1671_s12 = smov 0   ;;  %s2251_s0 = inlined_call_operand.vmem [shape: bf16[1024,192], index: 0, kind: input, shape index: {}]   ;;  %s2252_s1 = inlined_call_operand.vmem [shape: bf16[192,128], index: 1, kind: input, shape index: {}]   ;;  %s2253_s2 = inlined_call_operand.vmem [shape: f32[1024,128], index: 2, kind: output, shape index: {0}]   ;;  %s2254_s3 = inlined_call_operand.vmem [shape: f32[2,2,128], index: 3, kind: output, shape index: {1}]  }
   0x1 LB: > { %s1677_s13 = sadd.s32 4294967295, %s1648_s12   ;;  %p1383_p0 = scmp.ge.s32.totalorder %s1648_s12, 1  ;;  %s1648_s12 = sphi %s1671_s12, %s14_s12  }
   0x2   : > { %p142_p1 = scmp.lt.s32.totalorder %s1648_s12, 3 }
   0x4   : > { %p143_p2 = pnand %p1383_p0, %p142_p1 }
   0x5   : > { %s1384_s16 = sshll.u32 (!%p143_p2), %s1677_s13, 6  ;;  %p184_p4 = scmp.lt.s32.totalorder (!%p143_p2), %s1677_s13, 1 }
   0x6   : > { %146 = sbr.rel (%p143_p2) target bundleno = 459 (0x1cb), region = 28  ;;  %p172_p3 = scmp.lt.s32.totalorder (!%p143_p2), %s1384_s16, 127 }
   0xb   : > { %v1534_v0 = vld [vmem:[%s2252_s1 + $0x38] sm:$0xff]   ;;  %v1650_v1 = vmov 0   ;;  %v1535_v2 = vld [vmem:[%s2252_s1 + $0x30] sm:$0xff]   ;;  %s2256_s16 = smov (!%p172_p3, %s1384_s16), 127  ;;  %v1536_v3 = vld [vmem:[%s2252_s1 + $0x28] sm:$0xff]   ;;  %vm637_vm0 = vcmask 523264  }
   0xc   : > { %734 = vmatprep.subr.bf16.mxu0 %v1650_v1  ;;  %1501 = vmatprep.subr.bf16.mxu1 %v1650_v1  ;;  %s1500_s21 = sshll.u32 %s2256_s16, 3  ;;  %v1537_v4 = vld [vmem:[%s2252_s1 + $0x20] sm:$0xff]   ;;  %v1538_v6 = vld [vmem:[%s2252_s1 + $0x18] sm:$0xff]   ;;  %v1539_v7 = vld [vmem:[%s2252_s1 + $0x10] sm:$0xff]   ;;  %s2258_s13 = smov (!%p184_p4, %s1677_s13), 1  ;;  %vm1289_vm1 = vcmask 1040384  }
   0xd   : > { %735 = vmatpush1.bf16.msra.mxu0 %v1534_v0  ;;  %1513 = vmatpush1.bf16.msra.mxu1 %v1534_v0  ;;  %s1708_s26 = scalar_lea.vmem %s2251_s0, %s1500_s21  ;;  %v1540_v8 = vld [vmem:[%s2252_s1 + $0x8] sm:$0xff]   ;;  %v1541_v10 = vld [vmem:[%s2252_s1] sm:$0xff]   ;;  %v1542_v11 = vld [vmem:[%s2252_s1 + $0x58] sm:$0xff]   ;;  %s1853_s22 = scalar_lea.vmem %s2253_s2, %s1500_s21 }
   0xe   : > { %736 = vmatprep.subr.bf16.mxu0 %v1650_v1  ;;  %1502 = vmatprep.subr.bf16.mxu1 %v1650_v1  ;;  %v1548_v5 = vld [vmem:[%s1708_s26 + $0x4] ss:$8 sps:$4 sm:$0xff]   ;;  %v1543_v12 = vld [vmem:[%s2252_s1 + $0x50] sm:$0xff]   ;;  %v1546_v15 = vld [vmem:[%s1708_s26] ss:$8 sps:$4 sm:$0xff]   ;;  %s1389_s16 = sshll.u32 %s2258_s13, 1 }
   0xf   : > { %1466 = vmatprep.mubr.msk.bf16.mxu0 %vm637_vm0, %v1548_v5  ;;  %v1572_v9 = vld [vmem:[%s1708_s26 + $0x104] ss:$8 sps:$4 sm:$0xff]   ;;  %v1570_v16 = vld [vmem:[%s1708_s26 + $0x100] ss:$8 sps:$4 sm:$0xff]   ;;  %v1549_v17 = vld [vmem:[%s1708_s26 + $0x14] ss:$8 sps:$4 sm:$0xff]   ;;  %s187_s24 = scalar_lea.vmem %s2254_s3, %s1389_s16 }
  0x10   : > { %1482 = vmatprep.mubr.msk.bf16.mxu1 %vm637_vm0, %v1572_v9  ;;  %v1544_v13 = vld [vmem:[%s2252_s1 + $0x48] sm:$0xff]   ;;  %v1545_v14 = vld [vmem:[%s2252_s1 + $0x40] sm:$0xff]   ;;  %v1576_v18 = vld [vmem:[%s1708_s26 + $0x114] ss:$8 sps:$4 sm:$0xff]  }
  0x11   : > { %737 = vmatpush1.bf16.msra.mxu0 %v1535_v2  ;;  %1514 = vmatpush1.bf16.msra.mxu1 %v1535_v2  ;;  %v1551_v19 = vld [vmem:[%s1708_s26 + $0x10] ss:$8 sps:$4 sm:$0xff]   ;;  %v1552_v21 = vld [vmem:[%s1708_s26 + $0x24] ss:$8 sps:$4 sm:$0xff]   ;;  %v1554_v23 = vld [vmem:[%s1708_s26 + $0x20] ss:$8 sps:$4 sm:$0xff]  }
  0x12   : > { %738 = vmatprep.subr.bf16.mxu0 %v1650_v1  ;;  %1503 = vmatprep.subr.bf16.mxu1 %v1650_v1  ;;  %v1578_v20 = vld [vmem:[%s1708_s26 + $0x110] ss:$8 sps:$4 sm:$0xff]   ;;  %v1582_v22 = vld [vmem:[%s1708_s26 + $0x124] ss:$8 sps:$4 sm:$0xff]   ;;  %v1584_v24 = vld [vmem:[%s1708_s26 + $0x120] ss:$8 sps:$4 sm:$0xff]  }
  0x13   : > { %v1555_v25 = vld [vmem:[%s1708_s26 + $0x34] ss:$8 sps:$4 sm:$0xff]   ;;  %v1557_v27 = vld [vmem:[%s1708_s26 + $0x30] ss:$8 sps:$4 sm:$0xff]   ;;  %v1558_v29 = vld [vmem:[%s1708_s26 + $0x44] ss:$8 sps:$4 sm:$0xff]  }
  0x14   : > { %v1588_v26 = vld [vmem:[%s1708_s26 + $0x134] ss:$8 sps:$4 sm:$0xff]   ;;  %v1590_v28 = vld [vmem:[%s1708_s26 + $0x130] ss:$8 sps:$4 sm:$0xff]   ;;  %v1594_v30 = vld [vmem:[%s1708_s26 + $0x144] ss:$8 sps:$4 sm:$0xff]  }
  0x15   : > { %739 = vmatpush1.bf16.msra.mxu0 %v1536_v3  ;;  %1515 = vmatpush1.bf16.msra.mxu1 %v1536_v3  ;;  %v1560_v31 = vld [vmem:[%s1708_s26 + $0x40] ss:$8 sps:$4 sm:$0xff]   ;;  %v1561_v33 = vld [vmem:[%s1708_s26 + $0x54] ss:$8 sps:$4 sm:$0xff]   ;;  %v1563_v35 = vld [vmem:[%s1708_s26 + $0x50] ss:$8 sps:$4 sm:$0xff]  }
  0x16   : > { %740 = vmatprep.subr.bf16.mxu0 %v1650_v1  ;;  %1504 = vmatprep.subr.bf16.mxu1 %v1650_v1  ;;  %v1596_v32 = vld [vmem:[%s1708_s26 + $0x140] ss:$8 sps:$4 sm:$0xff]   ;;  %v1600_v34 = vld [vmem:[%s1708_s26 + $0x154] ss:$8 sps:$4 sm:$0xff]   ;;  %v1602_v36 = vld [vmem:[%s1708_s26 + $0x150] ss:$8 sps:$4 sm:$0xff]  }
  0x17   : > { %v1564_v37 = vld [vmem:[%s1708_s26 + $0x64] ss:$8 sps:$4 sm:$0xff]   ;;  %v1566_v39 = vld [vmem:[%s1708_s26 + $0x60] ss:$8 sps:$4 sm:$0xff]   ;;  %v1567_v41 = vld [vmem:[%s1708_s26 + $0x74] ss:$8 sps:$4 sm:$0xff]  }
  0x18   : > { %v1606_v38 = vld [vmem:[%s1708_s26 + $0x164] ss:$8 sps:$4 sm:$0xff]   ;;  %v1608_v40 = vld [vmem:[%s1708_s26 + $0x160] ss:$8 sps:$4 sm:$0xff]   ;;  %v1612_v42 = vld [vmem:[%s1708_s26 + $0x174] ss:$8 sps:$4 sm:$0xff]  }
  0x19   : > { %741 = vmatpush1.bf16.msra.mxu0 %v1537_v4  ;;  %1516 = vmatpush1.bf16.msra.mxu1 %v1537_v4  ;;  %v1569_v43 = vld [vmem:[%s1708_s26 + $0x70] ss:$8 sps:$4 sm:$0xff]   ;;  %v1573_v45 = vld [vmem:[%s1708_s26 + $0x84] ss:$8 sps:$4 sm:$0xff]   ;;  %v1575_v47 = vld [vmem:[%s1708_s26 + $0x80] ss:$8 sps:$4 sm:$0xff]  }
  0x1a   : > { %742 = vmatprep.subr.bf16.mxu0 %v1650_v1  ;;  %1505 = vmatprep.subr.bf16.mxu1 %v1650_v1  ;;  %v1614_v44 = vld [vmem:[%s1708_s26 + $0x170] ss:$8 sps:$4 sm:$0xff]   ;;  %v1618_v46 = vld [vmem:[%s1708_s26 + $0x184] ss:$8 sps:$4 sm:$0xff]   ;;  %v1620_v48 = vld [vmem:[%s1708_s26 + $0x180] ss:$8 sps:$4 sm:$0xff]  }
  0x1b   : > { %v1579_v49 = vld [vmem:[%s1708_s26 + $0x94] ss:$8 sps:$4 sm:$0xff]   ;;  %v1581_v51 = vld [vmem:[%s1708_s26 + $0x90] ss:$8 sps:$4 sm:$0xff]   ;;  %v1585_v53 = vld [vmem:[%s1708_s26 + $0xa4] ss:$8 sps:$4 sm:$0xff]  }
  0x1c   : > { %v1621_v50 = vld [vmem:[%s1708_s26 + $0x194] ss:$8 sps:$4 sm:$0xff]   ;;  %v1623_v52 = vld [vmem:[%s1708_s26 + $0x190] ss:$8 sps:$4 sm:$0xff]   ;;  %v1624_v54 = vld [vmem:[%s1708_s26 + $0x1a4] ss:$8 sps:$4 sm:$0xff]  }
  0x1d   : > { %743 = vmatpush1.bf16.msra.mxu0 %v1538_v6  ;;  %1517 = vmatpush1.bf16.msra.mxu1 %v1538_v6  ;;  %v1587_v55 = vld [vmem:[%s1708_s26 + $0xa0] ss:$8 sps:$4 sm:$0xff]   ;;  %v1591_v57 = vld [vmem:[%s1708_s26 + $0xb4] ss:$8 sps:$4 sm:$0xff]   ;;  %v1593_v59 = vld [vmem:[%s1708_s26 + $0xb0] ss:$8 sps:$4 sm:$0xff]  }
  0x1e   : > { %744 = vmatprep.subr.bf16.mxu0 %v1650_v1  ;;  %1506 = vmatprep.subr.bf16.mxu1 %v1650_v1  ;;  %v1626_v56 = vld [vmem:[%s1708_s26 + $0x1a0] ss:$8 sps:$4 sm:$0xff]   ;;  %v1627_v58 = vld [vmem:[%s1708_s26 + $0x1b4] ss:$8 sps:$4 sm:$0xff]   ;;  %v1629_v60 = vld [vmem:[%s1708_s26 + $0x1b0] ss:$8 sps:$4 sm:$0xff]  }
  0x1f   : > { %v1597_v61 = vld [vmem:[%s1708_s26 + $0xc4] ss:$8 sps:$4 sm:$0xff]   ;;  %v1599_v63 = vld [vmem:[%s1708_s26 + $0xc0] ss:$8 sps:$4 sm:$0xff]   ;;  %v1633_v2 = vld [vmem:[%s1708_s26 + $0x1d4] ss:$8 sps:$4 sm:$0xff]  }
  0x20   : > { %v1630_v62 = vld [vmem:[%s1708_s26 + $0x1c4] ss:$8 sps:$4 sm:$0xff]   ;;  %v1632_v0 = vld [vmem:[%s1708_s26 + $0x1c0] ss:$8 sps:$4 sm:$0xff]   ;;  %v1605_v3 = vld [vmem:[%s1708_s26 + $0xd0] ss:$8 sps:$4 sm:$0xff]  }
  0x21   : > { %745 = vmatpush1.bf16.msra.mxu0 %v1539_v7  ;;  %1518 = vmatpush1.bf16.msra.mxu1 %v1539_v7  ;;  %v1635_v4 = vld [vmem:[%s1708_s26 + $0x1d0] ss:$8 sps:$4 sm:$0xff]   ;;  %v1609_v5 = vld [vmem:[%s1708_s26 + $0xe4] ss:$8 sps:$4 sm:$0xff]   ;;  %v1611_v7 = vld [vmem:[%s1708_s26 + $0xe0] ss:$8 sps:$4 sm:$0xff]  }
  0x22   : > { %746 = vmatprep.subr.bf16.mxu0 %v1650_v1  ;;  %1507 = vmatprep.subr.bf16.mxu1 %v1650_v1  ;;  %v1636_v6 = vld [vmem:[%s1708_s26 + $0x1e4] ss:$8 sps:$4 sm:$0xff]   ;;  %v1615_v9 = vld [vmem:[%s1708_s26 + $0xf4] ss:$8 sps:$4 sm:$0xff]  }
  0x25   : > { %747 = vmatpush1.bf16.msra.mxu0 %v1540_v8  ;;  %1519 = vmatpush1.bf16.msra.mxu1 %v1540_v8  ;;  %v1638_v8 = vld [vmem:[%s1708_s26 + $0x1e0] ss:$8 sps:$4 sm:$0xff]  }
  0x26   : > { %748 = vmatprep.subr.bf16.mxu0 %v1650_v1  ;;  %1508 = vmatprep.subr.bf16.mxu1 %v1650_v1 }
  0x29   : > { %749 = vmatpush1.bf16.msra.mxu0 %v1541_v10  ;;  %1520 = vmatpush1.bf16.msra.mxu1 %v1541_v10  ;;  %v1639_v10 = vld [vmem:[%s1708_s26 + $0x1f4] ss:$8 sps:$4 sm:$0xff]  }
  0x2a   : > { %758 = vmatprep.subr.bf16.mxu0 %v1650_v1  ;;  %1509 = vmatprep.subr.bf16.mxu1 %v1650_v1 }
  0x2d   : > { %759 = vmatpush2.bf16.msra.mxu0 %v1542_v11  ;;  %1521 = vmatpush2.bf16.msra.mxu1 %v1542_v11  ;;  %v1617_v11 = vld [vmem:[%s1708_s26 + $0xf0] ss:$8 sps:$4 sm:$0xff]  }
  0x2e   : > { %760 = vmatprep.subr.bf16.mxu0 %v1650_v1  ;;  %1510 = vmatprep.subr.bf16.mxu1 %v1650_v1 }
  0x31   : > { %761 = vmatpush2.bf16.msra.mxu0 %v1543_v12  ;;  %1522 = vmatpush2.bf16.msra.mxu1 %v1543_v12  ;;  %v1641_v12 = vld [vmem:[%s1708_s26 + $0x1f0] ss:$8 sps:$4 sm:$0xff]  }
  0x32   : > { %762 = vmatprep.subr.bf16.mxu0 %v1650_v1  ;;  %1511 = vmatprep.subr.bf16.mxu1 %v1650_v1 }
  0x35   : > { %763 = vmatpush2.bf16.msra.mxu0 %v1544_v13  ;;  %1523 = vmatpush2.bf16.msra.mxu1 %v1544_v13 }
  0x36   : > { %764 = vmatprep.subr.bf16.mxu0 %v1650_v1  ;;  %1512 = vmatprep.subr.bf16.mxu1 %v1650_v1  ;;  %v1603_v1 = vld [vmem:[%s1708_s26 + $0xd4] ss:$8 sps:$4 sm:$0xff]  }
  0x39   : > { %765 = vmatpush2.bf16.msra.mxu0 %v1545_v14  ;;  %1524 = vmatpush2.bf16.msra.mxu1 %v1545_v14 }
  0x3c   : > { %767 = vmatmul.mubr.bf16.vlgmr.msra.gmra.mxu0 %v1546_v15  ;;  %895 = vmatmul.mubr.bf16.vlgmr.msra.gmra.mxu1 %v1570_v16 }
  0x3d   : > { %1467 = vmatprep.mubr.msk.bf16.mxu0 %vm637_vm0, %v1549_v17  ;;  %1483 = vmatprep.mubr.msk.bf16.mxu1 %vm637_vm0, %v1576_v18 }
  0x44   : > { %775 = vmatmul.mubr.bf16.gmra.mxu0 %v1551_v19  ;;  %903 = vmatmul.mubr.bf16.gmra.mxu1 %v1578_v20 }
  0x45   : > { %1468 = vmatprep.mubr.msk.bf16.mxu0 %vm637_vm0, %v1552_v21  ;;  %1484 = vmatprep.mubr.msk.bf16.mxu1 %vm637_vm0, %v1582_v22 }
  0x4c   : > { %783 = vmatmul.mubr.bf16.gmra.mxu0 %v1554_v23  ;;  %911 = vmatmul.mubr.bf16.gmra.mxu1 %v1584_v24 }
  0x4d   : > { %1469 = vmatprep.mubr.msk.bf16.mxu0 %vm637_vm0, %v1555_v25  ;;  %1485 = vmatprep.mubr.msk.bf16.mxu1 %vm637_vm0, %v1588_v26 }
  0x54   : > { %791 = vmatmul.mubr.bf16.gmra.mxu0 %v1557_v27  ;;  %919 = vmatmul.mubr.bf16.gmra.mxu1 %v1590_v28 }
  0x55   : > { %1470 = vmatprep.mubr.msk.bf16.mxu0 %vm637_vm0, %v1558_v29  ;;  %1486 = vmatprep.mubr.msk.bf16.mxu1 %vm637_vm0, %v1594_v30 }
  0x5c   : > { %799 = vmatmul.mubr.bf16.gmra.mxu0 %v1560_v31  ;;  %927 = vmatmul.mubr.bf16.gmra.mxu1 %v1596_v32 }
  0x5d   : > { %1471 = vmatprep.mubr.msk.bf16.mxu0 %vm637_vm0, %v1561_v33  ;;  %1487 = vmatprep.mubr.msk.bf16.mxu1 %vm637_vm0, %v1600_v34 }
  0x64   : > { %807 = vmatmul.mubr.bf16.gmra.mxu0 %v1563_v35  ;;  %935 = vmatmul.mubr.bf16.gmra.mxu1 %v1602_v36 }
  0x65   : > { %1472 = vmatprep.mubr.msk.bf16.mxu0 %vm637_vm0, %v1564_v37  ;;  %1488 = vmatprep.mubr.msk.bf16.mxu1 %vm637_vm0, %v1606_v38 }
  0x6c   : > { %815 = vmatmul.mubr.bf16.gmra.mxu0 %v1566_v39  ;;  %943 = vmatmul.mubr.bf16.gmra.mxu1 %v1608_v40 }
  0x6d   : > { %1473 = vmatprep.mubr.msk.bf16.mxu0 %vm637_vm0, %v1567_v41  ;;  %1489 = vmatprep.mubr.msk.bf16.mxu1 %vm637_vm0, %v1612_v42 }
  0x74   : > { %823 = vmatmul.mubr.bf16.gmra.mxu0 %v1569_v43  ;;  %951 = vmatmul.mubr.bf16.gmra.mxu1 %v1614_v44 }
  0x75   : > { %1474 = vmatprep.mubr.msk.bf16.mxu0 %vm637_vm0, %v1573_v45  ;;  %1490 = vmatprep.mubr.msk.bf16.mxu1 %vm637_vm0, %v1618_v46 }
  0x7c   : > { %831 = vmatmul.mubr.bf16.gmra.mxu0 %v1575_v47  ;;  %959 = vmatmul.mubr.bf16.gmra.mxu1 %v1620_v48 }
  0x7d   : > { %1475 = vmatprep.mubr.msk.bf16.mxu0 %vm637_vm0, %v1579_v49  ;;  %1491 = vmatprep.mubr.msk.bf16.mxu1 %vm637_vm0, %v1621_v50 }
  0x84   : > { %839 = vmatmul.mubr.bf16.gmra.mxu0 %v1581_v51  ;;  %967 = vmatmul.mubr.bf16.gmra.mxu1 %v1623_v52 }
  0x85   : > { %1476 = vmatprep.mubr.msk.bf16.mxu0 %vm637_vm0, %v1585_v53  ;;  %1492 = vmatprep.mubr.msk.bf16.mxu1 %vm637_vm0, %v1624_v54 }
  0x8c   : > { %847 = vmatmul.mubr.bf16.gmra.mxu0 %v1587_v55  ;;  %975 = vmatmul.mubr.bf16.gmra.mxu1 %v1626_v56 }
  0x8d   : > { %1477 = vmatprep.mubr.msk.bf16.mxu0 %vm637_vm0, %v1591_v57  ;;  %1493 = vmatprep.mubr.msk.bf16.mxu1 %vm637_vm0, %v1627_v58 }
  0x94   : > { %855 = vmatmul.mubr.bf16.gmra.mxu0 %v1593_v59  ;;  %983 = vmatmul.mubr.bf16.gmra.mxu1 %v1629_v60 }
  0x95   : > { %1478 = vmatprep.mubr.msk.bf16.mxu0 %vm637_vm0, %v1597_v61  ;;  %1494 = vmatprep.mubr.msk.bf16.mxu1 %vm637_vm0, %v1630_v62 }
  0x9c   : > { %863 = vmatmul.mubr.bf16.gmra.mxu0 %v1599_v63  ;;  %991 = vmatmul.mubr.bf16.gmra.mxu1 %v1632_v0 }
  0x9d   : > { %1479 = vmatprep.mubr.msk.bf16.mxu0 %vm637_vm0, %v1603_v1  ;;  %1495 = vmatprep.mubr.msk.bf16.mxu1 %vm637_vm0, %v1633_v2 }
  0xa4   : > { %871 = vmatmul.mubr.bf16.gmra.mxu0 %v1605_v3  ;;  %999 = vmatmul.mubr.bf16.gmra.mxu1 %v1635_v4 }
  0xa5   : > { %1480 = vmatprep.mubr.msk.bf16.mxu0 %vm637_vm0, %v1609_v5  ;;  %1496 = vmatprep.mubr.msk.bf16.mxu1 %vm637_vm0, %v1636_v6 }
  0xac   : > { %879 = vmatmul.mubr.bf16.gmra.mxu0 %v1611_v7  ;;  %1007 = vmatmul.mubr.bf16.gmra.mxu1 %v1638_v8 }
  0xad   : > { %1481 = vmatprep.mubr.msk.bf16.mxu0 %vm637_vm0, %v1615_v9  ;;  %1497 = vmatprep.mubr.msk.bf16.mxu1 %vm637_vm0, %v1639_v10 }
  0xb4   : > { %887 = vmatmul.mubr.bf16.gmra.mxu0 %v1617_v11  ;;  %1015 = vmatmul.mubr.bf16.gmra.mxu1 %v1641_v12 }
  0xfc   : > { %v1855_v13 = vpop.f32.mrf.mxu0  ;;  %v1857_v14 = vpop.f32.mrf.mxu1 }
  0xfd   : > { %1023 = vst [vmem:[%s1853_s22] sm:$0xff] %v1855_v13  ;;  %1055 = vst [vmem:[%s1853_s22 + $0x100] sm:$0xff] %v1857_v14 }
  0xfe   : > { %v770_v15 = vpop.f32.mrf.mxu0  ;;  %v898_v16 = vpop.f32.mrf.mxu1 }
 0x100   : > { %v1863_v17 = vpop.f32.mrf.mxu0  ;;  %v1865_v18 = vpop.f32.mrf.mxu1 }
 0x101   : > { %1024 = vst [vmem:[%s1853_s22 + $0x8] sm:$0xff] %v1863_v17  ;;  %1056 = vst [vmem:[%s1853_s22 + $0x108] sm:$0xff] %v1865_v18  ;;  %v1157_v15 = vmul.f32 %v1863_v17, %v1863_v17 }
 0x102   : > { %v773_v19 = vpop.f32.mrf.mxu0  ;;  %v901_v20 = vpop.f32.mrf.mxu1 }
 0x103   : > { %v1156_v20 = vmul.f32 %v1855_v13, %v1855_v13 }
 0x104   : > { %v1871_v21 = vpop.f32.mrf.mxu0  ;;  %v1873_v22 = vpop.f32.mrf.mxu1 }
 0x105   : > { %1025 = vst [vmem:[%s1853_s22 + $0x10] sm:$0xff] %v1871_v21  ;;  %1057 = vst [vmem:[%s1853_s22 + $0x110] sm:$0xff] %v1873_v22 }
 0x106   : > { %v778_v23 = vpop.f32.mrf.mxu0  ;;  %v906_v24 = vpop.f32.mrf.mxu1 }
 0x107   : > { %v1087_v23 = vadd.f32 %v1863_v17, %v1855_v13  ;;  %v1158_v24 = vmul.f32 %v1871_v21, %v1871_v21 }
 0x108   : > { %v1879_v25 = vpop.f32.mrf.mxu0  ;;  %v1881_v26 = vpop.f32.mrf.mxu1 }
 0x109   : > { %1026 = vst [vmem:[%s1853_s22 + $0x18] sm:$0xff] %v1879_v25  ;;  %1058 = vst [vmem:[%s1853_s22 + $0x118] sm:$0xff] %v1881_v26 }
 0x10a   : > { %v781_v27 = vpop.f32.mrf.mxu0  ;;  %v909_v28 = vpop.f32.mrf.mxu1 }
 0x10c   : > { %v1887_v29 = vpop.f32.mrf.mxu0  ;;  %v1889_v30 = vpop.f32.mrf.mxu1 }
 0x10d   : > { %1027 = vst [vmem:[%s1853_s22 + $0x20] sm:$0xff] %v1887_v29  ;;  %1059 = vst [vmem:[%s1853_s22 + $0x120] sm:$0xff] %v1889_v30 }
 0x10e   : > { %v786_v31 = vpop.f32.mrf.mxu0  ;;  %v914_v32 = vpop.f32.mrf.mxu1 }
 0x10f   : > { %v1220_v31 = vadd.f32 %v1157_v15, %v1156_v20  ;;  %v1088_v32 = vadd.f32 %v1087_v23, %v1871_v21 }
 0x110   : > { %v1895_v33 = vpop.f32.mrf.mxu0  ;;  %v1897_v34 = vpop.f32.mrf.mxu1 }
 0x111   : > { %1028 = vst [vmem:[%s1853_s22 + $0x28] sm:$0xff] %v1895_v33  ;;  %1060 = vst [vmem:[%s1853_s22 + $0x128] sm:$0xff] %v1897_v34  ;;  %v1221_v13 = vadd.f32 %v1220_v31, %v1158_v24  ;;  %v1089_v17 = vadd.f32 %v1088_v32, %v1879_v25 }
 0x112   : > { %v789_v35 = vpop.f32.mrf.mxu0  ;;  %v917_v36 = vpop.f32.mrf.mxu1 }
 0x113   : > { %v1159_v35 = vmul.f32 %v1879_v25, %v1879_v25 }
 0x114   : > { %v1903_v37 = vpop.f32.mrf.mxu0  ;;  %v1905_v38 = vpop.f32.mrf.mxu1 }
 0x115   : > { %1029 = vst [vmem:[%s1853_s22 + $0x30] sm:$0xff] %v1903_v37  ;;  %1061 = vst [vmem:[%s1853_s22 + $0x130] sm:$0xff] %v1905_v38 }
 0x116   : > { %v794_v39 = vpop.f32.mrf.mxu0  ;;  %v922_v40 = vpop.f32.mrf.mxu1 }
 0x117   : > { %v1160_v40 = vmul.f32 %v1887_v29, %v1887_v29 }
 0x118   : > { %v1911_v41 = vpop.f32.mrf.mxu0  ;;  %v1913_v42 = vpop.f32.mrf.mxu1 }
 0x119   : > { %1030 = vst [vmem:[%s1853_s22 + $0x38] sm:$0xff] %v1911_v41  ;;  %1062 = vst [vmem:[%s1853_s22 + $0x138] sm:$0xff] %v1913_v42 }
 0x11a   : > { %v797_v43 = vpop.f32.mrf.mxu0  ;;  %v925_v44 = vpop.f32.mrf.mxu1 }
 0x11b   : > { %v1222_v44 = vadd.f32 %v1221_v13, %v1159_v35 }
 0x11c   : > { %v1919_v45 = vpop.f32.mrf.mxu0  ;;  %v1921_v46 = vpop.f32.mrf.mxu1 }
 0x11d   : > { %1031 = vst [vmem:[%s1853_s22 + $0x40] sm:$0xff] %v1919_v45  ;;  %1063 = vst [vmem:[%s1853_s22 + $0x140] sm:$0xff] %v1921_v46  ;;  %v1223_v25 = vadd.f32 %v1222_v44, %v1160_v40 }
 0x11e   : > { %v802_v47 = vpop.f32.mrf.mxu0  ;;  %v930_v48 = vpop.f32.mrf.mxu1 }
 0x11f   : > { %v1090_v47 = vadd.f32 %v1089_v17, %v1887_v29  ;;  %v1161_v48 = vmul.f32 %v1895_v33, %v1895_v33 }
 0x120   : > { %v1927_v49 = vpop.f32.mrf.mxu0  ;;  %v1929_v50 = vpop.f32.mrf.mxu1 }
 0x121   : > { %1032 = vst [vmem:[%s1853_s22 + $0x48] sm:$0xff] %v1927_v49  ;;  %1064 = vst [vmem:[%s1853_s22 + $0x148] sm:$0xff] %v1929_v50  ;;  %v1165_v20 = vmul.f32 %v1927_v49, %v1927_v49 }
 0x122   : > { %v805_v51 = vpop.f32.mrf.mxu0  ;;  %v933_v52 = vpop.f32.mrf.mxu1 }
 0x124   : > { %v1935_v53 = vpop.f32.mrf.mxu0  ;;  %v1937_v54 = vpop.f32.mrf.mxu1 }
 0x125   : > { %1033 = vst [vmem:[%s1853_s22 + $0x50] sm:$0xff] %v1935_v53  ;;  %1065 = vst [vmem:[%s1853_s22 + $0x150] sm:$0xff] %v1937_v54 }
 0x126   : > { %v810_v55 = vpop.f32.mrf.mxu0  ;;  %v938_v56 = vpop.f32.mrf.mxu1 }
 0x127   : > { %v1091_v55 = vadd.f32 %v1090_v47, %v1895_v33  ;;  %v1162_v56 = vmul.f32 %v1903_v37, %v1903_v37 }
 0x128   : > { %v1943_v57 = vpop.f32.mrf.mxu0  ;;  %v1945_v58 = vpop.f32.mrf.mxu1 }
 0x129   : > { %1034 = vst [vmem:[%s1853_s22 + $0x58] sm:$0xff] %v1943_v57  ;;  %1066 = vst [vmem:[%s1853_s22 + $0x158] sm:$0xff] %v1945_v58  ;;  %v1167_v13 = vmul.f32 %v1943_v57, %v1943_v57 }
 0x12a   : > { %v813_v59 = vpop.f32.mrf.mxu0  ;;  %v941_v60 = vpop.f32.mrf.mxu1 }
 0x12b   : > { %v1224_v60 = vadd.f32 %v1223_v25, %v1161_v48 }
 0x12c   : > { %v1951_v61 = vpop.f32.mrf.mxu0  ;;  %v1953_v62 = vpop.f32.mrf.mxu1 }
 0x12d   : > { %1035 = vst [vmem:[%s1853_s22 + $0x60] sm:$0xff] %v1951_v61  ;;  %1067 = vst [vmem:[%s1853_s22 + $0x160] sm:$0xff] %v1953_v62  ;;  %v1225_v33 = vadd.f32 %v1224_v60, %v1162_v56 }
 0x12e   : > { %v818_v63 = vpop.f32.mrf.mxu0  ;;  %v946_v0 = vpop.f32.mrf.mxu1 }
 0x12f   : > { %v1092_v63 = vadd.f32 %v1091_v55, %v1903_v37  ;;  %v1163_v0 = vmul.f32 %v1911_v41, %v1911_v41 }
 0x130   : > { %v1959_v1 = vpop.f32.mrf.mxu0  ;;  %v1961_v2 = vpop.f32.mrf.mxu1 }
 0x131   : > { %1036 = vst [vmem:[%s1853_s22 + $0x68] sm:$0xff] %v1959_v1  ;;  %1068 = vst [vmem:[%s1853_s22 + $0x168] sm:$0xff] %v1961_v2  ;;  %v1169_v25 = vmul.f32 %v1959_v1, %v1959_v1 }
 0x132   : > { %v821_v3 = vpop.f32.mrf.mxu0  ;;  %v949_v4 = vpop.f32.mrf.mxu1 }
 0x134   : > { %v1967_v5 = vpop.f32.mrf.mxu0  ;;  %v1969_v6 = vpop.f32.mrf.mxu1 }
 0x135   : > { %1037 = vst [vmem:[%s1853_s22 + $0x70] sm:$0xff] %v1967_v5  ;;  %1069 = vst [vmem:[%s1853_s22 + $0x170] sm:$0xff] %v1969_v6 }
 0x136   : > { %v826_v7 = vpop.f32.mrf.mxu0  ;;  %v954_v8 = vpop.f32.mrf.mxu1 }
 0x137   : > { %v1093_v7 = vadd.f32 %v1092_v63, %v1911_v41  ;;  %v1164_v8 = vmul.f32 %v1919_v45, %v1919_v45 }
 0x138   : > { %v1975_v9 = vpop.f32.mrf.mxu0  ;;  %v1977_v10 = vpop.f32.mrf.mxu1 }
 0x139   : > { %1038 = vst [vmem:[%s1853_s22 + $0x78] sm:$0xff] %v1975_v9  ;;  %1070 = vst [vmem:[%s1853_s22 + $0x178] sm:$0xff] %v1977_v10  ;;  %v1094_v15 = vadd.f32 %v1093_v7, %v1919_v45 }
 0x13a   : > { %v829_v11 = vpop.f32.mrf.mxu0  ;;  %v957_v12 = vpop.f32.mrf.mxu1 }
 0x13b   : > { %v1226_v12 = vadd.f32 %v1225_v33, %v1163_v0  ;;  %v1171_v33 = vmul.f32 %v1975_v9, %v1975_v9 }
 0x13c   : > { %v1985_v16 = vpop.f32.mrf.mxu0  ;;  %v1987_v19 = vpop.f32.mrf.mxu1 }
 0x13d   : > { %1039 = vst [vmem:[%s1853_s22 + $0x80] sm:$0xff] %v1985_v16  ;;  %1071 = vst [vmem:[%s1853_s22 + $0x180] sm:$0xff] %v1987_v19  ;;  %v1227_v41 = vadd.f32 %v1226_v12, %v1164_v8 }
 0x13e   : > { %v834_v27 = vpop.f32.mrf.mxu0  ;;  %v962_v28 = vpop.f32.mrf.mxu1 }
 0x13f   : > { %v1095_v27 = vadd.f32 %v1094_v15, %v1927_v49  ;;  %v1166_v28 = vmul.f32 %v1935_v53, %v1935_v53  ;;  %v1228_v32 = vadd.f32 %v1227_v41, %v1165_v20 }
 0x140   : > { %v2002_v36 = vpop.f32.mrf.mxu0  ;;  %v2004_v39 = vpop.f32.mrf.mxu1 }
 0x141   : > { %1040 = vst [vmem:[%s1853_s22 + $0x88] sm:$0xff] %v2002_v36  ;;  %1072 = vst [vmem:[%s1853_s22 + $0x188] sm:$0xff] %v2004_v39  ;;  %v1096_v35 = vadd.f32 %v1095_v27, %v1935_v53  ;;  %v1229_v49 = vadd.f32 %v1228_v32, %v1166_v28  ;;  %v1173_v41 = vmul.f32 %v2002_v36, %v2002_v36 }
 0x142   : > { %v837_v21 = vpop.f32.mrf.mxu0  ;;  %v965_v43 = vpop.f32.mrf.mxu1 }
 0x143   : > { %v1097_v21 = vadd.f32 %v1096_v35, %v1943_v57  ;;  %v1168_v43 = vmul.f32 %v1951_v61, %v1951_v61  ;;  %v1230_v47 = vadd.f32 %v1229_v49, %v1167_v13 }
 0x144   : > { %v2016_v51 = vpop.f32.mrf.mxu0  ;;  %v2018_v52 = vpop.f32.mrf.mxu1 }
 0x145   : > { %1041 = vst [vmem:[%s1853_s22 + $0x90] sm:$0xff] %v2016_v51  ;;  %1073 = vst [vmem:[%s1853_s22 + $0x190] sm:$0xff] %v2018_v52  ;;  %v1098_v48 = vadd.f32 %v1097_v21, %v1951_v61  ;;  %v1231_v57 = vadd.f32 %v1230_v47, %v1168_v43 }
 0x146   : > { %v842_v29 = vpop.f32.mrf.mxu0  ;;  %v970_v59 = vpop.f32.mrf.mxu1 }
 0x147   : > { %v1099_v29 = vadd.f32 %v1098_v48, %v1959_v1  ;;  %v1170_v59 = vmul.f32 %v1967_v5, %v1967_v5  ;;  %v1232_v61 = vadd.f32 %v1231_v57, %v1169_v25 }
 0x148   : > { %v2030_v3 = vpop.f32.mrf.mxu0  ;;  %v2032_v4 = vpop.f32.mrf.mxu1 }
 0x149   : > { %1042 = vst [vmem:[%s1853_s22 + $0x98] sm:$0xff] %v2030_v3  ;;  %1074 = vst [vmem:[%s1853_s22 + $0x198] sm:$0xff] %v2032_v4  ;;  %v1100_v0 = vadd.f32 %v1099_v29, %v1967_v5  ;;  %v1175_v49 = vmul.f32 %v2030_v3, %v2030_v3 }
 0x14a   : > { %v845_v37 = vpop.f32.mrf.mxu0  ;;  %v973_v11 = vpop.f32.mrf.mxu1 }
 0x14b   : > { %v1233_v37 = vadd.f32 %v1232_v61, %v1170_v59  ;;  %v1101_v1 = vadd.f32 %v1100_v0, %v1975_v9  ;;  %v1172_v11 = vmul.f32 %v1985_v16, %v1985_v16 }
 0x14c   : > { %v2044_v23 = vpop.f32.mrf.mxu0  ;;  %v2046_v24 = vpop.f32.mrf.mxu1 }
 0x14d   : > { %1043 = vst [vmem:[%s1853_s22 + $0xa0] sm:$0xff] %v2044_v23  ;;  %1075 = vst [vmem:[%s1853_s22 + $0x1a0] sm:$0xff] %v2046_v24  ;;  %v1234_v5 = vadd.f32 %v1233_v37, %v1171_v33  ;;  %v1102_v20 = vadd.f32 %v1101_v1, %v1985_v16 }
 0x14e   : > { %v850_v45 = vpop.f32.mrf.mxu0  ;;  %v978_v31 = vpop.f32.mrf.mxu1 }
 0x14f   : > { %v1235_v45 = vadd.f32 %v1234_v5, %v1172_v11  ;;  %v1103_v9 = vadd.f32 %v1102_v20, %v2002_v36  ;;  %v1174_v31 = vmul.f32 %v2016_v51, %v2016_v51 }
 0x150   : > { %v2058_v17 = vpop.f32.mrf.mxu0  ;;  %v2060_v40 = vpop.f32.mrf.mxu1 }
 0x151   : > { %1044 = vst [vmem:[%s1853_s22 + $0xa8] sm:$0xff] %v2058_v17  ;;  %1076 = vst [vmem:[%s1853_s22 + $0x1a8] sm:$0xff] %v2060_v40  ;;  %v1236_v16 = vadd.f32 %v1235_v45, %v1173_v41  ;;  %v1104_v13 = vadd.f32 %v1103_v9, %v2016_v51  ;;  %v1177_v57 = vmul.f32 %v2058_v17, %v2058_v17 }
 0x152   : > { %v853_v53 = vpop.f32.mrf.mxu0  ;;  %v981_v44 = vpop.f32.mrf.mxu1 }
 0x153   : > { %v1237_v53 = vadd.f32 %v1236_v16, %v1174_v31  ;;  %v1105_v36 = vadd.f32 %v1104_v13, %v2030_v3  ;;  %v1176_v44 = vmul.f32 %v2044_v23, %v2044_v23 }
 0x154   : > { %v856_v55 = vpop.f32.mrf.mxu0  ;;  %v2072_v56 = vpop.f32.mrf.mxu1 }
 0x155   : > { %1045 = vst [vmem:[%s1853_s22 + $0xb0] sm:$0xff] %v856_v55  ;;  %1077 = vst [vmem:[%s1853_s22 + $0x1b0] sm:$0xff] %v2072_v56  ;;  %v1238_v51 = vadd.f32 %v1237_v53, %v1175_v49  ;;  %v1106_v25 = vadd.f32 %v1105_v36, %v2044_v23 }
 0x156   : > { %v858_v60 = vpop.f32.mrf.mxu0  ;;  %v986_v63 = vpop.f32.mrf.mxu1 }
 0x157   : > { %v1239_v60 = vadd.f32 %v1238_v51, %v1176_v44  ;;  %v1107_v3 = vadd.f32 %v1106_v25, %v2058_v17  ;;  %v1178_v63 = vmul.f32 %v856_v55, %v856_v55 }
 0x158   : > { %v859_v7 = vpop.f32.mrf.mxu0  ;;  %v2083_v8 = vpop.f32.mrf.mxu1 }
 0x159   : > { %1046 = vst [vmem:[%s1853_s22 + $0xb8] sm:$0xff] %v859_v7  ;;  %1078 = vst [vmem:[%s1853_s22 + $0x1b8] sm:$0xff] %v2083_v8  ;;  %v1240_v33 = vadd.f32 %v1239_v60, %v1177_v57  ;;  %v1108_v37 = vadd.f32 %v1107_v3, %v856_v55  ;;  %v1179_v23 = vmul.f32 %v859_v7, %v859_v7 }
 0x15a   : > { %v861_v12 = vpop.f32.mrf.mxu0  ;;  %v989_v15 = vpop.f32.mrf.mxu1 }
 0x15b   : > { %v1241_v12 = vadd.f32 %v1240_v33, %v1178_v63  ;;  %v1109_v15 = vadd.f32 %v1108_v37, %v859_v7 }
 0x15c   : > { %v864_v27 = vpop.f32.mrf.mxu0  ;;  %v2094_v28 = vpop.f32.mrf.mxu1 }
 0x15d   : > { %1047 = vst [vmem:[%s1853_s22 + $0xc0] sm:$0xff] %v864_v27  ;;  %1079 = vst [vmem:[%s1853_s22 + $0x1c0] sm:$0xff] %v2094_v28  ;;  %v1180_v5 = vmul.f32 %v864_v27, %v864_v27  ;;  %v1242_v41 = vadd.f32 %v1241_v12, %v1179_v23  ;;  %v1110_v45 = vadd.f32 %v1109_v15, %v864_v27 }
 0x15e   : > { %v866_v32 = vpop.f32.mrf.mxu0  ;;  %v994_v35 = vpop.f32.mrf.mxu1 }
 0x15f   : > { %v1243_v55 = vadd.f32 %v1242_v41, %v1180_v5 }
 0x160   : > { %v867_v21 = vpop.f32.mrf.mxu0  ;;  %v2105_v43 = vpop.f32.mrf.mxu1 }
 0x161   : > { %1048 = vst [vmem:[%s1853_s22 + $0xc8] sm:$0xff] %v867_v21  ;;  %1080 = vst [vmem:[%s1853_s22 + $0x1c8] sm:$0xff] %v2105_v43  ;;  %v1181_v9 = vmul.f32 %v867_v21, %v867_v21  ;;  %v1111_v35 = vadd.f32 %v1110_v45, %v867_v21 }
 0x162   : > { %v869_v47 = vpop.f32.mrf.mxu0  ;;  %v997_v48 = vpop.f32.mrf.mxu1 }
 0x163   : > { %v1244_v49 = vadd.f32 %v1243_v55, %v1181_v9 }
 0x164   : > { %v872_v29 = vpop.f32.mrf.mxu0  ;;  %v2116_v59 = vpop.f32.mrf.mxu1 }
 0x165   : > { %1049 = vst [vmem:[%s1853_s22 + $0xd0] sm:$0xff] %v872_v29  ;;  %1081 = vst [vmem:[%s1853_s22 + $0x1d0] sm:$0xff] %v2116_v59  ;;  %v1182_v16 = vmul.f32 %v872_v29, %v872_v29  ;;  %v1112_v53 = vadd.f32 %v1111_v35, %v872_v29 }
 0x166   : > { %v874_v61 = vpop.f32.mrf.mxu0  ;;  %v1002_v0 = vpop.f32.mrf.mxu1 }
 0x167   : > { %v1245_v47 = vadd.f32 %v1244_v49, %v1182_v16  ;;  %v1189_v16 = vmul.f32 %v1865_v18, %v1865_v18  ;;  %v1190_v49 = vmul.f32 %v1873_v22, %v1873_v22 }
 0x168   : > { %v875_v1 = vpop.f32.mrf.mxu0  ;;  %v2122_v11 = vpop.f32.mrf.mxu1 }
 0x169   : > { %1050 = vst [vmem:[%s1853_s22 + $0xd8] sm:$0xff] %v875_v1  ;;  %1082 = vst [vmem:[%s1853_s22 + $0x1d8] sm:$0xff] %v2122_v11  ;;  %v1183_v36 = vmul.f32 %v875_v1, %v875_v1  ;;  %v1113_v48 = vadd.f32 %v1112_v53, %v875_v1 }
 0x16a   : > { %v877_v17 = vpop.f32.mrf.mxu0  ;;  %v1005_v20 = vpop.f32.mrf.mxu1 }
 0x16b   : > { %v1246_v57 = vadd.f32 %v1245_v47, %v1183_v36 }
 0x16c   : > { %v880_v31 = vpop.f32.mrf.mxu0  ;;  %v2127_v32 = vpop.f32.mrf.mxu1 }
 0x16d   : > { %1051 = vst [vmem:[%s1853_s22 + $0xe0] sm:$0xff] %v880_v31  ;;  %1083 = vst [vmem:[%s1853_s22 + $0x1e0] sm:$0xff] %v2127_v32  ;;  %v1184_v51 = vmul.f32 %v880_v31, %v880_v31  ;;  %v1114_v60 = vadd.f32 %v1113_v48, %v880_v31  ;;  %v1188_v31 = vmul.f32 %v1857_v14, %v1857_v14 }
 0x16e   : > { %v882_v7 = vpop.f32.mrf.mxu0  ;;  %v1010_v13 = vpop.f32.mrf.mxu1 }
 0x16f   : > { %v1247_v61 = vadd.f32 %v1246_v57, %v1184_v51 }
 0x170   : > { %v883_v44 = vpop.f32.mrf.mxu0  ;;  %v2132_v27 = vpop.f32.mrf.mxu1 }
 0x171   : > { %1052 = vst [vmem:[%s1853_s22 + $0xe8] sm:$0xff] %v883_v44  ;;  %1084 = vst [vmem:[%s1853_s22 + $0x1e8] sm:$0xff] %v2132_v27  ;;  %v1185_v3 = vmul.f32 %v883_v44, %v883_v44  ;;  %v1115_v0 = vadd.f32 %v1114_v60, %v883_v44  ;;  %v1191_v44 = vmul.f32 %v1881_v26, %v1881_v26 }
 0x172   : > { %v885_v21 = vpop.f32.mrf.mxu0  ;;  %v1013_v25 = vpop.f32.mrf.mxu1 }
 0x173   : > { %v1248_v1 = vadd.f32 %v1247_v61, %v1185_v3 }
 0x174   : > { %v888_v63 = vpop.f32.mrf.mxu0  ;;  %v2137_v29 = vpop.f32.mrf.mxu1 }
 0x175   : > { %1053 = vst [vmem:[%s1853_s22 + $0xf0] sm:$0xff] %v888_v63  ;;  %v1186_v33 = vmul.f32 %v888_v63, %v888_v63  ;;  %1085 = vst [vmem:[%s1853_s22 + $0x1f0] sm:$0xff] %v2137_v29  ;;  %v1116_v12 = vadd.f32 %v1115_v0, %v888_v63 }
 0x176   : > { %v890_v37 = vpop.f32.mrf.mxu0  ;;  %v1018_v23 = vpop.f32.mrf.mxu1 }
 0x177   : > { %v1249_v17 = vadd.f32 %v1248_v1, %v1186_v33 }
 0x178   : > { %v891_v15 = vpop.f32.mrf.mxu0  ;;  %v2142_v5 = vpop.f32.mrf.mxu1 }
 0x179   : > { %1054 = vst [vmem:[%s1853_s22 + $0xf8] sm:$0xff] %v891_v15  ;;  %v1117_v20 = vadd.f32 %v1116_v12, %v891_v15  ;;  %v1187_v41 = vmul.f32 %v891_v15, %v891_v15  ;;  %1086 = vst [vmem:[%s1853_s22 + $0x1f8] sm:$0xff] %v2142_v5 }
 0x17a   : > { %v893_v45 = vpop.f32.mrf.mxu0  ;;  %v1021_v9 = vpop.f32.mrf.mxu1 }
 0x17b   : > { %v1118_v55 = vadd.f32 %v1117_v20, %v1857_v14  ;;  %v1250_v35 = vadd.f32 %v1249_v17, %v1187_v41  ;;  %v1192_v14 = vmul.f32 %v1889_v30, %v1889_v30 }
 0x17d   : > { %v1119_v7 = vadd.f32 %v1118_v55, %v1865_v18  ;;  %v1251_v13 = vadd.f32 %v1250_v35, %v1188_v31  ;;  %v1193_v18 = vmul.f32 %v1897_v34, %v1897_v34 }
 0x17f   : > { %v1120_v53 = vadd.f32 %v1119_v7, %v1873_v22  ;;  %v1252_v36 = vadd.f32 %v1251_v13, %v1189_v16  ;;  %v1194_v22 = vmul.f32 %v1905_v38, %v1905_v38 }
 0x181   : > { %v1121_v47 = vadd.f32 %v1120_v53, %v1881_v26  ;;  %v1253_v48 = vadd.f32 %v1252_v36, %v1190_v49  ;;  %v1195_v26 = vmul.f32 %v1913_v42, %v1913_v42  ;;  %v1205_v49 = vmul.f32 %v2004_v39, %v2004_v39 }
 0x183   : > { %v1122_v51 = vadd.f32 %v1121_v47, %v1889_v30  ;;  %v1254_v21 = vadd.f32 %v1253_v48, %v1191_v44  ;;  %v1196_v30 = vmul.f32 %v1921_v46, %v1921_v46  ;;  %v1206_v44 = vmul.f32 %v2018_v52, %v2018_v52 }
 0x184   : > { %v1207_v48 = vmul.f32 %v2032_v4, %v2032_v4 }
 0x185   : > { %v1123_v25 = vadd.f32 %v1122_v51, %v1897_v34  ;;  %v1255_v57 = vadd.f32 %v1254_v21, %v1192_v14  ;;  %v1197_v34 = vmul.f32 %v1929_v50, %v1929_v50  ;;  %v1208_v51 = vmul.f32 %v2046_v24, %v2046_v24 }
 0x187   : > { %v1124_v60 = vadd.f32 %v1123_v25, %v1905_v38  ;;  %v1256_v3 = vadd.f32 %v1255_v57, %v1193_v18  ;;  %v1198_v38 = vmul.f32 %v1937_v54, %v1937_v54  ;;  %v1209_v18 = vmul.f32 %v2060_v40, %v2060_v40 }
 0x188   : > { %v1210_v57 = vmul.f32 %v2072_v56, %v2072_v56 }
 0x189   : > { %v1125_v63 = vadd.f32 %v1124_v60, %v1913_v42  ;;  %v1257_v61 = vadd.f32 %v1256_v3, %v1194_v22  ;;  %v1199_v42 = vmul.f32 %v1945_v58, %v1945_v58  ;;  %v1211_v60 = vmul.f32 %v2083_v8, %v2083_v8 }
 0x18b   : > { %v1258_v0 = vadd.f32 %v1257_v61, %v1195_v26  ;;  %v1126_v33 = vadd.f32 %v1125_v63, %v1921_v46  ;;  %v1200_v46 = vmul.f32 %v1953_v62, %v1953_v62  ;;  %v1212_v26 = vmul.f32 %v2094_v28, %v2094_v28 }
 0x18c   : > { %v1213_v61 = vmul.f32 %v2105_v43, %v2105_v43 }
 0x18d   : > { %v1127_v37 = vadd.f32 %v1126_v33, %v1929_v50  ;;  %v1259_v23 = vadd.f32 %v1258_v0, %v1196_v30  ;;  %v1201_v50 = vmul.f32 %v1961_v2, %v1961_v2  ;;  %v1214_v0 = vmul.f32 %v2116_v59, %v2116_v59 }
 0x18f   : > { %v1128_v1 = vadd.f32 %v1127_v37, %v1937_v54  ;;  %v1260_v12 = vadd.f32 %v1259_v23, %v1197_v34  ;;  %v1202_v54 = vmul.f32 %v1969_v6, %v1969_v6  ;;  %v1215_v34 = vmul.f32 %v2122_v11, %v2122_v11 }
 0x190   : > { %v1216_v23 = vmul.f32 %v2127_v32, %v2127_v32 }
 0x191   : > { %v1129_v15 = vadd.f32 %v1128_v1, %v1945_v58  ;;  %v1261_v17 = vadd.f32 %v1260_v12, %v1198_v38  ;;  %v1203_v58 = vmul.f32 %v1977_v10, %v1977_v10 }
 0x193   : > { %v1130_v20 = vadd.f32 %v1129_v15, %v1953_v62  ;;  %v1262_v41 = vadd.f32 %v1261_v17, %v1199_v42  ;;  %v1204_v62 = vmul.f32 %v1987_v19, %v1987_v19  ;;  %v1218_v42 = vmul.f32 %v2137_v29, %v2137_v29 }
 0x194   : > { %v1219_v17 = vmul.f32 %v2142_v5, %v2142_v5 }
 0x195   : > { %v1131_v45 = vadd.f32 %v1130_v20, %v1961_v2  ;;  %v1263_v9 = vadd.f32 %v1262_v41, %v1200_v46 }
 0x197   : > { %v1132_v31 = vadd.f32 %v1131_v45, %v1969_v6  ;;  %v1264_v55 = vadd.f32 %v1263_v9, %v1201_v50 }
 0x199   : > { %v1133_v35 = vadd.f32 %v1132_v31, %v1977_v10  ;;  %v1265_v16 = vadd.f32 %v1264_v55, %v1202_v54 }
 0x19b   : > { %v1134_v7 = vadd.f32 %v1133_v35, %v1987_v19  ;;  %v1266_v13 = vadd.f32 %v1265_v16, %v1203_v58 }
 0x19d   : > { %v1135_v2 = vadd.f32 %v1134_v7, %v2004_v39  ;;  %v1267_v53 = vadd.f32 %v1266_v13, %v1204_v62 }
 0x19f   : > { %v1268_v6 = vadd.f32 %v1267_v53, %v1205_v49  ;;  %v1136_v36 = vadd.f32 %v1135_v2, %v2018_v52 }
 0x1a1   : > { %v1269_v10 = vadd.f32 %v1268_v6, %v1206_v44  ;;  %v1137_v47 = vadd.f32 %v1136_v36, %v2032_v4 }
 0x1a3   : > { %v1270_v19 = vadd.f32 %v1269_v10, %v1207_v48  ;;  %v1138_v14 = vadd.f32 %v1137_v47, %v2046_v24 }
 0x1a5   : > { %v1271_v39 = vadd.f32 %v1270_v19, %v1208_v51  ;;  %v1139_v21 = vadd.f32 %v1138_v14, %v2060_v40 }
 0x1a7   : > { %v1272_v25 = vadd.f32 %v1271_v39, %v1209_v18  ;;  %v1140_v52 = vadd.f32 %v1139_v21, %v2072_v56 }
 0x1a9   : > { %v1273_v22 = vadd.f32 %v1272_v25, %v1210_v57  ;;  %v1141_v4 = vadd.f32 %v1140_v52, %v2083_v8 }
 0x1ab   : > { %v1274_v3 = vadd.f32 %v1273_v22, %v1211_v60  ;;  %v1142_v24 = vadd.f32 %v1141_v4, %v2094_v28 }
 0x1ad   : > { %v1275_v63 = vadd.f32 %v1274_v3, %v1212_v26  ;;  %v1143_v40 = vadd.f32 %v1142_v24, %v2105_v43 }
 0x1af   : > { %v1276_v30 = vadd.f32 %v1275_v63, %v1213_v61  ;;  %v1144_v56 = vadd.f32 %v1143_v40, %v2116_v59  ;;  %v1217_v59 = vmul.f32 %v2132_v27, %v2132_v27 }
 0x1b1   : > { %v1277_v33 = vadd.f32 %v1276_v30, %v1214_v0  ;;  %v1145_v8 = vadd.f32 %v1144_v56, %v2122_v11 }
 0x1b3   : > { %v1278_v28 = vadd.f32 %v1277_v33, %v1215_v34  ;;  %v1146_v37 = vadd.f32 %v1145_v8, %v2127_v32 }
 0x1b5   : > { %v1279_v43 = vadd.f32 %v1278_v28, %v1216_v23  ;;  %v1147_v38 = vadd.f32 %v1146_v37, %v2132_v27 }
 0x1b7   : > { %v1280_v1 = vadd.f32 %v1279_v43, %v1217_v59  ;;  %v1148_v12 = vadd.f32 %v1147_v38, %v2137_v29 }
 0x1b9   : > { %v1281_v11 = vadd.f32 %v1280_v1, %v1218_v42  ;;  %v1149_v15 = vadd.f32 %v1148_v12, %v2142_v5 }
 0x1bb   : > { %v1150_v32 = vrot.slane %v1149_v15, 4  ;;  %v1282_v46 = vadd.f32 %v1281_v11, %v1219_v17 }
 0x1bd   : > { %v1151_v20 = vadd.f32 %v1150_v32, %v1149_v15  ;;  %v1283_v41 = vrot.slane %v1282_v46, 4 }
 0x1bf   : > { %v1152_v50 = vrot.slane %v1151_v20, 2  ;;  %v1284_v45 = vadd.f32 %v1283_v41, %v1282_v46 }
 0x1c1   : > { %v1153_v27 = vadd.f32 %v1152_v50, %v1151_v20  ;;  %v1285_v9 = vrot.slane %v1284_v45, 2 }
 0x1c3   : > { %v1154_v54 = vrot.slane %v1153_v27, 1  ;;  %v1286_v31 = vadd.f32 %v1285_v9, %v1284_v45 }
 0x1c5   : > { %v1287_v29 = vrot.slane %v1286_v31, 1  ;;  %v1155_v5 = vadd.f32 %v1154_v54, %v1153_v27 }
 0x1c7   : > { %v1288_v55 = vadd.f32 %v1287_v29, %v1286_v31 }
 0x1c9   : > { %v1290_v58 = vsel %vm1289_vm1, %v1155_v5, %v1288_v55 }
 0x1ca   : > { %1291 = vst [vmem:[%s187_s24] sm:$0x3] %v1290_v58 }
 0x1cb PF: > { %s14_s12 = sadd.s32 1, %s1648_s12  }
 0x1cc   : > { %p11_p5 = scmp.ge.s32.totalorder %s14_s12, 4  }
 0x1ce   :  { %13 = sbr.rel (!%p11_p5) target bundleno = 1 (0x1), region = 70 }

// kernel: _lambda_.10
= control target key start
LH: loop header
LB: loop body
LE: loop exit
PB: predicated region body
PF: predicated region fallthrough
CT: control target
= control target key end

     0   :  { %s1316_s12 = smov 0   ;;  %s1576_s0 = inlined_call_operand.vmem [shape: f32[1024,128], index: 0, kind: input, shape index: {}]   ;;  %s1577_s1 = inlined_call_operand.vmem [shape: f32[1,128], index: 1, kind: input, shape index: {}]   ;;  %s1578_s2 = inlined_call_operand.vmem [shape: f32[1,128], index: 2, kind: input, shape index: {}]   ;;  %s1579_s3 = inlined_call_operand.vmem [shape: bf16[1024,128], index: 3, kind: output, shape index: {}]  }
   0x1 LB: > { %s948_s13 = sadd.s32 4294967295, %s1294_s12   ;;  %p952_p0 = scmp.ge.s32.totalorder %s1294_s12, 1  ;;  %s1294_s12 = sphi %s1316_s12, %s13_s12  }
   0x2   : > { %p138_p1 = scmp.lt.s32.totalorder %s1294_s12, 3 }
   0x4   : > { %p139_p2 = pnand %p952_p0, %p138_p1 }
   0x5   : > { %s953_s14 = sshll.u32 (!%p139_p2), %s948_s13, 6 }
   0x6   : > { %142 = sbr.rel (%p139_p2) target bundleno = 109 (0x6d), region = 32  ;;  %p163_p3 = scmp.lt.s32.totalorder (!%p139_p2), %s953_s14, 127 }
   0xb   : > { %s1581_s14 = smov (!%p163_p3, %s953_s14), 127  ;;  %v1330_v0 = vld [vmem:[%s1577_s1] ss:$0 sm:$0xff] }
   0xc   : > { %s954_s15 = sshll.u32 %s1581_s14, 3  ;;  %v1340_v1 = vld [vmem:[%s1578_s2] ss:$0 sm:$0xff]  ;;  %s956_s23 = sshll.u32 %s1581_s14, 2 }
   0xd   : > { %s1335_s20 = scalar_lea.vmem %s1576_s0, %s954_s15  ;;  %s1368_s26 = scalar_lea.vmem %s1579_s3, %s956_s23 }
   0xe   : > { %v174_v2 = vld [vmem:[%s1335_s20] sm:$0xff]  ;;  %v175_v3 = vld [vmem:[%s1335_s20 + $0x8] sm:$0xff]  ;;  %v176_v4 = vld [vmem:[%s1335_s20 + $0x10] sm:$0xff] }
   0xf   : > { %v245_v5 = vmul.f32 %v1330_v0, %v174_v2  ;;  %v246_v6 = vmul.f32 %v1330_v0, %v175_v3  ;;  %v177_v7 = vld [vmem:[%s1335_s20 + $0x18] sm:$0xff]  ;;  %v247_v8 = vmul.f32 %v1330_v0, %v176_v4  ;;  %v178_v9 = vld [vmem:[%s1335_s20 + $0x20] sm:$0xff]  ;;  %v179_v10 = vld [vmem:[%s1335_s20 + $0x28] sm:$0xff] }
  0x10   : > { %v248_v11 = vmul.f32 %v1330_v0, %v177_v7  ;;  %v249_v12 = vmul.f32 %v1330_v0, %v178_v9  ;;  %v250_v13 = vmul.f32 %v1330_v0, %v179_v10  ;;  %v180_v14 = vld [vmem:[%s1335_s20 + $0x30] sm:$0xff]  ;;  %v181_v15 = vld [vmem:[%s1335_s20 + $0x38] sm:$0xff]  ;;  %v182_v30 = vld [vmem:[%s1335_s20 + $0x40] sm:$0xff] }
  0x11   : > { %v316_v16 = vadd.f32 %v1340_v1, %v245_v5  ;;  %v317_v17 = vadd.f32 %v1340_v1, %v246_v6  ;;  %v318_v18 = vadd.f32 %v1340_v1, %v247_v8  ;;  %v251_v19 = vmul.f32 %v1330_v0, %v180_v14  ;;  %v183_v31 = vld [vmem:[%s1335_s20 + $0x48] sm:$0xff]  ;;  %v184_v32 = vld [vmem:[%s1335_s20 + $0x50] sm:$0xff]  ;;  %v185_v44 = vld [vmem:[%s1335_s20 + $0x58] sm:$0xff] }
  0x12   : > { %v319_v20 = vadd.f32 %v1340_v1, %v248_v11  ;;  %v320_v21 = vadd.f32 %v1340_v1, %v249_v12  ;;  %v321_v22 = vadd.f32 %v1340_v1, %v250_v13  ;;  %v252_v23 = vmul.f32 %v1330_v0, %v181_v15  ;;  %v186_v46 = vld [vmem:[%s1335_s20 + $0x60] sm:$0xff]  ;;  %v187_v56 = vld [vmem:[%s1335_s20 + $0x68] sm:$0xff]  ;;  %v188_v60 = vld [vmem:[%s1335_s20 + $0x70] sm:$0xff] }
  0x13   : > { %vm380_vm0 = vcmp.ge.f32.partialorder %v316_v16, 0.0  ;;  %vm381_vm1 = vcmp.ge.f32.partialorder %v317_v17, 0.0  ;;  %v444_v24 = vmul.f32 0.2, %v316_v16  ;;  %v445_v25 = vmul.f32 0.2, %v317_v17 }
  0x14   : > { %vm382_vm2 = vcmp.ge.f32.partialorder %v318_v18, 0.0  ;;  %vm383_vm3 = vcmp.ge.f32.partialorder %v319_v20, 0.0  ;;  %v446_v26 = vmul.f32 0.2, %v318_v18  ;;  %v447_v27 = vmul.f32 0.2, %v319_v20 }
  0x15   : > { %v508_v28 = vsel %vm380_vm0, %v316_v16, %v444_v24  ;;  %v509_v29 = vsel %vm381_vm1, %v317_v17, %v445_v25  ;;  %vm384_vm4 = vcmp.ge.f32.partialorder %v320_v21, 0.0  ;;  %vm385_vm5 = vcmp.ge.f32.partialorder %v321_v22, 0.0  ;;  %v189_v6 = vld [vmem:[%s1335_s20 + $0x78] sm:$0xff]  ;;  %v190_v10 = vld [vmem:[%s1335_s20 + $0x80] sm:$0xff] }
  0x16   : > { %v1092_v33 = vpack.c.bf16 %v509_v29, %v508_v28  ;;  %v510_v34 = vsel %vm382_vm2, %v318_v18, %v446_v26  ;;  %v511_v35 = vsel %vm383_vm3, %v319_v20, %v447_v27  ;;  %v448_v36 = vmul.f32 0.2, %v320_v21  ;;  %v191_v18 = vld [vmem:[%s1335_s20 + $0x88] sm:$0xff]  ;;  %v193_v26 = vld [vmem:[%s1335_s20 + $0x98] sm:$0xff] }
  0x17   : > { %v1097_v37 = vpack.c.bf16 %v511_v35, %v510_v34  ;;  %v449_v38 = vmul.f32 0.2, %v321_v22  ;;  %v322_v39 = vadd.f32 %v1340_v1, %v251_v19  ;;  %v323_v40 = vadd.f32 %v1340_v1, %v252_v23  ;;  %v192_v19 = vld [vmem:[%s1335_s20 + $0x90] sm:$0xff] }
  0x18   : > { %1093 = vst [vmem:[%s1368_s26] sm:$0xff] %v1092_v33   ;;  %v512_v41 = vsel %vm384_vm4, %v320_v21, %v448_v36  ;;  %v253_v42 = vmul.f32 %v1330_v0, %v182_v30  ;;  %v254_v43 = vmul.f32 %v1330_v0, %v183_v31  ;;  %v255_v45 = vmul.f32 %v1330_v0, %v184_v32  ;;  %v194_v31 = vld [vmem:[%s1335_s20 + $0xa0] sm:$0xff]  ;;  %v195_v32 = vld [vmem:[%s1335_s20 + $0xa8] sm:$0xff] }
  0x19   : > { %1249 = vst [vmem:[%s1368_s26 + $0x8] sm:$0xff] %v1097_v37   ;;  %v513_v47 = vsel %vm385_vm5, %v321_v22, %v449_v38  ;;  %vm386_vm6 = vcmp.ge.f32.partialorder %v322_v39, 0.0  ;;  %vm387_vm7 = vcmp.ge.f32.partialorder %v323_v40, 0.0  ;;  %v450_v48 = vmul.f32 0.2, %v322_v39 }
  0x1a   : > { %v1102_v49 = vpack.c.bf16 %v513_v47, %v512_v41  ;;  %v451_v50 = vmul.f32 0.2, %v323_v40  ;;  %v324_v51 = vadd.f32 %v1340_v1, %v253_v42  ;;  %v325_v52 = vadd.f32 %v1340_v1, %v254_v43  ;;  %v196_v43 = vld [vmem:[%s1335_s20 + $0xb0] sm:$0xff] }
  0x1b   : > { %v514_v53 = vsel %vm386_vm6, %v322_v39, %v450_v48  ;;  %v256_v54 = vmul.f32 %v1330_v0, %v185_v44  ;;  %v326_v55 = vadd.f32 %v1340_v1, %v255_v45  ;;  %v257_v57 = vmul.f32 %v1330_v0, %v186_v46  ;;  %v197_v44 = vld [vmem:[%s1335_s20 + $0xb8] sm:$0xff] }
  0x1c   : > { %1250 = vst [vmem:[%s1368_s26 + $0x10] sm:$0xff] %v1102_v49   ;;  %v515_v58 = vsel %vm387_vm7, %v323_v40, %v451_v50  ;;  %vm388_vm8 = vcmp.ge.f32.partialorder %v324_v51, 0.0  ;;  %vm389_vm9 = vcmp.ge.f32.partialorder %v325_v52, 0.0  ;;  %v452_v59 = vmul.f32 0.2, %v324_v51 }
  0x1d   : > { %v1107_v61 = vpack.c.bf16 %v515_v58, %v514_v53  ;;  %v453_v62 = vmul.f32 0.2, %v325_v52  ;;  %v327_v63 = vadd.f32 %v1340_v1, %v256_v54  ;;  %vm390_vm10 = vcmp.ge.f32.partialorder %v326_v55, 0.0 }
  0x1e   : > { %v516_v2 = vsel %vm388_vm8, %v324_v51, %v452_v59  ;;  %v454_v3 = vmul.f32 0.2, %v326_v55  ;;  %v258_v4 = vmul.f32 %v1330_v0, %v187_v56  ;;  %v328_v5 = vadd.f32 %v1340_v1, %v257_v57  ;;  %v199_v59 = vld [vmem:[%s1335_s20 + $0xc8] sm:$0xff] }
  0x1f   : > { %1251 = vst [vmem:[%s1368_s26 + $0x18] sm:$0xff] %v1107_v61   ;;  %v517_v7 = vsel %vm389_vm9, %v325_v52, %v453_v62  ;;  %vm391_vm11 = vcmp.ge.f32.partialorder %v327_v63, 0.0  ;;  %v455_v8 = vmul.f32 0.2, %v327_v63  ;;  %v259_v9 = vmul.f32 %v1330_v0, %v188_v60 }
  0x20   : > { %v1112_v11 = vpack.c.bf16 %v517_v7, %v516_v2  ;;  %v518_v12 = vsel %vm390_vm10, %v326_v55, %v454_v3  ;;  %v329_v13 = vadd.f32 %v1340_v1, %v258_v4  ;;  %vm392_vm12 = vcmp.ge.f32.partialorder %v328_v5, 0.0  ;;  %v198_v55 = vld [vmem:[%s1335_s20 + $0xc0] sm:$0xff]  ;;  %v200_v4 = vld [vmem:[%s1335_s20 + $0xd0] sm:$0xff] }
  0x21   : > { %v519_v14 = vsel %vm391_vm11, %v327_v63, %v455_v8  ;;  %v456_v15 = vmul.f32 0.2, %v328_v5  ;;  %v260_v16 = vmul.f32 %v1330_v0, %v189_v6  ;;  %v330_v17 = vadd.f32 %v1340_v1, %v259_v9  ;;  %v201_v9 = vld [vmem:[%s1335_s20 + $0xd8] sm:$0xff] }
  0x22   : > { %1252 = vst [vmem:[%s1368_s26 + $0x20] sm:$0xff] %v1112_v11   ;;  %v1117_v20 = vpack.c.bf16 %v519_v14, %v518_v12  ;;  %vm393_vm13 = vcmp.ge.f32.partialorder %v329_v13, 0.0  ;;  %v457_v21 = vmul.f32 0.2, %v329_v13  ;;  %v261_v22 = vmul.f32 %v1330_v0, %v190_v10  ;;  %v202_v10 = vld [vmem:[%s1335_s20 + $0xe0] sm:$0xff]  ;;  %v203_v11 = vld [vmem:[%s1335_s20 + $0xe8] sm:$0xff] }
  0x23   : > { %v520_v23 = vsel %vm392_vm12, %v328_v5, %v456_v15  ;;  %v331_v24 = vadd.f32 %v1340_v1, %v260_v16  ;;  %vm394_vm14 = vcmp.ge.f32.partialorder %v330_v17, 0.0  ;;  %v458_v25 = vmul.f32 0.2, %v330_v17 }
  0x24   : > { %1253 = vst [vmem:[%s1368_s26 + $0x28] sm:$0xff] %v1117_v20   ;;  %v521_v27 = vsel %vm393_vm13, %v329_v13, %v457_v21  ;;  %v262_v28 = vmul.f32 %v1330_v0, %v191_v18  ;;  %v332_v29 = vadd.f32 %v1340_v1, %v261_v22  ;;  %v263_v30 = vmul.f32 %v1330_v0, %v192_v19  ;;  %v204_v22 = vld [vmem:[%s1335_s20 + $0xf0] sm:$0xff] }
  0x25   : > { %v1122_v33 = vpack.c.bf16 %v521_v27, %v520_v23  ;;  %vm395_vm15 = vcmp.ge.f32.partialorder %v331_v24, 0.0  ;;  %v459_v34 = vmul.f32 0.2, %v331_v24  ;;  %v522_v35 = vsel %vm394_vm14, %v330_v17, %v458_v25 }
  0x26   : > { %v333_v36 = vadd.f32 %v1340_v1, %v262_v28  ;;  %vm396_vm0 = vcmp.ge.f32.partialorder %v332_v29, 0.0  ;;  %v460_v37 = vmul.f32 0.2, %v332_v29  ;;  %v264_v38 = vmul.f32 %v1330_v0, %v193_v26 }
  0x27   : > { %1254 = vst [vmem:[%s1368_s26 + $0x30] sm:$0xff] %v1122_v33   ;;  %v523_v39 = vsel %vm395_vm15, %v331_v24, %v459_v34  ;;  %v334_v40 = vadd.f32 %v1340_v1, %v263_v30  ;;  %v265_v41 = vmul.f32 %v1330_v0, %v194_v31  ;;  %v266_v42 = vmul.f32 %v1330_v0, %v195_v32  ;;  %v205_v32 = vld [vmem:[%s1335_s20 + $0xf8] sm:$0xff] }
  0x28   : > { %v1127_v45 = vpack.c.bf16 %v523_v39, %v522_v35  ;;  %vm397_vm1 = vcmp.ge.f32.partialorder %v333_v36, 0.0  ;;  %v461_v46 = vmul.f32 0.2, %v333_v36  ;;  %v524_v47 = vsel %vm396_vm0, %v332_v29, %v460_v37  ;;  %v207_v37 = vld [vmem:[%s1335_s20 + $0x108] sm:$0xff] }
  0x29   : > { %v335_v48 = vadd.f32 %v1340_v1, %v264_v38  ;;  %vm398_vm2 = vcmp.ge.f32.partialorder %v334_v40, 0.0  ;;  %v462_v49 = vmul.f32 0.2, %v334_v40  ;;  %v336_v50 = vadd.f32 %v1340_v1, %v265_v41 }
  0x2a   : > { %1255 = vst [vmem:[%s1368_s26 + $0x38] sm:$0xff] %v1127_v45   ;;  %v525_v51 = vsel %vm397_vm1, %v333_v36, %v461_v46  ;;  %v337_v52 = vadd.f32 %v1340_v1, %v266_v42  ;;  %v267_v53 = vmul.f32 %v1330_v0, %v196_v43  ;;  %v268_v54 = vmul.f32 %v1330_v0, %v197_v44  ;;  %v206_v36 = vld [vmem:[%s1335_s20 + $0x100] sm:$0xff] }
  0x2b   : > { %v1132_v56 = vpack.c.bf16 %v525_v51, %v524_v47  ;;  %vm399_vm3 = vcmp.ge.f32.partialorder %v335_v48, 0.0  ;;  %v463_v57 = vmul.f32 0.2, %v335_v48  ;;  %v526_v58 = vsel %vm398_vm2, %v334_v40, %v462_v49 }
  0x2c   : > { %vm400_vm4 = vcmp.ge.f32.partialorder %v336_v50, 0.0  ;;  %vm401_vm5 = vcmp.ge.f32.partialorder %v337_v52, 0.0  ;;  %v464_v60 = vmul.f32 0.2, %v336_v50  ;;  %v465_v61 = vmul.f32 0.2, %v337_v52 }
  0x2d   : > { %1256 = vst [vmem:[%s1368_s26 + $0x40] sm:$0xff] %v1132_v56   ;;  %v527_v62 = vsel %vm399_vm3, %v335_v48, %v463_v57  ;;  %v338_v63 = vadd.f32 %v1340_v1, %v267_v53  ;;  %v339_v2 = vadd.f32 %v1340_v1, %v268_v54  ;;  %v269_v3 = vmul.f32 %v1330_v0, %v198_v55  ;;  %v208_v48 = vld [vmem:[%s1335_s20 + $0x110] sm:$0xff]  ;;  %v209_v53 = vld [vmem:[%s1335_s20 + $0x118] sm:$0xff] }
  0x2e   : > { %v1137_v5 = vpack.c.bf16 %v527_v62, %v526_v58  ;;  %v528_v6 = vsel %vm400_vm4, %v336_v50, %v464_v60  ;;  %v529_v7 = vsel %vm401_vm5, %v337_v52, %v465_v61  ;;  %v270_v8 = vmul.f32 %v1330_v0, %v199_v59  ;;  %v210_v60 = vld [vmem:[%s1335_s20 + $0x120] sm:$0xff] }
  0x2f   : > { %v1142_v12 = vpack.c.bf16 %v529_v7, %v528_v6  ;;  %vm402_vm6 = vcmp.ge.f32.partialorder %v338_v63, 0.0  ;;  %vm403_vm7 = vcmp.ge.f32.partialorder %v339_v2, 0.0  ;;  %v466_v13 = vmul.f32 0.2, %v338_v63 }
  0x30   : > { %1257 = vst [vmem:[%s1368_s26 + $0x48] sm:$0xff] %v1137_v5   ;;  %v467_v14 = vmul.f32 0.2, %v339_v2  ;;  %v340_v15 = vadd.f32 %v1340_v1, %v269_v3  ;;  %v341_v16 = vadd.f32 %v1340_v1, %v270_v8  ;;  %v271_v17 = vmul.f32 %v1330_v0, %v200_v4 }
  0x31   : > { %1258 = vst [vmem:[%s1368_s26 + $0x50] sm:$0xff] %v1142_v12   ;;  %v530_v18 = vsel %vm402_vm6, %v338_v63, %v466_v13  ;;  %v272_v19 = vmul.f32 %v1330_v0, %v201_v9  ;;  %v273_v20 = vmul.f32 %v1330_v0, %v202_v10  ;;  %v274_v21 = vmul.f32 %v1330_v0, %v203_v11  ;;  %v212_v10 = vld [vmem:[%s1335_s20 + $0x130] sm:$0xff]  ;;  %v213_v11 = vld [vmem:[%s1335_s20 + $0x138] sm:$0xff] }
  0x32   : > { %v531_v23 = vsel %vm403_vm7, %v339_v2, %v467_v14  ;;  %vm404_vm8 = vcmp.ge.f32.partialorder %v340_v15, 0.0  ;;  %vm405_vm9 = vcmp.ge.f32.partialorder %v341_v16, 0.0  ;;  %v468_v24 = vmul.f32 0.2, %v340_v15  ;;  %v211_v2 = vld [vmem:[%s1335_s20 + $0x128] sm:$0xff] }
  0x33   : > { %v1147_v25 = vpack.c.bf16 %v531_v23, %v530_v18  ;;  %v469_v26 = vmul.f32 0.2, %v341_v16  ;;  %v342_v27 = vadd.f32 %v1340_v1, %v271_v17  ;;  %v343_v28 = vadd.f32 %v1340_v1, %v272_v19  ;;  %v215_v23 = vld [vmem:[%s1335_s20 + $0x148] sm:$0xff] }
  0x34   : > { %v532_v29 = vsel %vm404_vm8, %v340_v15, %v468_v24  ;;  %v344_v30 = vadd.f32 %v1340_v1, %v273_v20  ;;  %v345_v31 = vadd.f32 %v1340_v1, %v274_v21  ;;  %v275_v33 = vmul.f32 %v1330_v0, %v204_v22  ;;  %v214_v15 = vld [vmem:[%s1335_s20 + $0x140] sm:$0xff] }
  0x35   : > { %1259 = vst [vmem:[%s1368_s26 + $0x58] sm:$0xff] %v1147_v25   ;;  %v533_v34 = vsel %vm405_vm9, %v341_v16, %v469_v26  ;;  %vm406_vm10 = vcmp.ge.f32.partialorder %v342_v27, 0.0  ;;  %vm407_vm11 = vcmp.ge.f32.partialorder %v343_v28, 0.0  ;;  %v470_v35 = vmul.f32 0.2, %v342_v27 }
  0x36   : > { %v1152_v38 = vpack.c.bf16 %v533_v34, %v532_v29  ;;  %v471_v39 = vmul.f32 0.2, %v343_v28  ;;  %vm408_vm12 = vcmp.ge.f32.partialorder %v344_v30, 0.0  ;;  %vm409_vm13 = vcmp.ge.f32.partialorder %v345_v31, 0.0 }
  0x37   : > { %v534_v40 = vsel %vm406_vm10, %v342_v27, %v470_v35  ;;  %v472_v41 = vmul.f32 0.2, %v344_v30  ;;  %v473_v42 = vmul.f32 0.2, %v345_v31  ;;  %v276_v43 = vmul.f32 %v1330_v0, %v205_v32  ;;  %v216_v27 = vld [vmem:[%s1335_s20 + $0x150] sm:$0xff]  ;;  %v217_v35 = vld [vmem:[%s1335_s20 + $0x158] sm:$0xff] }
  0x38   : > { %1260 = vst [vmem:[%s1368_s26 + $0x60] sm:$0xff] %v1152_v38   ;;  %v535_v44 = vsel %vm407_vm11, %v343_v28, %v471_v39  ;;  %v346_v45 = vadd.f32 %v1340_v1, %v275_v33  ;;  %v277_v46 = vmul.f32 %v1330_v0, %v206_v36  ;;  %v278_v47 = vmul.f32 %v1330_v0, %v207_v37 }
  0x39   : > { %v1157_v49 = vpack.c.bf16 %v535_v44, %v534_v40  ;;  %v536_v50 = vsel %vm408_vm12, %v344_v30, %v472_v41  ;;  %v537_v51 = vsel %vm409_vm13, %v345_v31, %v473_v42  ;;  %v347_v52 = vadd.f32 %v1340_v1, %v276_v43  ;;  %v218_v42 = vld [vmem:[%s1335_s20 + $0x160] sm:$0xff] }
  0x3a   : > { %v1162_v54 = vpack.c.bf16 %v537_v51, %v536_v50  ;;  %vm410_vm14 = vcmp.ge.f32.partialorder %v346_v45, 0.0  ;;  %v474_v55 = vmul.f32 0.2, %v346_v45  ;;  %v348_v56 = vadd.f32 %v1340_v1, %v277_v46  ;;  %v219_v46 = vld [vmem:[%s1335_s20 + $0x168] sm:$0xff] }
  0x3b   : > { %1261 = vst [vmem:[%s1368_s26 + $0x68] sm:$0xff] %v1157_v49   ;;  %vm411_vm15 = vcmp.ge.f32.partialorder %v347_v52, 0.0  ;;  %v475_v57 = vmul.f32 0.2, %v347_v52  ;;  %v349_v58 = vadd.f32 %v1340_v1, %v278_v47  ;;  %v279_v59 = vmul.f32 %v1330_v0, %v208_v48 }
  0x3c   : > { %1262 = vst [vmem:[%s1368_s26 + $0x70] sm:$0xff] %v1162_v54   ;;  %v538_v61 = vsel %vm410_vm14, %v346_v45, %v474_v55  ;;  %vm412_vm0 = vcmp.ge.f32.partialorder %v348_v56, 0.0  ;;  %v476_v62 = vmul.f32 0.2, %v348_v56  ;;  %v280_v63 = vmul.f32 %v1330_v0, %v209_v53  ;;  %v220_v54 = vld [vmem:[%s1335_s20 + $0x170] sm:$0xff]  ;;  %v221_v55 = vld [vmem:[%s1335_s20 + $0x178] sm:$0xff] }
  0x3d   : > { %v539_v3 = vsel %vm411_vm15, %v347_v52, %v475_v57  ;;  %vm413_vm1 = vcmp.ge.f32.partialorder %v349_v58, 0.0  ;;  %v477_v4 = vmul.f32 0.2, %v349_v58  ;;  %v350_v5 = vadd.f32 %v1340_v1, %v279_v59  ;;  %v222_v59 = vld [vmem:[%s1335_s20 + $0x180] sm:$0xff] }
  0x3e   : > { %v1167_v6 = vpack.c.bf16 %v539_v3, %v538_v61  ;;  %v540_v7 = vsel %vm412_vm0, %v348_v56, %v476_v62  ;;  %v351_v8 = vadd.f32 %v1340_v1, %v280_v63  ;;  %v281_v9 = vmul.f32 %v1330_v0, %v210_v60 }
  0x3f   : > { %v541_v12 = vsel %vm413_vm1, %v349_v58, %v477_v4  ;;  %vm414_vm2 = vcmp.ge.f32.partialorder %v350_v5, 0.0  ;;  %v478_v13 = vmul.f32 0.2, %v350_v5  ;;  %v282_v14 = vmul.f32 %v1330_v0, %v211_v2 }
  0x40   : > { %1263 = vst [vmem:[%s1368_s26 + $0x78] sm:$0xff] %v1167_v6   ;;  %v1172_v16 = vpack.c.bf16 %v541_v12, %v540_v7  ;;  %vm415_vm3 = vcmp.ge.f32.partialorder %v351_v8, 0.0  ;;  %v479_v17 = vmul.f32 0.2, %v351_v8  ;;  %v352_v18 = vadd.f32 %v1340_v1, %v281_v9  ;;  %v224_v9 = vld [vmem:[%s1335_s20 + $0x190] sm:$0xff] }
  0x41   : > { %v542_v19 = vsel %vm414_vm2, %v350_v5, %v478_v13  ;;  %v353_v20 = vadd.f32 %v1340_v1, %v282_v14  ;;  %v283_v21 = vmul.f32 %v1330_v0, %v212_v10  ;;  %v284_v22 = vmul.f32 %v1330_v0, %v213_v11  ;;  %v223_v5 = vld [vmem:[%s1335_s20 + $0x188] sm:$0xff] }
  0x42   : > { %1264 = vst [vmem:[%s1368_s26 + $0x80] sm:$0xff] %v1172_v16   ;;  %v543_v24 = vsel %vm415_vm3, %v351_v8, %v479_v17  ;;  %vm416_vm4 = vcmp.ge.f32.partialorder %v352_v18, 0.0  ;;  %v480_v25 = vmul.f32 0.2, %v352_v18  ;;  %v285_v26 = vmul.f32 %v1330_v0, %v214_v15  ;;  %v225_v17 = vld [vmem:[%s1335_s20 + $0x198] sm:$0xff] }
  0x43   : > { %v1177_v28 = vpack.c.bf16 %v543_v24, %v542_v19  ;;  %vm417_vm5 = vcmp.ge.f32.partialorder %v353_v20, 0.0  ;;  %v481_v29 = vmul.f32 0.2, %v353_v20  ;;  %v354_v30 = vadd.f32 %v1340_v1, %v283_v21  ;;  %v226_v24 = vld [vmem:[%s1335_s20 + $0x1a0] sm:$0xff] }
  0x44   : > { %v544_v31 = vsel %vm416_vm4, %v352_v18, %v480_v25  ;;  %v355_v32 = vadd.f32 %v1340_v1, %v284_v22  ;;  %v286_v33 = vmul.f32 %v1330_v0, %v215_v23  ;;  %v356_v34 = vadd.f32 %v1340_v1, %v285_v26 }
  0x45   : > { %1265 = vst [vmem:[%s1368_s26 + $0x88] sm:$0xff] %v1177_v28   ;;  %v545_v36 = vsel %vm417_vm5, %v353_v20, %v481_v29  ;;  %vm418_vm6 = vcmp.ge.f32.partialorder %v354_v30, 0.0  ;;  %v482_v37 = vmul.f32 0.2, %v354_v30  ;;  %v287_v38 = vmul.f32 %v1330_v0, %v216_v27  ;;  %v227_v28 = vld [vmem:[%s1335_s20 + $0x1a8] sm:$0xff] }
  0x46   : > { %v1182_v39 = vpack.c.bf16 %v545_v36, %v544_v31  ;;  %vm419_vm7 = vcmp.ge.f32.partialorder %v355_v32, 0.0  ;;  %v483_v40 = vmul.f32 0.2, %v355_v32  ;;  %v357_v41 = vadd.f32 %v1340_v1, %v286_v33  ;;  %v228_v36 = vld [vmem:[%s1335_s20 + $0x1b0] sm:$0xff] }
  0x47   : > { %v546_v43 = vsel %vm418_vm6, %v354_v30, %v482_v37  ;;  %vm420_vm8 = vcmp.ge.f32.partialorder %v356_v34, 0.0  ;;  %v484_v44 = vmul.f32 0.2, %v356_v34  ;;  %v288_v45 = vmul.f32 %v1330_v0, %v217_v35  ;;  %v229_v37 = vld [vmem:[%s1335_s20 + $0x1b8] sm:$0xff] }
  0x48   : > { %1266 = vst [vmem:[%s1368_s26 + $0x90] sm:$0xff] %v1182_v39   ;;  %v547_v47 = vsel %vm419_vm7, %v355_v32, %v483_v40  ;;  %vm421_vm9 = vcmp.ge.f32.partialorder %v357_v41, 0.0  ;;  %v485_v48 = vmul.f32 0.2, %v357_v41  ;;  %v358_v49 = vadd.f32 %v1340_v1, %v287_v38 }
  0x49   : > { %v1187_v50 = vpack.c.bf16 %v547_v47, %v546_v43  ;;  %v548_v51 = vsel %vm420_vm8, %v356_v34, %v484_v44  ;;  %v359_v52 = vadd.f32 %v1340_v1, %v288_v45  ;;  %v289_v53 = vmul.f32 %v1330_v0, %v218_v42 }
  0x4a   : > { %v549_v56 = vsel %vm421_vm9, %v357_v41, %v485_v48  ;;  %vm422_vm10 = vcmp.ge.f32.partialorder %v358_v49, 0.0  ;;  %v486_v57 = vmul.f32 0.2, %v358_v49  ;;  %v290_v58 = vmul.f32 %v1330_v0, %v219_v46  ;;  %v230_v41 = vld [vmem:[%s1335_s20 + $0x1c0] sm:$0xff] }
  0x4b   : > { %1267 = vst [vmem:[%s1368_s26 + $0x98] sm:$0xff] %v1187_v50   ;;  %v1192_v60 = vpack.c.bf16 %v549_v56, %v548_v51  ;;  %vm423_vm11 = vcmp.ge.f32.partialorder %v359_v52, 0.0  ;;  %v487_v61 = vmul.f32 0.2, %v359_v52  ;;  %v360_v62 = vadd.f32 %v1340_v1, %v289_v53  ;;  %v232_v53 = vld [vmem:[%s1335_s20 + $0x1d0] sm:$0xff] }
  0x4c   : > { %v550_v63 = vsel %vm422_vm10, %v358_v49, %v486_v57  ;;  %v361_v2 = vadd.f32 %v1340_v1, %v290_v58  ;;  %v291_v3 = vmul.f32 %v1330_v0, %v220_v54  ;;  %v292_v4 = vmul.f32 %v1330_v0, %v221_v55  ;;  %v231_v49 = vld [vmem:[%s1335_s20 + $0x1c8] sm:$0xff] }
  0x4d   : > { %1268 = vst [vmem:[%s1368_s26 + $0xa0] sm:$0xff] %v1192_v60   ;;  %v551_v6 = vsel %vm423_vm11, %v359_v52, %v487_v61  ;;  %vm424_vm12 = vcmp.ge.f32.partialorder %v360_v62, 0.0  ;;  %v488_v7 = vmul.f32 0.2, %v360_v62  ;;  %v293_v8 = vmul.f32 %v1330_v0, %v222_v59  ;;  %v233_v61 = vld [vmem:[%s1335_s20 + $0x1d8] sm:$0xff] }
  0x4e   : > { %v1197_v10 = vpack.c.bf16 %v551_v6, %v550_v63  ;;  %vm425_vm13 = vcmp.ge.f32.partialorder %v361_v2, 0.0  ;;  %v489_v11 = vmul.f32 0.2, %v361_v2  ;;  %v362_v12 = vadd.f32 %v1340_v1, %v291_v3  ;;  %v234_v6 = vld [vmem:[%s1335_s20 + $0x1e0] sm:$0xff] }
  0x4f   : > { %v552_v13 = vsel %vm424_vm12, %v360_v62, %v488_v7  ;;  %v363_v14 = vadd.f32 %v1340_v1, %v292_v4  ;;  %v294_v15 = vmul.f32 %v1330_v0, %v223_v5  ;;  %v364_v16 = vadd.f32 %v1340_v1, %v293_v8 }
  0x50   : > { %1269 = vst [vmem:[%s1368_s26 + $0xa8] sm:$0xff] %v1197_v10   ;;  %v553_v18 = vsel %vm425_vm13, %v361_v2, %v489_v11  ;;  %vm426_vm14 = vcmp.ge.f32.partialorder %v362_v12, 0.0  ;;  %v490_v19 = vmul.f32 0.2, %v362_v12  ;;  %v295_v20 = vmul.f32 %v1330_v0, %v224_v9  ;;  %v235_v10 = vld [vmem:[%s1335_s20 + $0x1e8] sm:$0xff] }
  0x51   : > { %v1202_v21 = vpack.c.bf16 %v553_v18, %v552_v13  ;;  %vm427_vm15 = vcmp.ge.f32.partialorder %v363_v14, 0.0  ;;  %v491_v22 = vmul.f32 0.2, %v363_v14  ;;  %v365_v23 = vadd.f32 %v1340_v1, %v294_v15  ;;  %v236_v18 = vld [vmem:[%s1335_s20 + $0x1f0] sm:$0xff] }
  0x52   : > { %v554_v25 = vsel %vm426_vm14, %v362_v12, %v490_v19  ;;  %vm428_vm0 = vcmp.ge.f32.partialorder %v364_v16, 0.0  ;;  %v492_v26 = vmul.f32 0.2, %v364_v16  ;;  %v296_v27 = vmul.f32 %v1330_v0, %v225_v17  ;;  %v237_v19 = vld [vmem:[%s1335_s20 + $0x1f8] sm:$0xff] }
  0x53   : > { %1270 = vst [vmem:[%s1368_s26 + $0xb0] sm:$0xff] %v1202_v21   ;;  %v555_v29 = vsel %vm427_vm15, %v363_v14, %v491_v22  ;;  %vm429_vm1 = vcmp.ge.f32.partialorder %v365_v23, 0.0  ;;  %v493_v30 = vmul.f32 0.2, %v365_v23  ;;  %v366_v31 = vadd.f32 %v1340_v1, %v295_v20 }
  0x54   : > { %v1207_v32 = vpack.c.bf16 %v555_v29, %v554_v25  ;;  %v556_v33 = vsel %vm428_vm0, %v364_v16, %v492_v26  ;;  %v367_v34 = vadd.f32 %v1340_v1, %v296_v27  ;;  %v297_v35 = vmul.f32 %v1330_v0, %v226_v24 }
  0x55   : > { %v557_v38 = vsel %vm429_vm1, %v365_v23, %v493_v30  ;;  %vm430_vm2 = vcmp.ge.f32.partialorder %v366_v31, 0.0  ;;  %v494_v39 = vmul.f32 0.2, %v366_v31  ;;  %v298_v40 = vmul.f32 %v1330_v0, %v227_v28 }
  0x56   : > { %1271 = vst [vmem:[%s1368_s26 + $0xb8] sm:$0xff] %v1207_v32   ;;  %v1212_v42 = vpack.c.bf16 %v557_v38, %v556_v33  ;;  %vm431_vm3 = vcmp.ge.f32.partialorder %v367_v34, 0.0  ;;  %v495_v43 = vmul.f32 0.2, %v367_v34  ;;  %v368_v44 = vadd.f32 %v1340_v1, %v297_v35 }
  0x57   : > { %v558_v45 = vsel %vm430_vm2, %v366_v31, %v494_v39  ;;  %v369_v46 = vadd.f32 %v1340_v1, %v298_v40  ;;  %v299_v47 = vmul.f32 %v1330_v0, %v228_v36  ;;  %v300_v48 = vmul.f32 %v1330_v0, %v229_v37 }
  0x58   : > { %1272 = vst [vmem:[%s1368_s26 + $0xc0] sm:$0xff] %v1212_v42   ;;  %v559_v50 = vsel %vm431_vm3, %v367_v34, %v495_v43  ;;  %vm432_vm4 = vcmp.ge.f32.partialorder %v368_v44, 0.0  ;;  %v496_v51 = vmul.f32 0.2, %v368_v44  ;;  %v301_v52 = vmul.f32 %v1330_v0, %v230_v41 }
  0x59   : > { %v1217_v54 = vpack.c.bf16 %v559_v50, %v558_v45  ;;  %vm433_vm5 = vcmp.ge.f32.partialorder %v369_v46, 0.0  ;;  %v497_v55 = vmul.f32 0.2, %v369_v46  ;;  %v370_v56 = vadd.f32 %v1340_v1, %v299_v47 }
  0x5a   : > { %v560_v57 = vsel %vm432_vm4, %v368_v44, %v496_v51  ;;  %v371_v58 = vadd.f32 %v1340_v1, %v300_v48  ;;  %v302_v59 = vmul.f32 %v1330_v0, %v231_v49  ;;  %v372_v60 = vadd.f32 %v1340_v1, %v301_v52 }
  0x5b   : > { %1273 = vst [vmem:[%s1368_s26 + $0xc8] sm:$0xff] %v1217_v54   ;;  %v561_v62 = vsel %vm433_vm5, %v369_v46, %v497_v55  ;;  %vm434_vm6 = vcmp.ge.f32.partialorder %v370_v56, 0.0  ;;  %v498_v63 = vmul.f32 0.2, %v370_v56  ;;  %v303_v2 = vmul.f32 %v1330_v0, %v232_v53 }
  0x5c   : > { %v1222_v3 = vpack.c.bf16 %v561_v62, %v560_v57  ;;  %vm435_vm7 = vcmp.ge.f32.partialorder %v371_v58, 0.0  ;;  %v499_v4 = vmul.f32 0.2, %v371_v58  ;;  %v373_v5 = vadd.f32 %v1340_v1, %v302_v59 }
  0x5d   : > { %v562_v7 = vsel %vm434_vm6, %v370_v56, %v498_v63  ;;  %vm436_vm8 = vcmp.ge.f32.partialorder %v372_v60, 0.0  ;;  %v500_v8 = vmul.f32 0.2, %v372_v60  ;;  %v304_v9 = vmul.f32 %v1330_v0, %v233_v61 }
  0x5e   : > { %1274 = vst [vmem:[%s1368_s26 + $0xd0] sm:$0xff] %v1222_v3   ;;  %v563_v11 = vsel %vm435_vm7, %v371_v58, %v499_v4  ;;  %vm437_vm9 = vcmp.ge.f32.partialorder %v373_v5, 0.0  ;;  %v501_v12 = vmul.f32 0.2, %v373_v5  ;;  %v374_v13 = vadd.f32 %v1340_v1, %v303_v2 }
  0x5f   : > { %v1227_v14 = vpack.c.bf16 %v563_v11, %v562_v7  ;;  %v564_v15 = vsel %vm436_vm8, %v372_v60, %v500_v8  ;;  %v375_v16 = vadd.f32 %v1340_v1, %v304_v9  ;;  %v305_v17 = vmul.f32 %v1330_v0, %v234_v6 }
  0x60   : > { %v565_v20 = vsel %vm437_vm9, %v373_v5, %v501_v12  ;;  %vm438_vm10 = vcmp.ge.f32.partialorder %v374_v13, 0.0  ;;  %v502_v21 = vmul.f32 0.2, %v374_v13  ;;  %v306_v22 = vmul.f32 %v1330_v0, %v235_v10 }
  0x61   : > { %1275 = vst [vmem:[%s1368_s26 + $0xd8] sm:$0xff] %v1227_v14   ;;  %v1232_v23 = vpack.c.bf16 %v565_v20, %v564_v15  ;;  %vm439_vm11 = vcmp.ge.f32.partialorder %v375_v16, 0.0  ;;  %v503_v24 = vmul.f32 0.2, %v375_v16  ;;  %v376_v25 = vadd.f32 %v1340_v1, %v305_v17 }
  0x62   : > { %v566_v26 = vsel %vm438_vm10, %v374_v13, %v502_v21  ;;  %v377_v27 = vadd.f32 %v1340_v1, %v306_v22  ;;  %v307_v28 = vmul.f32 %v1330_v0, %v236_v18  ;;  %v308_v29 = vmul.f32 %v1330_v0, %v237_v19 }
  0x63   : > { %1276 = vst [vmem:[%s1368_s26 + $0xe0] sm:$0xff] %v1232_v23   ;;  %v567_v30 = vsel %vm439_vm11, %v375_v16, %v503_v24  ;;  %vm440_vm12 = vcmp.ge.f32.partialorder %v376_v25, 0.0  ;;  %v504_v31 = vmul.f32 0.2, %v376_v25 }
  0x64   : > { %v1237_v32 = vpack.c.bf16 %v567_v30, %v566_v26  ;;  %vm441_vm13 = vcmp.ge.f32.partialorder %v377_v27, 0.0  ;;  %v505_v33 = vmul.f32 0.2, %v377_v27  ;;  %v378_v34 = vadd.f32 %v1340_v1, %v307_v28 }
  0x65   : > { %v568_v35 = vsel %vm440_vm12, %v376_v25, %v504_v31  ;;  %v379_v36 = vadd.f32 %v1340_v1, %v308_v29 }
  0x66   : > { %1277 = vst [vmem:[%s1368_s26 + $0xe8] sm:$0xff] %v1237_v32   ;;  %v569_v37 = vsel %vm441_vm13, %v377_v27, %v505_v33  ;;  %vm442_vm14 = vcmp.ge.f32.partialorder %v378_v34, 0.0  ;;  %v506_v38 = vmul.f32 0.2, %v378_v34 }
  0x67   : > { %v1242_v39 = vpack.c.bf16 %v569_v37, %v568_v35  ;;  %vm443_vm15 = vcmp.ge.f32.partialorder %v379_v36, 0.0  ;;  %v507_v0 = vmul.f32 0.2, %v379_v36 }
  0x68   : > { %v570_v40 = vsel %vm442_vm14, %v378_v34, %v506_v38 }
  0x69   : > { %1278 = vst [vmem:[%s1368_s26 + $0xf0] sm:$0xff] %v1242_v39   ;;  %v571_v41 = vsel %vm443_vm15, %v379_v36, %v507_v0 }
  0x6a   : > { %v1247_v42 = vpack.c.bf16 %v571_v41, %v570_v40 }
  0x6c   : > { %1279 = vst [vmem:[%s1368_s26 + $0xf8] sm:$0xff] %v1247_v42  }
  0x6d PF: > { %s13_s12 = sadd.s32 1, %s1294_s12  }
  0x6e   : > { %p10_p4 = scmp.ge.s32.totalorder %s13_s12, 4  }
  0x70   :  { %12 = sbr.rel (!%p10_p4) target bundleno = 1 (0x1), region = 62 }

// kernel: _lambda_.11
= control target key start
LH: loop header
LB: loop body
LE: loop exit
PB: predicated region body
PF: predicated region fallthrough
CT: control target
= control target key end

     0   :  { %vm730_vm0 = vcmask 1040384   ;;  %s1282_s1 = inlined_call_operand.vmem [shape: bf16[512,128], index: 1, kind: input, shape index: {}]   ;;  %s1283_s0 = inlined_call_operand.vmem [shape: bf16[128,512], index: 0, kind: input, shape index: {}]   ;;  %s1284_s2 = inlined_call_operand.vmem [shape: f32[128,128], index: 2, kind: output, shape index: {0}]   ;;  %s1285_s3 = inlined_call_operand.vmem [shape: f32[1,2,128], index: 3, kind: output, shape index: {1}]  }
   0x1   :  { %v933_v0 = vld [vmem:[%s1282_s1 + $0x78] sm:$0xff]   ;;  %v937_v4 = vld [vmem:[%s1282_s1 + $0x70] sm:$0xff]   ;;  %v941_v8 = vld [vmem:[%s1282_s1 + $0x68] sm:$0xff]  }
   0x2   :  { %v934_v1 = vld [vmem:[%s1282_s1 + $0xf8] sm:$0xff]   ;;  %805 = vmatprep.subr.bf16.mxu0 %v933_v0  ;;  %v938_v5 = vld [vmem:[%s1282_s1 + $0xf0] sm:$0xff]   ;;  %v942_v9 = vld [vmem:[%s1282_s1 + $0xe8] sm:$0xff]  }
   0x3   :  { %v935_v2 = vld [vmem:[%s1282_s1 + $0x38] sm:$0xff]   ;;  %869 = vmatprep.subr.bf16.mxu1 %v934_v1  ;;  %v939_v6 = vld [vmem:[%s1282_s1 + $0x30] sm:$0xff]   ;;  %v943_v10 = vld [vmem:[%s1282_s1 + $0x28] sm:$0xff]  }
   0x4   :  { %v936_v3 = vld [vmem:[%s1282_s1 + $0xb8] sm:$0xff]   ;;  %806 = vmatpush3.bf16.msra.mxu0 %v935_v2  ;;  %v940_v7 = vld [vmem:[%s1282_s1 + $0xb0] sm:$0xff]   ;;  %v944_v11 = vld [vmem:[%s1282_s1 + $0xa8] sm:$0xff]  }
   0x5   :  { %870 = vmatpush3.bf16.msra.mxu1 %v936_v3  ;;  %807 = vmatprep.subr.bf16.mxu0 %v937_v4  ;;  %v945_v12 = vld [vmem:[%s1282_s1 + $0x60] sm:$0xff]   ;;  %v949_v16 = vld [vmem:[%s1282_s1 + $0x58] sm:$0xff]   ;;  %v953_v20 = vld [vmem:[%s1282_s1 + $0x50] sm:$0xff]  }
   0x6   :  { %871 = vmatprep.subr.bf16.mxu1 %v938_v5  ;;  %v946_v13 = vld [vmem:[%s1282_s1 + $0xe0] sm:$0xff]   ;;  %v950_v17 = vld [vmem:[%s1282_s1 + $0xd8] sm:$0xff]   ;;  %v954_v21 = vld [vmem:[%s1282_s1 + $0xd0] sm:$0xff]  }
   0x7   :  { %v947_v14 = vld [vmem:[%s1282_s1 + $0x20] sm:$0xff]   ;;  %v951_v18 = vld [vmem:[%s1282_s1 + $0x18] sm:$0xff]   ;;  %v955_v22 = vld [vmem:[%s1282_s1 + $0x10] sm:$0xff]  }
   0x8   :  { %808 = vmatpush3.bf16.msra.mxu0 %v939_v6  ;;  %v948_v15 = vld [vmem:[%s1282_s1 + $0xa0] sm:$0xff]   ;;  %v952_v19 = vld [vmem:[%s1282_s1 + $0x98] sm:$0xff]   ;;  %v956_v23 = vld [vmem:[%s1282_s1 + $0x90] sm:$0xff]  }
   0x9   :  { %872 = vmatpush3.bf16.msra.mxu1 %v940_v7  ;;  %809 = vmatprep.subr.bf16.mxu0 %v941_v8  ;;  %v957_v24 = vld [vmem:[%s1282_s1 + $0x48] sm:$0xff]   ;;  %v961_v28 = vld [vmem:[%s1282_s1 + $0x40] sm:$0xff]  }
   0xa   :  { %873 = vmatprep.subr.bf16.mxu1 %v942_v9  ;;  %v958_v25 = vld [vmem:[%s1282_s1 + $0xc8] sm:$0xff]   ;;  %v962_v29 = vld [vmem:[%s1282_s1 + $0xc0] sm:$0xff]  }
   0xb   :  { %v959_v26 = vld [vmem:[%s1282_s1 + $0x8] sm:$0xff]   ;;  %v963_v30 = vld [vmem:[%s1282_s1] sm:$0xff]  }
   0xc   :  { %810 = vmatpush3.bf16.msra.mxu0 %v943_v10  ;;  %v960_v27 = vld [vmem:[%s1282_s1 + $0x88] sm:$0xff]   ;;  %v964_v31 = vld [vmem:[%s1282_s1 + $0x80] sm:$0xff]  }
   0xd   :  { %874 = vmatpush3.bf16.msra.mxu1 %v944_v11  ;;  %811 = vmatprep.subr.bf16.mxu0 %v945_v12  ;;  %v965_v32 = vld [vmem:[%s1283_s0] ss:$16 sps:$4 sm:$0xff]   ;;  %v967_v33 = vld [vmem:[%s1283_s0 + $0x4] ss:$16 sps:$4 sm:$0xff]   ;;  %v968_v34 = vld [vmem:[%s1283_s0 + $0x8] ss:$16 sps:$4 sm:$0xff]  }
   0xe   :  { %875 = vmatprep.subr.bf16.mxu1 %v946_v13  ;;  %v970_v35 = vld [vmem:[%s1283_s0 + $0xc] ss:$16 sps:$4 sm:$0xff]   ;;  %494 = vmatprep.mubr.bf16.mxu0 %v967_v33  ;;  %v971_v36 = vld [vmem:[%s1283_s0 + $0x24] ss:$16 sps:$4 sm:$0xff]   ;;  %v975_v38 = vld [vmem:[%s1283_s0 + $0x20] ss:$16 sps:$4 sm:$0xff]  }
   0xf   :  { %591 = vmatprep.mubr.bf16.mxu1 %v970_v35  ;;  %v973_v37 = vld [vmem:[%s1283_s0 + $0x2c] ss:$16 sps:$4 sm:$0xff]   ;;  %v976_v39 = vld [vmem:[%s1283_s0 + $0x28] ss:$16 sps:$4 sm:$0xff]   ;;  %v977_v40 = vld [vmem:[%s1283_s0 + $0x44] ss:$16 sps:$4 sm:$0xff]  }
  0x10   :  { %812 = vmatpush3.bf16.msra.mxu0 %v947_v14  ;;  %v979_v41 = vld [vmem:[%s1283_s0 + $0x4c] ss:$16 sps:$4 sm:$0xff]   ;;  %v981_v42 = vld [vmem:[%s1283_s0 + $0x40] ss:$16 sps:$4 sm:$0xff]   ;;  %v982_v43 = vld [vmem:[%s1283_s0 + $0x48] ss:$16 sps:$4 sm:$0xff]  }
  0x11   :  { %876 = vmatpush3.bf16.msra.mxu1 %v948_v15  ;;  %813 = vmatprep.subr.bf16.mxu0 %v949_v16  ;;  %v983_v44 = vld [vmem:[%s1283_s0 + $0x64] ss:$16 sps:$4 sm:$0xff]   ;;  %v985_v45 = vld [vmem:[%s1283_s0 + $0x6c] ss:$16 sps:$4 sm:$0xff]   ;;  %v987_v46 = vld [vmem:[%s1283_s0 + $0x60] ss:$16 sps:$4 sm:$0xff]  }
  0x12   :  { %877 = vmatprep.subr.bf16.mxu1 %v950_v17  ;;  %v988_v47 = vld [vmem:[%s1283_s0 + $0x68] ss:$16 sps:$4 sm:$0xff]   ;;  %v989_v48 = vld [vmem:[%s1283_s0 + $0x84] ss:$16 sps:$4 sm:$0xff]   ;;  %v991_v49 = vld [vmem:[%s1283_s0 + $0x8c] ss:$16 sps:$4 sm:$0xff]  }
  0x13   :  { %v993_v50 = vld [vmem:[%s1283_s0 + $0x80] ss:$16 sps:$4 sm:$0xff]   ;;  %v994_v51 = vld [vmem:[%s1283_s0 + $0x88] ss:$16 sps:$4 sm:$0xff]   ;;  %v995_v52 = vld [vmem:[%s1283_s0 + $0xa4] ss:$16 sps:$4 sm:$0xff]  }
  0x14   :  { %814 = vmatpush3.bf16.msra.mxu0 %v951_v18  ;;  %v997_v53 = vld [vmem:[%s1283_s0 + $0xac] ss:$16 sps:$4 sm:$0xff]   ;;  %v999_v54 = vld [vmem:[%s1283_s0 + $0xa0] ss:$16 sps:$4 sm:$0xff]   ;;  %v1000_v55 = vld [vmem:[%s1283_s0 + $0xa8] ss:$16 sps:$4 sm:$0xff]  }
  0x15   :  { %878 = vmatpush3.bf16.msra.mxu1 %v952_v19  ;;  %815 = vmatprep.subr.bf16.mxu0 %v953_v20  ;;  %v1001_v56 = vld [vmem:[%s1283_s0 + $0xc4] ss:$16 sps:$4 sm:$0xff]   ;;  %v1003_v57 = vld [vmem:[%s1283_s0 + $0xcc] ss:$16 sps:$4 sm:$0xff]   ;;  %v1005_v58 = vld [vmem:[%s1283_s0 + $0xc0] ss:$16 sps:$4 sm:$0xff]  }
  0x16   :  { %879 = vmatprep.subr.bf16.mxu1 %v954_v21  ;;  %v1006_v59 = vld [vmem:[%s1283_s0 + $0xc8] ss:$16 sps:$4 sm:$0xff]   ;;  %v1007_v60 = vld [vmem:[%s1283_s0 + $0xe4] ss:$16 sps:$4 sm:$0xff]   ;;  %v1009_v61 = vld [vmem:[%s1283_s0 + $0xec] ss:$16 sps:$4 sm:$0xff]  }
  0x17   :  { %v1011_v62 = vld [vmem:[%s1283_s0 + $0xe0] ss:$16 sps:$4 sm:$0xff]   ;;  %v1012_v63 = vld [vmem:[%s1283_s0 + $0xe8] ss:$16 sps:$4 sm:$0xff]  }
  0x18   :  { %816 = vmatpush3.bf16.msra.mxu0 %v955_v22 }
  0x19   :  { %880 = vmatpush3.bf16.msra.mxu1 %v956_v23  ;;  %817 = vmatprep.subr.bf16.mxu0 %v957_v24 }
  0x1a   :  { %881 = vmatprep.subr.bf16.mxu1 %v958_v25 }
  0x1c   :  { %818 = vmatpush3.bf16.msra.mxu0 %v959_v26 }
  0x1d   :  { %882 = vmatpush3.bf16.msra.mxu1 %v960_v27  ;;  %819 = vmatprep.subr.bf16.mxu0 %v961_v28 }
  0x1e   :  { %883 = vmatprep.subr.bf16.mxu1 %v962_v29 }
  0x20   :  { %820 = vmatpush3.bf16.msra.mxu0 %v963_v30 }
  0x21   :  { %884 = vmatpush3.bf16.msra.mxu1 %v964_v31 }
  0x23   :  { %495 = vmatmul.mubr.bf16.vlgmr.msra.gmra.mxu0 %v965_v32 }
  0x24   :  { %592 = vmatmul.mubr.bf16.vlgmr.msra.gmra.mxu1 %v968_v34  ;;  %502 = vmatprep.mubr.bf16.mxu0 %v971_v36 }
  0x25   :  { %599 = vmatprep.mubr.bf16.mxu1 %v973_v37 }
  0x2b   :  { %503 = vmatmul.mubr.bf16.gmra.mxu0 %v975_v38 }
  0x2c   :  { %600 = vmatmul.mubr.bf16.gmra.mxu1 %v976_v39  ;;  %510 = vmatprep.mubr.bf16.mxu0 %v977_v40 }
  0x2d   :  { %607 = vmatprep.mubr.bf16.mxu1 %v979_v41 }
  0x33   :  { %511 = vmatmul.mubr.bf16.gmra.mxu0 %v981_v42 }
  0x34   :  { %608 = vmatmul.mubr.bf16.gmra.mxu1 %v982_v43  ;;  %518 = vmatprep.mubr.bf16.mxu0 %v983_v44 }
  0x35   :  { %615 = vmatprep.mubr.bf16.mxu1 %v985_v45 }
  0x3b   :  { %519 = vmatmul.mubr.bf16.gmra.mxu0 %v987_v46 }
  0x3c   :  { %616 = vmatmul.mubr.bf16.gmra.mxu1 %v988_v47  ;;  %526 = vmatprep.mubr.bf16.mxu0 %v989_v48 }
  0x3d   :  { %623 = vmatprep.mubr.bf16.mxu1 %v991_v49 }
  0x43   :  { %527 = vmatmul.mubr.bf16.gmra.mxu0 %v993_v50 }
  0x44   :  { %624 = vmatmul.mubr.bf16.gmra.mxu1 %v994_v51  ;;  %534 = vmatprep.mubr.bf16.mxu0 %v995_v52 }
  0x45   :  { %631 = vmatprep.mubr.bf16.mxu1 %v997_v53 }
  0x4b   :  { %535 = vmatmul.mubr.bf16.gmra.mxu0 %v999_v54 }
  0x4c   :  { %632 = vmatmul.mubr.bf16.gmra.mxu1 %v1000_v55  ;;  %542 = vmatprep.mubr.bf16.mxu0 %v1001_v56 }
  0x4d   :  { %639 = vmatprep.mubr.bf16.mxu1 %v1003_v57 }
  0x53   :  { %543 = vmatmul.mubr.bf16.gmra.mxu0 %v1005_v58 }
  0x54   :  { %640 = vmatmul.mubr.bf16.gmra.mxu1 %v1006_v59  ;;  %550 = vmatprep.mubr.bf16.mxu0 %v1007_v60 }
  0x55   :  { %647 = vmatprep.mubr.bf16.mxu1 %v1009_v61 }
  0x5b   :  { %551 = vmatmul.mubr.bf16.gmra.mxu0 %v1011_v62 }
  0x5c   :  { %648 = vmatmul.mubr.bf16.gmra.mxu1 %v1012_v63 }
  0xe3   :  { %v821_v0 = vpop.f32.mrf.mxu0 }
  0xe4   :  { %v885_v1 = vpop.f32.mrf.mxu1 }
  0xe5   :  { %v822_v2 = vpop.f32.mrf.mxu0 }
  0xe6   :  { %v823_v3 = vadd.f32 %v822_v2, %v821_v0  ;;  %v886_v4 = vpop.f32.mrf.mxu1 }
  0xe7   :  { %v887_v5 = vadd.f32 %v886_v4, %v885_v1  ;;  %v824_v6 = vpop.f32.mrf.mxu0 }
  0xe8   :  { %v888_v7 = vpop.f32.mrf.mxu1 }
  0xe9   :  { %v1225_v8 = vadd.f32 %v887_v5, %v823_v3  ;;  %v825_v9 = vpop.f32.mrf.mxu0 }
  0xea   :  { %v826_v10 = vadd.f32 %v825_v9, %v824_v6  ;;  %v889_v11 = vpop.f32.mrf.mxu1 }
  0xeb   :  { %656 = vst [vmem:[%s1284_s2] sm:$0xff] %v1225_v8  ;;  %v890_v12 = vadd.f32 %v889_v11, %v888_v7  ;;  %v827_v13 = vpop.f32.mrf.mxu0  ;;  %v693_v5 = vmul.f32 %v1225_v8, %v1225_v8 }
  0xec   :  { %v891_v14 = vpop.f32.mrf.mxu1 }
  0xed   :  { %v597_v15 = vadd.f32 %v890_v12, %v826_v10  ;;  %v828_v16 = vpop.f32.mrf.mxu0 }
  0xee   :  { %v829_v17 = vadd.f32 %v828_v16, %v827_v13  ;;  %v892_v18 = vpop.f32.mrf.mxu1 }
  0xef   :  { %657 = vst [vmem:[%s1284_s2 + $0x8] sm:$0xff] %v597_v15  ;;  %v893_v19 = vadd.f32 %v892_v18, %v891_v14  ;;  %v830_v20 = vpop.f32.mrf.mxu0  ;;  %v694_v0 = vmul.f32 %v597_v15, %v597_v15  ;;  %v672_v6 = vadd.f32 %v597_v15, %v1225_v8 }
  0xf0   :  { %v894_v21 = vpop.f32.mrf.mxu1 }
  0xf1   :  { %v602_v22 = vadd.f32 %v893_v19, %v829_v17  ;;  %v831_v23 = vpop.f32.mrf.mxu0  ;;  %v709_v12 = vadd.f32 %v694_v0, %v693_v5 }
  0xf2   :  { %v832_v24 = vadd.f32 %v831_v23, %v830_v20  ;;  %v895_v25 = vpop.f32.mrf.mxu1 }
  0xf3   :  { %658 = vst [vmem:[%s1284_s2 + $0x10] sm:$0xff] %v602_v22  ;;  %v896_v26 = vadd.f32 %v895_v25, %v894_v21  ;;  %v833_v27 = vpop.f32.mrf.mxu0  ;;  %v695_v7 = vmul.f32 %v602_v22, %v602_v22  ;;  %v673_v13 = vadd.f32 %v672_v6, %v602_v22 }
  0xf4   :  { %v897_v28 = vpop.f32.mrf.mxu1 }
  0xf5   :  { %v605_v29 = vadd.f32 %v896_v26, %v832_v24  ;;  %v834_v30 = vpop.f32.mrf.mxu0  ;;  %v710_v20 = vadd.f32 %v709_v12, %v695_v7 }
  0xf6   :  { %v835_v31 = vadd.f32 %v834_v30, %v833_v27  ;;  %v898_v32 = vpop.f32.mrf.mxu1 }
  0xf7   :  { %659 = vst [vmem:[%s1284_s2 + $0x18] sm:$0xff] %v605_v29  ;;  %v899_v33 = vadd.f32 %v898_v32, %v897_v28  ;;  %v836_v34 = vpop.f32.mrf.mxu0  ;;  %v696_v14 = vmul.f32 %v605_v29, %v605_v29  ;;  %v674_v21 = vadd.f32 %v673_v13, %v605_v29 }
  0xf8   :  { %v900_v35 = vpop.f32.mrf.mxu1 }
  0xf9   :  { %v610_v36 = vadd.f32 %v899_v33, %v835_v31  ;;  %v837_v37 = vpop.f32.mrf.mxu0  ;;  %v711_v25 = vadd.f32 %v710_v20, %v696_v14 }
  0xfa   :  { %v838_v38 = vadd.f32 %v837_v37, %v836_v34  ;;  %v901_v39 = vpop.f32.mrf.mxu1 }
  0xfb   :  { %660 = vst [vmem:[%s1284_s2 + $0x20] sm:$0xff] %v610_v36  ;;  %v902_v40 = vadd.f32 %v901_v39, %v900_v35  ;;  %v839_v41 = vpop.f32.mrf.mxu0  ;;  %v697_v23 = vmul.f32 %v610_v36, %v610_v36  ;;  %v675_v26 = vadd.f32 %v674_v21, %v610_v36 }
  0xfc   :  { %v903_v42 = vpop.f32.mrf.mxu1 }
  0xfd   :  { %v613_v43 = vadd.f32 %v902_v40, %v838_v38  ;;  %v840_v44 = vpop.f32.mrf.mxu0  ;;  %v712_v32 = vadd.f32 %v711_v25, %v697_v23 }
  0xfe   :  { %v841_v45 = vadd.f32 %v840_v44, %v839_v41  ;;  %v904_v46 = vpop.f32.mrf.mxu1 }
  0xff   :  { %661 = vst [vmem:[%s1284_s2 + $0x28] sm:$0xff] %v613_v43  ;;  %v905_v47 = vadd.f32 %v904_v46, %v903_v42  ;;  %v842_v48 = vpop.f32.mrf.mxu0  ;;  %v698_v27 = vmul.f32 %v613_v43, %v613_v43  ;;  %v676_v33 = vadd.f32 %v675_v26, %v613_v43 }
 0x100   :  { %v906_v49 = vpop.f32.mrf.mxu1 }
 0x101   :  { %v618_v50 = vadd.f32 %v905_v47, %v841_v45  ;;  %v843_v51 = vpop.f32.mrf.mxu0  ;;  %v713_v38 = vadd.f32 %v712_v32, %v698_v27 }
 0x102   :  { %v844_v52 = vadd.f32 %v843_v51, %v842_v48  ;;  %v907_v53 = vpop.f32.mrf.mxu1 }
 0x103   :  { %662 = vst [vmem:[%s1284_s2 + $0x30] sm:$0xff] %v618_v50  ;;  %v908_v54 = vadd.f32 %v907_v53, %v906_v49  ;;  %v845_v55 = vpop.f32.mrf.mxu0  ;;  %v699_v34 = vmul.f32 %v618_v50, %v618_v50  ;;  %v677_v39 = vadd.f32 %v676_v33, %v618_v50 }
 0x104   :  { %v909_v56 = vpop.f32.mrf.mxu1 }
 0x105   :  { %v621_v57 = vadd.f32 %v908_v54, %v844_v52  ;;  %v846_v58 = vpop.f32.mrf.mxu0  ;;  %v714_v45 = vadd.f32 %v713_v38, %v699_v34 }
 0x106   :  { %v847_v59 = vadd.f32 %v846_v58, %v845_v55  ;;  %v910_v60 = vpop.f32.mrf.mxu1 }
 0x107   :  { %663 = vst [vmem:[%s1284_s2 + $0x38] sm:$0xff] %v621_v57  ;;  %v911_v61 = vadd.f32 %v910_v60, %v909_v56  ;;  %v848_v62 = vpop.f32.mrf.mxu0  ;;  %v700_v40 = vmul.f32 %v621_v57, %v621_v57  ;;  %v678_v46 = vadd.f32 %v677_v39, %v621_v57 }
 0x108   :  { %v912_v63 = vpop.f32.mrf.mxu1 }
 0x109   :  { %v626_v1 = vadd.f32 %v911_v61, %v847_v59  ;;  %v849_v2 = vpop.f32.mrf.mxu0  ;;  %v715_v51 = vadd.f32 %v714_v45, %v700_v40 }
 0x10a   :  { %v850_v3 = vadd.f32 %v849_v2, %v848_v62  ;;  %v913_v4 = vpop.f32.mrf.mxu1 }
 0x10b   :  { %664 = vst [vmem:[%s1284_s2 + $0x40] sm:$0xff] %v626_v1  ;;  %v914_v9 = vadd.f32 %v913_v4, %v912_v63  ;;  %v851_v10 = vpop.f32.mrf.mxu0  ;;  %v701_v47 = vmul.f32 %v626_v1, %v626_v1  ;;  %v679_v52 = vadd.f32 %v678_v46, %v626_v1 }
 0x10c   :  { %v915_v11 = vpop.f32.mrf.mxu1 }
 0x10d   :  { %v629_v16 = vadd.f32 %v914_v9, %v850_v3  ;;  %v852_v17 = vpop.f32.mrf.mxu0  ;;  %v716_v58 = vadd.f32 %v715_v51, %v701_v47 }
 0x10e   :  { %v853_v18 = vadd.f32 %v852_v17, %v851_v10  ;;  %v916_v19 = vpop.f32.mrf.mxu1 }
 0x10f   :  { %665 = vst [vmem:[%s1284_s2 + $0x48] sm:$0xff] %v629_v16  ;;  %v917_v8 = vadd.f32 %v916_v19, %v915_v11  ;;  %v854_v15 = vpop.f32.mrf.mxu0  ;;  %v702_v53 = vmul.f32 %v629_v16, %v629_v16  ;;  %v680_v59 = vadd.f32 %v679_v52, %v629_v16 }
 0x110   :  { %v918_v24 = vpop.f32.mrf.mxu1 }
 0x111   :  { %v634_v28 = vadd.f32 %v917_v8, %v853_v18  ;;  %v855_v22 = vpop.f32.mrf.mxu0  ;;  %v717_v63 = vadd.f32 %v716_v58, %v702_v53 }
 0x112   :  { %v856_v30 = vadd.f32 %v855_v22, %v854_v15  ;;  %v919_v31 = vpop.f32.mrf.mxu1 }
 0x113   :  { %666 = vst [vmem:[%s1284_s2 + $0x50] sm:$0xff] %v634_v28  ;;  %v920_v29 = vadd.f32 %v919_v31, %v918_v24  ;;  %v857_v35 = vpop.f32.mrf.mxu0  ;;  %v703_v60 = vmul.f32 %v634_v28, %v634_v28  ;;  %v681_v0 = vadd.f32 %v680_v59, %v634_v28 }
 0x114   :  { %v921_v37 = vpop.f32.mrf.mxu1 }
 0x115   :  { %v637_v41 = vadd.f32 %v920_v29, %v856_v30  ;;  %v858_v36 = vpop.f32.mrf.mxu0  ;;  %v718_v6 = vadd.f32 %v717_v63, %v703_v60 }
 0x116   :  { %v859_v42 = vadd.f32 %v858_v36, %v857_v35  ;;  %v922_v44 = vpop.f32.mrf.mxu1 }
 0x117   :  { %667 = vst [vmem:[%s1284_s2 + $0x58] sm:$0xff] %v637_v41  ;;  %v923_v43 = vadd.f32 %v922_v44, %v921_v37  ;;  %v860_v48 = vpop.f32.mrf.mxu0  ;;  %v704_v2 = vmul.f32 %v637_v41, %v637_v41  ;;  %v682_v7 = vadd.f32 %v681_v0, %v637_v41 }
 0x118   :  { %v924_v49 = vpop.f32.mrf.mxu1 }
 0x119   :  { %v642_v54 = vadd.f32 %v923_v43, %v859_v42  ;;  %v861_v50 = vpop.f32.mrf.mxu0  ;;  %v719_v13 = vadd.f32 %v718_v6, %v704_v2 }
 0x11a   :  { %v862_v55 = vadd.f32 %v861_v50, %v860_v48  ;;  %v925_v56 = vpop.f32.mrf.mxu1 }
 0x11b   :  { %668 = vst [vmem:[%s1284_s2 + $0x60] sm:$0xff] %v642_v54  ;;  %v926_v57 = vadd.f32 %v925_v56, %v924_v49  ;;  %v863_v61 = vpop.f32.mrf.mxu0  ;;  %v705_v9 = vmul.f32 %v642_v54, %v642_v54  ;;  %v683_v14 = vadd.f32 %v682_v7, %v642_v54 }
 0x11c   :  { %v927_v62 = vpop.f32.mrf.mxu1 }
 0x11d   :  { %v645_v3 = vadd.f32 %v926_v57, %v862_v55  ;;  %v864_v1 = vpop.f32.mrf.mxu0  ;;  %v720_v21 = vadd.f32 %v719_v13, %v705_v9 }
 0x11e   :  { %v865_v4 = vadd.f32 %v864_v1, %v863_v61  ;;  %v928_v5 = vpop.f32.mrf.mxu1 }
 0x11f   :  { %669 = vst [vmem:[%s1284_s2 + $0x68] sm:$0xff] %v645_v3  ;;  %v929_v10 = vadd.f32 %v928_v5, %v927_v62  ;;  %v866_v11 = vpop.f32.mrf.mxu0  ;;  %v706_v16 = vmul.f32 %v645_v3, %v645_v3  ;;  %v684_v23 = vadd.f32 %v683_v14, %v645_v3 }
 0x120   :  { %v930_v12 = vpop.f32.mrf.mxu1 }
 0x121   :  { %v650_v17 = vadd.f32 %v929_v10, %v865_v4  ;;  %v867_v18 = vpop.f32.mrf.mxu0  ;;  %v721_v24 = vadd.f32 %v720_v21, %v706_v16 }
 0x122   :  { %v868_v19 = vadd.f32 %v867_v18, %v866_v11  ;;  %v931_v20 = vpop.f32.mrf.mxu1 }
 0x123   :  { %670 = vst [vmem:[%s1284_s2 + $0x70] sm:$0xff] %v650_v17  ;;  %v707_v8 = vmul.f32 %v650_v17, %v650_v17  ;;  %v932_v15 = vadd.f32 %v931_v20, %v930_v12  ;;  %v685_v25 = vadd.f32 %v684_v23, %v650_v17 }
 0x125   :  { %v653_v26 = vadd.f32 %v932_v15, %v868_v19  ;;  %v722_v27 = vadd.f32 %v721_v24, %v707_v8 }
 0x127   :  { %671 = vst [vmem:[%s1284_s2 + $0x78] sm:$0xff] %v653_v26  ;;  %v686_v28 = vadd.f32 %v685_v25, %v653_v26  ;;  %v708_v22 = vmul.f32 %v653_v26, %v653_v26 }
 0x129   :  { %v687_v30 = vrot.slane %v686_v28, 4  ;;  %v723_v31 = vadd.f32 %v722_v27, %v708_v22 }
 0x12b   :  { %v688_v32 = vadd.f32 %v687_v30, %v686_v28  ;;  %v724_v33 = vrot.slane %v723_v31, 4 }
 0x12d   :  { %v689_v34 = vrot.slane %v688_v32, 2  ;;  %v725_v29 = vadd.f32 %v724_v33, %v723_v31 }
 0x12f   :  { %v690_v35 = vadd.f32 %v689_v34, %v688_v32  ;;  %v726_v37 = vrot.slane %v725_v29, 2 }
 0x131   :  { %v691_v38 = vrot.slane %v690_v35, 1  ;;  %v727_v39 = vadd.f32 %v726_v37, %v725_v29 }
 0x133   :  { %v728_v40 = vrot.slane %v727_v39, 1  ;;  %v692_v41 = vadd.f32 %v691_v38, %v690_v35 }
 0x135   :  { %v729_v36 = vadd.f32 %v728_v40, %v727_v39 }
 0x137   :  { %v731_v42 = vsel %vm730_vm0, %v692_v41, %v729_v36 }
 0x138   :  { %732 = vst [vmem:[%s1285_s3] sm:$0x3] %v731_v42 }

// kernel: _lambda_.12
= control target key start
LH: loop header
LB: loop body
LE: loop exit
PB: predicated region body
PF: predicated region fallthrough
CT: control target
= control target key end

     0   :  { %s423_s0 = inlined_call_operand.vmem [shape: f32[128,128], index: 0, kind: input, shape index: {}]   ;;  %s424_s1 = inlined_call_operand.vmem [shape: f32[1,128], index: 1, kind: input, shape index: {}]   ;;  %s425_s2 = inlined_call_operand.vmem [shape: f32[1,128], index: 2, kind: input, shape index: {}]   ;;  %s426_s3 = inlined_call_operand.vmem [shape: bf16[128,128], index: 3, kind: output, shape index: {}]  }
   0x1   :  { %v14_v0 = vld [vmem:[%s423_s0] sm:$0xff]  ;;  %v15_v1 = vld [vmem:[%s423_s0 + $0x8] sm:$0xff]  ;;  %v16_v6 = vld [vmem:[%s423_s0 + $0x10] sm:$0xff] }
   0x2   :  { %v318_v2 = vld [vmem:[%s424_s1] ss:$0 sm:$0xff]  ;;  %v17_v7 = vld [vmem:[%s423_s0 + $0x18] sm:$0xff]  ;;  %v19_v11 = vld [vmem:[%s423_s0 + $0x28] sm:$0xff] }
   0x3   :  { %v37_v3 = vmul.f32 %v318_v2, %v14_v0  ;;  %v38_v4 = vmul.f32 %v318_v2, %v15_v1  ;;  %v325_v5 = vld [vmem:[%s425_s2] ss:$0 sm:$0xff]  ;;  %v39_v8 = vmul.f32 %v318_v2, %v16_v6  ;;  %v40_v9 = vmul.f32 %v318_v2, %v17_v7  ;;  %v20_v12 = vld [vmem:[%s423_s0 + $0x30] sm:$0xff]  ;;  %v21_v17 = vld [vmem:[%s423_s0 + $0x38] sm:$0xff] }
   0x4   :  { %v18_v10 = vld [vmem:[%s423_s0 + $0x20] sm:$0xff]  ;;  %v42_v16 = vmul.f32 %v318_v2, %v19_v11  ;;  %v43_v20 = vmul.f32 %v318_v2, %v20_v12  ;;  %v44_v21 = vmul.f32 %v318_v2, %v21_v17  ;;  %v23_v35 = vld [vmem:[%s423_s0 + $0x48] sm:$0xff]  ;;  %v24_v36 = vld [vmem:[%s423_s0 + $0x50] sm:$0xff] }
   0x5   :  { %v60_v13 = vadd.f32 %v325_v5, %v37_v3  ;;  %v61_v14 = vadd.f32 %v325_v5, %v38_v4  ;;  %v41_v15 = vmul.f32 %v318_v2, %v18_v10  ;;  %v62_v18 = vadd.f32 %v325_v5, %v39_v8  ;;  %v22_v34 = vld [vmem:[%s423_s0 + $0x40] sm:$0xff]  ;;  %v25_v42 = vld [vmem:[%s423_s0 + $0x58] sm:$0xff]  ;;  %v27_v48 = vld [vmem:[%s423_s0 + $0x68] sm:$0xff] }
   0x6   :  { %v63_v19 = vadd.f32 %v325_v5, %v40_v9  ;;  %v65_v29 = vadd.f32 %v325_v5, %v42_v16  ;;  %v66_v33 = vadd.f32 %v325_v5, %v43_v20  ;;  %v67_v40 = vadd.f32 %v325_v5, %v44_v21  ;;  %v26_v47 = vld [vmem:[%s423_s0 + $0x60] sm:$0xff]  ;;  %v28_v60 = vld [vmem:[%s423_s0 + $0x70] sm:$0xff]  ;;  %v29_v7 = vld [vmem:[%s423_s0 + $0x78] sm:$0xff] }
   0x7   :  { %vm76_vm0 = vcmp.ge.f32.partialorder %v60_v13, 0.0  ;;  %vm77_vm1 = vcmp.ge.f32.partialorder %v61_v14, 0.0  ;;  %v92_v22 = vmul.f32 0.2, %v60_v13  ;;  %v93_v23 = vmul.f32 0.2, %v61_v14 }
   0x8   :  { %vm78_vm2 = vcmp.ge.f32.partialorder %v62_v18, 0.0  ;;  %vm79_vm3 = vcmp.ge.f32.partialorder %v63_v19, 0.0  ;;  %v94_v24 = vmul.f32 0.2, %v62_v18  ;;  %v95_v25 = vmul.f32 0.2, %v63_v19 }
   0x9   :  { %v108_v26 = vsel %vm76_vm0, %v60_v13, %v92_v22  ;;  %v109_v27 = vsel %vm77_vm1, %v61_v14, %v93_v23  ;;  %v64_v28 = vadd.f32 %v325_v5, %v41_v15  ;;  %vm81_vm5 = vcmp.ge.f32.partialorder %v65_v29, 0.0 }
   0xa   :  { %v245_v30 = vpack.c.bf16 %v109_v27, %v108_v26  ;;  %v110_v31 = vsel %vm78_vm2, %v62_v18, %v94_v24  ;;  %v111_v32 = vsel %vm79_vm3, %v63_v19, %v95_v25  ;;  %v97_v39 = vmul.f32 0.2, %v65_v29 }
   0xb   :  { %v250_v37 = vpack.c.bf16 %v111_v32, %v110_v31  ;;  %vm80_vm4 = vcmp.ge.f32.partialorder %v64_v28, 0.0  ;;  %v96_v38 = vmul.f32 0.2, %v64_v28  ;;  %vm82_vm6 = vcmp.ge.f32.partialorder %v66_v33, 0.0 }
   0xc   :  { %246 = vst [vmem:[%s426_s3] sm:$0xff] %v245_v30   ;;  %v98_v41 = vmul.f32 0.2, %v66_v33  ;;  %v45_v44 = vmul.f32 %v318_v2, %v22_v34  ;;  %v46_v45 = vmul.f32 %v318_v2, %v23_v35  ;;  %v47_v46 = vmul.f32 %v318_v2, %v24_v36 }
   0xd   :  { %282 = vst [vmem:[%s426_s3 + $0x8] sm:$0xff] %v250_v37   ;;  %v112_v43 = vsel %vm80_vm4, %v64_v28, %v96_v38  ;;  %v113_v49 = vsel %vm81_vm5, %v65_v29, %v97_v39  ;;  %vm83_vm7 = vcmp.ge.f32.partialorder %v67_v40, 0.0  ;;  %v99_v50 = vmul.f32 0.2, %v67_v40 }
   0xe   :  { %v114_v51 = vsel %vm82_vm6, %v66_v33, %v98_v41  ;;  %v255_v52 = vpack.c.bf16 %v113_v49, %v112_v43  ;;  %v68_v53 = vadd.f32 %v325_v5, %v45_v44  ;;  %v69_v54 = vadd.f32 %v325_v5, %v46_v45 }
   0xf   :  { %v48_v55 = vmul.f32 %v318_v2, %v25_v42  ;;  %v115_v56 = vsel %vm83_vm7, %v67_v40, %v99_v50  ;;  %v70_v57 = vadd.f32 %v325_v5, %v47_v46  ;;  %v49_v58 = vmul.f32 %v318_v2, %v26_v47 }
  0x10   :  { %v50_v59 = vmul.f32 %v318_v2, %v27_v48  ;;  %283 = vst [vmem:[%s426_s3 + $0x10] sm:$0xff] %v255_v52   ;;  %v260_v61 = vpack.c.bf16 %v115_v56, %v114_v51  ;;  %vm84_vm8 = vcmp.ge.f32.partialorder %v68_v53, 0.0  ;;  %vm85_vm9 = vcmp.ge.f32.partialorder %v69_v54, 0.0 }
  0x11   :  { %v100_v62 = vmul.f32 0.2, %v68_v53  ;;  %v101_v63 = vmul.f32 0.2, %v69_v54  ;;  %v71_v0 = vadd.f32 %v325_v5, %v48_v55  ;;  %vm86_vm10 = vcmp.ge.f32.partialorder %v70_v57, 0.0 }
  0x12   :  { %v102_v1 = vmul.f32 0.2, %v70_v57  ;;  %284 = vst [vmem:[%s426_s3 + $0x18] sm:$0xff] %v260_v61   ;;  %v72_v4 = vadd.f32 %v325_v5, %v49_v58  ;;  %v73_v6 = vadd.f32 %v325_v5, %v50_v59  ;;  %v51_v8 = vmul.f32 %v318_v2, %v28_v60 }
  0x13   :  { %v116_v3 = vsel %vm84_vm8, %v68_v53, %v100_v62  ;;  %v117_v9 = vsel %vm85_vm9, %v69_v54, %v101_v63  ;;  %vm87_vm11 = vcmp.ge.f32.partialorder %v71_v0, 0.0  ;;  %v103_v10 = vmul.f32 0.2, %v71_v0 }
  0x14   :  { %v118_v11 = vsel %vm86_vm10, %v70_v57, %v102_v1  ;;  %v265_v12 = vpack.c.bf16 %v117_v9, %v116_v3  ;;  %vm88_vm12 = vcmp.ge.f32.partialorder %v72_v4, 0.0  ;;  %vm89_vm13 = vcmp.ge.f32.partialorder %v73_v6, 0.0 }
  0x15   :  { %v104_v13 = vmul.f32 0.2, %v72_v4  ;;  %v119_v14 = vsel %vm87_vm11, %v71_v0, %v103_v10  ;;  %v105_v15 = vmul.f32 0.2, %v73_v6  ;;  %v52_v16 = vmul.f32 %v318_v2, %v29_v7 }
  0x16   :  { %v74_v17 = vadd.f32 %v325_v5, %v51_v8  ;;  %285 = vst [vmem:[%s426_s3 + $0x20] sm:$0xff] %v265_v12   ;;  %v270_v18 = vpack.c.bf16 %v119_v14, %v118_v11 }
  0x17   :  { %v120_v19 = vsel %vm88_vm12, %v72_v4, %v104_v13  ;;  %v121_v20 = vsel %vm89_vm13, %v73_v6, %v105_v15  ;;  %v75_v21 = vadd.f32 %v325_v5, %v52_v16 }
  0x18   :  { %vm90_vm14 = vcmp.ge.f32.partialorder %v74_v17, 0.0  ;;  %v106_v22 = vmul.f32 0.2, %v74_v17  ;;  %286 = vst [vmem:[%s426_s3 + $0x28] sm:$0xff] %v270_v18   ;;  %v275_v23 = vpack.c.bf16 %v121_v20, %v120_v19 }
  0x19   :  { %vm91_vm15 = vcmp.ge.f32.partialorder %v75_v21, 0.0  ;;  %v107_v2 = vmul.f32 0.2, %v75_v21 }
  0x1a   :  { %v122_v24 = vsel %vm90_vm14, %v74_v17, %v106_v22  ;;  %287 = vst [vmem:[%s426_s3 + $0x30] sm:$0xff] %v275_v23  }
  0x1b   :  { %v123_v25 = vsel %vm91_vm15, %v75_v21, %v107_v2 }
  0x1c   :  { %v280_v26 = vpack.c.bf16 %v123_v25, %v122_v24 }
  0x1e   :  { %288 = vst [vmem:[%s426_s3 + $0x38] sm:$0xff] %v280_v26  }

// kernel: _lambda_.13
= control target key start
LH: loop header
LB: loop body
LE: loop exit
PB: predicated region body
PF: predicated region fallthrough
CT: control target
= control target key end

     0   :  { %vm756_vm0 = vcmask 1040384   ;;  %s1236_s1 = inlined_call_operand.vmem [shape: bf16[1024,128], index: 1, kind: input, shape index: {}]   ;;  %s1237_s0 = inlined_call_operand.vmem [shape: bf16[16,1024], index: 0, kind: input, shape index: {}]   ;;  %s1238_s2 = inlined_call_operand.vmem [shape: f32[16,128], index: 2, kind: output, shape index: {0}]   ;;  %s1239_s3 = inlined_call_operand.vmem [shape: f32[1,2,128], index: 3, kind: output, shape index: {1}]  }
   0x1   :  { %v927_v0 = vld [vmem:[%s1236_s1 + $0x78] sm:$0xff]   ;;  %v931_v4 = vld [vmem:[%s1236_s1 + $0x70] sm:$0xff]   ;;  %v935_v8 = vld [vmem:[%s1236_s1 + $0x68] sm:$0xff]  }
   0x2   :  { %v928_v1 = vld [vmem:[%s1236_s1 + $0xf8] sm:$0xff]   ;;  %839 = vmatprep.subr.bf16.mxu0 %v927_v0  ;;  %v932_v5 = vld [vmem:[%s1236_s1 + $0xf0] sm:$0xff]   ;;  %v936_v9 = vld [vmem:[%s1236_s1 + $0xe8] sm:$0xff]  }
   0x3   :  { %v929_v2 = vld [vmem:[%s1236_s1 + $0x38] sm:$0xff]   ;;  %861 = vmatprep.subr.bf16.mxu1 %v928_v1  ;;  %v933_v6 = vld [vmem:[%s1236_s1 + $0x30] sm:$0xff]   ;;  %v937_v10 = vld [vmem:[%s1236_s1 + $0x28] sm:$0xff]  }
   0x4   :  { %v930_v3 = vld [vmem:[%s1236_s1 + $0xb8] sm:$0xff]   ;;  %840 = vmatpush3.bf16.msra.mxu0 %v929_v2  ;;  %v934_v7 = vld [vmem:[%s1236_s1 + $0xb0] sm:$0xff]   ;;  %v938_v11 = vld [vmem:[%s1236_s1 + $0xa8] sm:$0xff]  }
   0x5   :  { %862 = vmatpush3.bf16.msra.mxu1 %v930_v3  ;;  %841 = vmatprep.subr.bf16.mxu0 %v931_v4  ;;  %v939_v12 = vld [vmem:[%s1236_s1 + $0x60] sm:$0xff]   ;;  %v943_v16 = vld [vmem:[%s1236_s1 + $0x58] sm:$0xff]   ;;  %v947_v20 = vld [vmem:[%s1236_s1 + $0x50] sm:$0xff]  }
   0x6   :  { %863 = vmatprep.subr.bf16.mxu1 %v932_v5  ;;  %v940_v13 = vld [vmem:[%s1236_s1 + $0xe0] sm:$0xff]   ;;  %v944_v17 = vld [vmem:[%s1236_s1 + $0xd8] sm:$0xff]   ;;  %v948_v21 = vld [vmem:[%s1236_s1 + $0xd0] sm:$0xff]  }
   0x7   :  { %v941_v14 = vld [vmem:[%s1236_s1 + $0x20] sm:$0xff]   ;;  %v945_v18 = vld [vmem:[%s1236_s1 + $0x18] sm:$0xff]   ;;  %v949_v22 = vld [vmem:[%s1236_s1 + $0x10] sm:$0xff]  }
   0x8   :  { %842 = vmatpush3.bf16.msra.mxu0 %v933_v6  ;;  %v942_v15 = vld [vmem:[%s1236_s1 + $0xa0] sm:$0xff]   ;;  %v946_v19 = vld [vmem:[%s1236_s1 + $0x98] sm:$0xff]   ;;  %v950_v23 = vld [vmem:[%s1236_s1 + $0x90] sm:$0xff]  }
   0x9   :  { %864 = vmatpush3.bf16.msra.mxu1 %v934_v7  ;;  %843 = vmatprep.subr.bf16.mxu0 %v935_v8  ;;  %v951_v24 = vld [vmem:[%s1236_s1 + $0x48] sm:$0xff]   ;;  %v955_v28 = vld [vmem:[%s1236_s1 + $0x40] sm:$0xff]   ;;  %v959_v40 = vld [vmem:[%s1236_s1 + $0x178] sm:$0xff]  }
   0xa   :  { %865 = vmatprep.subr.bf16.mxu1 %v936_v9  ;;  %v952_v25 = vld [vmem:[%s1236_s1 + $0xc8] sm:$0xff]   ;;  %v956_v29 = vld [vmem:[%s1236_s1 + $0xc0] sm:$0xff]   ;;  %v960_v41 = vld [vmem:[%s1236_s1 + $0x1f8] sm:$0xff]  }
   0xb   :  { %v953_v26 = vld [vmem:[%s1236_s1 + $0x8] sm:$0xff]   ;;  %v957_v30 = vld [vmem:[%s1236_s1] sm:$0xff]   ;;  %v961_v42 = vld [vmem:[%s1236_s1 + $0x138] sm:$0xff]  }
   0xc   :  { %844 = vmatpush3.bf16.msra.mxu0 %v937_v10  ;;  %v954_v27 = vld [vmem:[%s1236_s1 + $0x88] sm:$0xff]   ;;  %v958_v31 = vld [vmem:[%s1236_s1 + $0x80] sm:$0xff]   ;;  %v962_v43 = vld [vmem:[%s1236_s1 + $0x1b8] sm:$0xff]  }
   0xd   :  { %866 = vmatpush3.bf16.msra.mxu1 %v938_v11  ;;  %845 = vmatprep.subr.bf16.mxu0 %v939_v12  ;;  %v14_v32 = vld [vmem:[%s1237_s0] sm:$0xff]  ;;  %v15_v34 = vld [vmem:[%s1237_s0 + $0x8] sm:$0xff]  ;;  %v963_v44 = vld [vmem:[%s1236_s1 + $0x170] sm:$0xff]  }
   0xe   :  { %867 = vmatprep.subr.bf16.mxu1 %v940_v13  ;;  %v18_v33 = vld [vmem:[%s1237_s0 + $0x20] sm:$0xff]  ;;  %v19_v37 = vld [vmem:[%s1237_s0 + $0x28] sm:$0xff]  ;;  %v964_v45 = vld [vmem:[%s1236_s1 + $0x1f0] sm:$0xff]  }
   0xf   :  { %v767_v35 = vcombine.low %v14_v32, %v18_v33  ;;  %v768_v36 = vcombine.high %v14_v32, %v18_v33  ;;  %v769_v38 = vcombine.low %v15_v34, %v19_v37  ;;  %v770_v39 = vcombine.high %v15_v34, %v19_v37  ;;  %v965_v46 = vld [vmem:[%s1236_s1 + $0x130] sm:$0xff]   ;;  %v967_v48 = vld [vmem:[%s1236_s1 + $0x168] sm:$0xff]   ;;  %v971_v52 = vld [vmem:[%s1236_s1 + $0x160] sm:$0xff]  }
  0x10   :  { %846 = vmatpush3.bf16.msra.mxu0 %v941_v14  ;;  %v966_v47 = vld [vmem:[%s1236_s1 + $0x1b0] sm:$0xff]   ;;  %v968_v49 = vld [vmem:[%s1236_s1 + $0x1e8] sm:$0xff]   ;;  %v972_v53 = vld [vmem:[%s1236_s1 + $0x1e0] sm:$0xff]  }
  0x11   :  { %868 = vmatpush3.bf16.msra.mxu1 %v942_v15  ;;  %847 = vmatprep.subr.bf16.mxu0 %v943_v16  ;;  %v969_v50 = vld [vmem:[%s1236_s1 + $0x128] sm:$0xff]   ;;  %v973_v54 = vld [vmem:[%s1236_s1 + $0x120] sm:$0xff]   ;;  %v975_v56 = vld [vmem:[%s1236_s1 + $0x158] sm:$0xff]  }
  0x12   :  { %869 = vmatprep.subr.bf16.mxu1 %v944_v17  ;;  %606 = vmatprep.mubr.bf16.mxu0 %v768_v36  ;;  %v970_v51 = vld [vmem:[%s1236_s1 + $0x1a8] sm:$0xff]   ;;  %v974_v55 = vld [vmem:[%s1236_s1 + $0x1a0] sm:$0xff]   ;;  %v976_v57 = vld [vmem:[%s1236_s1 + $0x1d8] sm:$0xff]  }
  0x13   :  { %647 = vmatprep.mubr.bf16.mxu1 %v770_v39  ;;  %v977_v58 = vld [vmem:[%s1236_s1 + $0x118] sm:$0xff]   ;;  %v979_v60 = vld [vmem:[%s1236_s1 + $0x150] sm:$0xff]   ;;  %v983_v0 = vld [vmem:[%s1236_s1 + $0x148] sm:$0xff]  }
  0x14   :  { %848 = vmatpush3.bf16.msra.mxu0 %v945_v18  ;;  %v978_v59 = vld [vmem:[%s1236_s1 + $0x198] sm:$0xff]   ;;  %v980_v61 = vld [vmem:[%s1236_s1 + $0x1d0] sm:$0xff]   ;;  %v984_v1 = vld [vmem:[%s1236_s1 + $0x1c8] sm:$0xff]  }
  0x15   :  { %870 = vmatpush3.bf16.msra.mxu1 %v946_v19  ;;  %849 = vmatprep.subr.bf16.mxu0 %v947_v20  ;;  %v981_v62 = vld [vmem:[%s1236_s1 + $0x110] sm:$0xff]   ;;  %v985_v2 = vld [vmem:[%s1236_s1 + $0x108] sm:$0xff]   ;;  %v987_v4 = vld [vmem:[%s1236_s1 + $0x140] sm:$0xff]  }
  0x16   :  { %871 = vmatprep.subr.bf16.mxu1 %v948_v21  ;;  %v982_v63 = vld [vmem:[%s1236_s1 + $0x190] sm:$0xff]   ;;  %v986_v3 = vld [vmem:[%s1236_s1 + $0x188] sm:$0xff]   ;;  %v988_v5 = vld [vmem:[%s1236_s1 + $0x1c0] sm:$0xff]  }
  0x17   :  { %v989_v6 = vld [vmem:[%s1236_s1 + $0x100] sm:$0xff]   ;;  %v16_v8 = vld [vmem:[%s1237_s0 + $0x10] sm:$0xff]  ;;  %v17_v12 = vld [vmem:[%s1237_s0 + $0x18] sm:$0xff] }
  0x18   :  { %850 = vmatpush3.bf16.msra.mxu0 %v949_v22  ;;  %v990_v7 = vld [vmem:[%s1236_s1 + $0x180] sm:$0xff]   ;;  %v20_v9 = vld [vmem:[%s1237_s0 + $0x30] sm:$0xff]  ;;  %v21_v13 = vld [vmem:[%s1237_s0 + $0x38] sm:$0xff] }
  0x19   :  { %872 = vmatpush3.bf16.msra.mxu1 %v950_v23  ;;  %851 = vmatprep.subr.bf16.mxu0 %v951_v24  ;;  %v771_v10 = vcombine.low %v16_v8, %v20_v9  ;;  %v772_v11 = vcombine.high %v16_v8, %v20_v9  ;;  %v773_v14 = vcombine.low %v17_v12, %v21_v13 }
  0x1a   :  { %873 = vmatprep.subr.bf16.mxu1 %v952_v25  ;;  %v774_v15 = vcombine.high %v17_v12, %v21_v13 }
  0x1c   :  { %852 = vmatpush3.bf16.msra.mxu0 %v953_v26 }
  0x1d   :  { %874 = vmatpush3.bf16.msra.mxu1 %v954_v27  ;;  %853 = vmatprep.subr.bf16.mxu0 %v955_v28 }
  0x1e   :  { %875 = vmatprep.subr.bf16.mxu1 %v956_v29 }
  0x20   :  { %854 = vmatpush3.bf16.msra.mxu0 %v957_v30 }
  0x21   :  { %876 = vmatpush3.bf16.msra.mxu1 %v958_v31  ;;  %883 = vmatprep.subr.bf16.mxu0 %v959_v40 }
  0x22   :  { %905 = vmatprep.subr.bf16.mxu1 %v960_v41 }
  0x23   :  { %607 = vmatmul.mubr.bf16.vlgmr.msra.gmra.mxu0 %v767_v35 }
  0x24   :  { %648 = vmatmul.mubr.bf16.vlgmr.msra.gmra.mxu1 %v769_v38  ;;  %884 = vmatpush3.bf16.msra.mxu0 %v961_v42 }
  0x25   :  { %906 = vmatpush3.bf16.msra.mxu1 %v962_v43  ;;  %885 = vmatprep.subr.bf16.mxu0 %v963_v44 }
  0x26   :  { %907 = vmatprep.subr.bf16.mxu1 %v964_v45  ;;  %688 = vmatprep.mubr.bf16.mxu0 %v772_v11 }
  0x27   :  { %729 = vmatprep.mubr.bf16.mxu1 %v774_v15 }
  0x28   :  { %886 = vmatpush3.bf16.msra.mxu0 %v965_v46 }
  0x29   :  { %908 = vmatpush3.bf16.msra.mxu1 %v966_v47  ;;  %887 = vmatprep.subr.bf16.mxu0 %v967_v48 }
  0x2a   :  { %909 = vmatprep.subr.bf16.mxu1 %v968_v49 }
  0x2c   :  { %888 = vmatpush3.bf16.msra.mxu0 %v969_v50 }
  0x2d   :  { %910 = vmatpush3.bf16.msra.mxu1 %v970_v51  ;;  %889 = vmatprep.subr.bf16.mxu0 %v971_v52 }
  0x2e   :  { %911 = vmatprep.subr.bf16.mxu1 %v972_v53 }
  0x30   :  { %890 = vmatpush3.bf16.msra.mxu0 %v973_v54 }
  0x31   :  { %912 = vmatpush3.bf16.msra.mxu1 %v974_v55  ;;  %891 = vmatprep.subr.bf16.mxu0 %v975_v56 }
  0x32   :  { %913 = vmatprep.subr.bf16.mxu1 %v976_v57 }
  0x34   :  { %892 = vmatpush3.bf16.msra.mxu0 %v977_v58 }
  0x35   :  { %914 = vmatpush3.bf16.msra.mxu1 %v978_v59  ;;  %893 = vmatprep.subr.bf16.mxu0 %v979_v60 }
  0x36   :  { %915 = vmatprep.subr.bf16.mxu1 %v980_v61 }
  0x38   :  { %894 = vmatpush3.bf16.msra.mxu0 %v981_v62 }
  0x39   :  { %916 = vmatpush3.bf16.msra.mxu1 %v982_v63  ;;  %895 = vmatprep.subr.bf16.mxu0 %v983_v0 }
  0x3a   :  { %917 = vmatprep.subr.bf16.mxu1 %v984_v1 }
  0x3c   :  { %896 = vmatpush3.bf16.msra.mxu0 %v985_v2 }
  0x3d   :  { %918 = vmatpush3.bf16.msra.mxu1 %v986_v3  ;;  %897 = vmatprep.subr.bf16.mxu0 %v987_v4 }
  0x3e   :  { %919 = vmatprep.subr.bf16.mxu1 %v988_v5 }
  0x40   :  { %898 = vmatpush3.bf16.msra.mxu0 %v989_v6 }
  0x41   :  { %920 = vmatpush3.bf16.msra.mxu1 %v990_v7 }
  0x43   :  { %689 = vmatmul.mubr.bf16.vlgmr.msra.gmra.mxu0 %v771_v10 }
  0x44   :  { %730 = vmatmul.mubr.bf16.vlgmr.msra.gmra.mxu1 %v773_v14 }
  0xe3   :  { %v855_v16 = vpop.f32.mrf.mxu0 }
  0xe4   :  { %v877_v17 = vpop.f32.mrf.mxu1 }
  0xe5   :  { %v856_v18 = vpop.f32.mrf.mxu0 }
  0xe6   :  { %v878_v19 = vpop.f32.mrf.mxu1  ;;  %v857_v23 = vadd.f32 %v856_v18, %v855_v16 }
  0xe7   :  { %v858_v20 = vpop.f32.mrf.mxu0  ;;  %v879_v24 = vadd.f32 %v878_v19, %v877_v17 }
  0xe8   :  { %v880_v21 = vpop.f32.mrf.mxu1 }
  0xe9   :  { %v859_v22 = vpop.f32.mrf.mxu0  ;;  %v650_v29 = vadd.f32 %v879_v24, %v857_v23 }
  0xea   :  { %v881_v25 = vpop.f32.mrf.mxu1  ;;  %v860_v30 = vadd.f32 %v859_v22, %v858_v20 }
  0xeb   :  { %v882_v31 = vadd.f32 %v881_v25, %v880_v21 }
  0xed   :  { %v653_v39 = vadd.f32 %v882_v31, %v860_v30 }
 0x103   :  { %v899_v26 = vpop.f32.mrf.mxu0 }
 0x104   :  { %v921_v27 = vpop.f32.mrf.mxu1 }
 0x105   :  { %v900_v28 = vpop.f32.mrf.mxu0 }
 0x106   :  { %v901_v32 = vadd.f32 %v900_v28, %v899_v26  ;;  %v922_v33 = vpop.f32.mrf.mxu1 }
 0x107   :  { %v902_v34 = vpop.f32.mrf.mxu0  ;;  %v923_v36 = vadd.f32 %v922_v33, %v921_v27 }
 0x108   :  { %v691_v35 = vadd.f32 %v901_v32, %v650_v29  ;;  %v924_v37 = vpop.f32.mrf.mxu1 }
 0x109   :  { %v903_v38 = vpop.f32.mrf.mxu0 }
 0x10a   :  { %v732_v40 = vadd.f32 %v923_v36, %v691_v35  ;;  %v904_v41 = vadd.f32 %v903_v38, %v902_v34  ;;  %v925_v42 = vpop.f32.mrf.mxu1 }
 0x10b   :  { %v926_v44 = vadd.f32 %v925_v42, %v924_v37 }
 0x10c   :  { %738 = vst [vmem:[%s1238_s2] sm:$0xff] %v732_v40  ;;  %v694_v43 = vadd.f32 %v904_v41, %v653_v39  ;;  %v747_v46 = vmul.f32 %v732_v40, %v732_v40 }
 0x10e   :  { %v735_v45 = vadd.f32 %v926_v44, %v694_v43 }
 0x110   :  { %739 = vst [vmem:[%s1238_s2 + $0x8] sm:$0xff] %v735_v45  ;;  %v740_v47 = vadd.f32 %v735_v45, %v732_v40  ;;  %v748_v48 = vmul.f32 %v735_v45, %v735_v45 }
 0x112   :  { %v741_v49 = vrot.slane %v740_v47, 4  ;;  %v749_v50 = vadd.f32 %v748_v48, %v747_v46 }
 0x114   :  { %v742_v51 = vadd.f32 %v741_v49, %v740_v47  ;;  %v750_v52 = vrot.slane %v749_v50, 4 }
 0x116   :  { %v743_v53 = vrot.slane %v742_v51, 2  ;;  %v751_v54 = vadd.f32 %v750_v52, %v749_v50 }
 0x118   :  { %v744_v55 = vadd.f32 %v743_v53, %v742_v51  ;;  %v752_v56 = vrot.slane %v751_v54, 2 }
 0x11a   :  { %v745_v57 = vrot.slane %v744_v55, 1  ;;  %v753_v58 = vadd.f32 %v752_v56, %v751_v54 }
 0x11c   :  { %v754_v59 = vrot.slane %v753_v58, 1  ;;  %v746_v60 = vadd.f32 %v745_v57, %v744_v55 }
 0x11e   :  { %v755_v61 = vadd.f32 %v754_v59, %v753_v58 }
 0x120   :  { %v757_v62 = vsel %vm756_vm0, %v746_v60, %v755_v61 }
 0x121   :  { %758 = vst [vmem:[%s1239_s3] sm:$0x3] %v757_v62 }

// kernel: _lambda_.14
= control target key start
LH: loop header
LB: loop body
LE: loop exit
PB: predicated region body
PF: predicated region fallthrough
CT: control target
= control target key end

     0   :  { %s100_s0 = inlined_call_operand.vmem [shape: f32[16,128], index: 0, kind: input, shape index: {}]   ;;  %s101_s1 = inlined_call_operand.vmem [shape: f32[1,128], index: 1, kind: input, shape index: {}]   ;;  %s102_s2 = inlined_call_operand.vmem [shape: f32[1,128], index: 2, kind: input, shape index: {}]   ;;  %s103_s3 = inlined_call_operand.vmem [shape: bf16[16,128], index: 3, kind: output, shape index: {}]  }
   0x1   :  { %v14_v0 = vld [vmem:[%s100_s0] sm:$0xff]  ;;  %v15_v1 = vld [vmem:[%s100_s0 + $0x8] sm:$0xff] }
   0x2   :  { %v54_v2 = vld [vmem:[%s101_s1] ss:$0 sm:$0xff] }
   0x3   :  { %v23_v3 = vmul.f32 %v54_v2, %v14_v0  ;;  %v24_v4 = vmul.f32 %v54_v2, %v15_v1  ;;  %v55_v5 = vld [vmem:[%s102_s2] ss:$0 sm:$0xff] }
   0x5   :  { %v32_v6 = vadd.f32 %v55_v5, %v23_v3  ;;  %v33_v7 = vadd.f32 %v55_v5, %v24_v4 }
   0x7   :  { %vm34_vm0 = vcmp.ge.f32.partialorder %v32_v6, 0.0  ;;  %vm35_vm1 = vcmp.ge.f32.partialorder %v33_v7, 0.0  ;;  %v36_v8 = vmul.f32 0.2, %v32_v6  ;;  %v37_v9 = vmul.f32 0.2, %v33_v7 }
   0x9   :  { %v38_v10 = vsel %vm34_vm0, %v32_v6, %v36_v8  ;;  %v39_v11 = vsel %vm35_vm1, %v33_v7, %v37_v9 }
   0xa   :  { %v63_v12 = vpack.c.bf16 %v39_v11, %v38_v10 }
   0xc   :  { %64 = vst [vmem:[%s103_s3] sm:$0xff] %v63_v12  }

// kernel: _lambda_.17
= control target key start
LH: loop header
LB: loop body
LE: loop exit
PB: predicated region body
PF: predicated region fallthrough
CT: control target
= control target key end

     0   :  { %v132_v0 = vmov 0.0   ;;  %vm133_vm0 = vmmov 0   ;;  %vm45_vm1 = vcmask 523264   ;;  %s167_s1 = inlined_call_operand.vmem [shape: bf16[64,128], index: 1, kind: input, shape index: {}]   ;;  %s168_s0 = inlined_call_operand.vmem [shape: bf16[2,64], index: 0, kind: input, shape index: {}]   ;;  %s169_s2 = inlined_call_operand.vmem [shape: f32[2,128], index: 2, kind: output, shape index: {}]  }
   0x1   :  { %110 = vmatprep.subr.bf16.mxu0 %v132_v0  ;;  %v124_v1 = vld [vmem:[%s167_s1 + $0x18] sm:$0xff]   ;;  %118 = vmatprep.mubr.msk.bf16.mxu0 %vm133_vm0, %v132_v0  ;;  %v125_v2 = vld [vmem:[%s167_s1 + $0x10] sm:$0xff]   ;;  %v126_v3 = vld [vmem:[%s167_s1 + $0x8] sm:$0xff]  }
   0x2   :  { %111 = vmatpush3.bf16.msra.mxu0 %v124_v1  ;;  %v127_v4 = vld [vmem:[%s167_s1] sm:$0xff]  }
   0x3   :  { %112 = vmatprep.subr.bf16.mxu0 %v132_v0  ;;  %v12_v5 = vld [vmem:[%s168_s0] sm:$0x1] }
   0x6   :  { %113 = vmatpush3.bf16.msra.mxu0 %v125_v2 }
   0x7   :  { %114 = vmatprep.subr.bf16.mxu0 %v132_v0 }
   0xa   :  { %115 = vmatpush3.bf16.msra.mxu0 %v126_v3 }
   0xb   :  { %116 = vmatprep.subr.bf16.mxu0 %v132_v0 }
   0xe   :  { %117 = vmatpush3.bf16.msra.mxu0 %v127_v4 }
  0x11   :  { %119 = vmatmul.mubr.msk.bf16.vlgmr.msra.gmra.mxu0 %vm45_vm1, %v12_v5 }
  0xd1   :  { %v83_v6 = vpop.f32.mrf.mxu0 }
  0xd2   :  { %v89_v7 = vsub.f32 0.0, %v83_v6 }
  0xd3   :  { %v120_v8 = vpop.f32.mrf.mxu0 }
  0xd4   :  { %v90_v9 = vmul.f32 1.442695, %v89_v7 }
  0xd5   :  { %v86_v10 = vpop.f32.mrf.mxu0 }
  0xd6   :  { %128 = vpow2.f32 %v90_v9 }
  0xd7   :  { %v121_v11 = vpop.f32.mrf.mxu0 }
  0xe3   :  { %v129_v12 = vpop.eup %128 }
  0xe4   :  { %v92_v13 = vadd.f32 1.0, %v129_v12 }
  0xe6   :  { %130 = vrcp.f32 %v92_v13 }
  0xf3   :  { %v131_v14 = vpop.eup %130 }
  0xf4   :  { %95 = vst [vmem:[%s169_s2] sm:$0x3] %v131_v14 }

// kernel: _lambda_.16
= control target key start
LH: loop header
LB: loop body
LE: loop exit
PB: predicated region body
PF: predicated region fallthrough
CT: control target
= control target key end

     0   :  { %s74_s0 = inlined_call_operand.vmem [shape: f32[2,128], index: 0, kind: input, shape index: {}]   ;;  %s75_s1 = inlined_call_operand.vmem [shape: f32[1,128], index: 1, kind: input, shape index: {}]   ;;  %s76_s2 = inlined_call_operand.vmem [shape: f32[1,128], index: 2, kind: input, shape index: {}]   ;;  %s77_s3 = inlined_call_operand.vmem [shape: bf16[2,128], index: 3, kind: output, shape index: {}]  }
   0x1   :  { %v14_v0 = vld [vmem:[%s74_s0] sm:$0x3] }
   0x2   :  { %v40_v1 = vld [vmem:[%s75_s1] ss:$0 sm:$0xff] }
   0x3   :  { %v41_v2 = vld [vmem:[%s76_s2] ss:$0 sm:$0xff]  ;;  %v22_v3 = vmul.f32 %v40_v1, %v14_v0 }
   0x5   :  { %v30_v4 = vadd.f32 %v41_v2, %v22_v3 }
   0x7   :  { %vm31_vm0 = vcmp.ge.f32.partialorder %v30_v4, 0.0  ;;  %v32_v5 = vmul.f32 0.2, %v30_v4 }
   0x9   :  { %v33_v6 = vsel %vm31_vm0, %v30_v4, %v32_v5 }
   0xa   :  { %v34_v7 = vpack.c.bf16 %v33_v6, %v33_v6 }
   0xc   :  { %35 = vst [vmem:[%s77_s3] sm:$0x1] %v34_v7 }

// kernel: _lambda_.15
= control target key start
LH: loop header
LB: loop body
LE: loop exit
PB: predicated region body
PF: predicated region fallthrough
CT: control target
= control target key end

     0   :  { %v1939_v22 = vmov 1966171168   ;;  %v278_v24 = vlaneseq  ;;  %vm1477_vm0 = vcmask 1041408   ;;  %vm1493_vm1 = vcmask 1040384   ;;  %s2390_s1 = inlined_call_operand.vmem [shape: bf16[2048,128], index: 1, kind: input, shape index: {}]   ;;  %s2391_s0 = inlined_call_operand.vmem [shape: bf16[2,2048], index: 0, kind: input, shape index: {}]   ;;  %s2392_s2 = inlined_call_operand.vmem [shape: f32[2,128], index: 2, kind: output, shape index: {0}]   ;;  %s2393_s3 = inlined_call_operand.vmem [shape: f32[1,2,128], index: 3, kind: output, shape index: {1}]  }
   0x1   :  { %v1809_v0 = vld [vmem:[%s2390_s1 + $0x78] sm:$0xff]   ;;  %v1813_v4 = vld [vmem:[%s2390_s1 + $0x70] sm:$0xff]   ;;  %v1817_v8 = vld [vmem:[%s2390_s1 + $0x68] sm:$0xff]   ;;  %v276_v23 = vunpack.c.l.s4 %v1939_v22 }
   0x2   :  { %v1810_v1 = vld [vmem:[%s2390_s1 + $0xf8] sm:$0xff]   ;;  %1632 = vmatprep.subr.bf16.mxu0 %v1809_v0  ;;  %v1814_v5 = vld [vmem:[%s2390_s1 + $0xf0] sm:$0xff]   ;;  %v1818_v9 = vld [vmem:[%s2390_s1 + $0xe8] sm:$0xff]   ;;  %v279_v30 = vshrl.u32 %v278_v24, 7 }
   0x3   :  { %v1811_v2 = vld [vmem:[%s2390_s1 + $0x38] sm:$0xff]   ;;  %1654 = vmatprep.subr.bf16.mxu1 %v1810_v1  ;;  %v1815_v6 = vld [vmem:[%s2390_s1 + $0x30] sm:$0xff]   ;;  %v1819_v10 = vld [vmem:[%s2390_s1 + $0x28] sm:$0xff]   ;;  %v277_v29 = vunpack.c.0.s8 %v276_v23 }
   0x4   :  { %v1812_v3 = vld [vmem:[%s2390_s1 + $0xb8] sm:$0xff]   ;;  %1633 = vmatpush3.bf16.msra.mxu0 %v1811_v2  ;;  %v1816_v7 = vld [vmem:[%s2390_s1 + $0xb0] sm:$0xff]   ;;  %v1820_v11 = vld [vmem:[%s2390_s1 + $0xa8] sm:$0xff]  }
   0x5   :  { %1655 = vmatpush3.bf16.msra.mxu1 %v1812_v3  ;;  %1634 = vmatprep.subr.bf16.mxu0 %v1813_v4  ;;  %v1821_v12 = vld [vmem:[%s2390_s1 + $0x60] sm:$0xff]   ;;  %v1825_v16 = vld [vmem:[%s2390_s1 + $0x58] sm:$0xff]   ;;  %v1829_v20 = vld [vmem:[%s2390_s1 + $0x50] sm:$0xff]   ;;  %v2050_v35 = vsub.s32 %v277_v29, %v279_v30 }
   0x6   :  { %1656 = vmatprep.subr.bf16.mxu1 %v1814_v5  ;;  %v1822_v13 = vld [vmem:[%s2390_s1 + $0xe0] sm:$0xff]   ;;  %v1826_v17 = vld [vmem:[%s2390_s1 + $0xd8] sm:$0xff]   ;;  %v1830_v21 = vld [vmem:[%s2390_s1 + $0xd0] sm:$0xff]  }
   0x7   :  { %v1823_v14 = vld [vmem:[%s2390_s1 + $0x20] sm:$0xff]   ;;  %v1827_v18 = vld [vmem:[%s2390_s1 + $0x18] sm:$0xff]   ;;  %v1831_v25 = vld [vmem:[%s2390_s1 + $0x10] sm:$0xff]  }
   0x8   :  { %1635 = vmatpush3.bf16.msra.mxu0 %v1815_v6  ;;  %v1824_v15 = vld [vmem:[%s2390_s1 + $0xa0] sm:$0xff]   ;;  %v1828_v19 = vld [vmem:[%s2390_s1 + $0x98] sm:$0xff]   ;;  %v1832_v26 = vld [vmem:[%s2390_s1 + $0x90] sm:$0xff]  }
   0x9   :  { %1657 = vmatpush3.bf16.msra.mxu1 %v1816_v7  ;;  %1636 = vmatprep.subr.bf16.mxu0 %v1817_v8  ;;  %v1833_v27 = vld [vmem:[%s2390_s1 + $0x48] sm:$0xff]   ;;  %v1837_v33 = vld [vmem:[%s2390_s1 + $0x40] sm:$0xff]   ;;  %v1843_v41 = vld [vmem:[%s2390_s1 + $0x178] sm:$0xff]  }
   0xa   :  { %1658 = vmatprep.subr.bf16.mxu1 %v1818_v9  ;;  %v1834_v28 = vld [vmem:[%s2390_s1 + $0xc8] sm:$0xff]   ;;  %v1838_v34 = vld [vmem:[%s2390_s1 + $0xc0] sm:$0xff]   ;;  %v1844_v42 = vld [vmem:[%s2390_s1 + $0x1f8] sm:$0xff]  }
   0xb   :  { %v1835_v31 = vld [vmem:[%s2390_s1 + $0x8] sm:$0xff]   ;;  %v1839_v36 = vld [vmem:[%s2390_s1] sm:$0xff]   ;;  %v1845_v47 = vld [vmem:[%s2390_s1 + $0x138] sm:$0xff]  }
   0xc   :  { %1637 = vmatpush3.bf16.msra.mxu0 %v1819_v10  ;;  %v1836_v32 = vld [vmem:[%s2390_s1 + $0x88] sm:$0xff]   ;;  %v1840_v37 = vld [vmem:[%s2390_s1 + $0x80] sm:$0xff]   ;;  %v1847_v50 = vld [vmem:[%s2390_s1 + $0x170] sm:$0xff]  }
   0xd   :  { %1659 = vmatpush3.bf16.msra.mxu1 %v1820_v11  ;;  %1638 = vmatprep.subr.bf16.mxu0 %v1821_v12  ;;  %v14_v38 = vld [vmem:[%s2391_s0] sm:$0xff]  ;;  %v1846_v52 = vld [vmem:[%s2390_s1 + $0x1b8] sm:$0xff]   ;;  %v1848_v54 = vld [vmem:[%s2390_s1 + $0x1f0] sm:$0xff]  }
   0xe   :  { %1660 = vmatprep.subr.bf16.mxu1 %v1822_v13  ;;  %v274_v39 = vcombine.high %v14_v38, %v14_v38  ;;  %v281_v40 = vrot.slane %v14_v38, %v2050_v35  ;;  %v1849_v55 = vld [vmem:[%s2390_s1 + $0x130] sm:$0xff]   ;;  %v1851_v57 = vld [vmem:[%s2390_s1 + $0x168] sm:$0xff]   ;;  %v1855_v61 = vld [vmem:[%s2390_s1 + $0x160] sm:$0xff]  }
   0xf   :  { %v1850_v58 = vld [vmem:[%s2390_s1 + $0x1b0] sm:$0xff]   ;;  %v1852_v59 = vld [vmem:[%s2390_s1 + $0x1e8] sm:$0xff]   ;;  %v1856_v63 = vld [vmem:[%s2390_s1 + $0x1e0] sm:$0xff]  }
  0x10   :  { %1639 = vmatpush3.bf16.msra.mxu0 %v1823_v14  ;;  %v289_v43 = vcombine.high %v281_v40, %v281_v40  ;;  %v297_v44 = vrot.slane %v281_v40, %v2050_v35  ;;  %v2070_v45 = vrot.slane %v274_v39, %v2050_v35  ;;  %v1853_v60 = vld [vmem:[%s2390_s1 + $0x128] sm:$0xff]   ;;  %v1857_v0 = vld [vmem:[%s2390_s1 + $0x120] sm:$0xff]   ;;  %v1859_v1 = vld [vmem:[%s2390_s1 + $0x158] sm:$0xff]  }
  0x11   :  { %1661 = vmatpush3.bf16.msra.mxu1 %v1824_v15  ;;  %1640 = vmatprep.subr.bf16.mxu0 %v1825_v16  ;;  %v1854_v62 = vld [vmem:[%s2390_s1 + $0x1a8] sm:$0xff]   ;;  %v1858_v2 = vld [vmem:[%s2390_s1 + $0x1a0] sm:$0xff]   ;;  %v1860_v3 = vld [vmem:[%s2390_s1 + $0x1d8] sm:$0xff]  }
  0x12   :  { %1662 = vmatprep.subr.bf16.mxu1 %v1826_v17  ;;  %v311_v46 = vrot.slane %v289_v43, %v2050_v35  ;;  %v290_v48 = vcombine.high %v2070_v45, %v2070_v45  ;;  %v319_v49 = vcombine.high %v297_v44, %v297_v44  ;;  %v1861_v4 = vld [vmem:[%s2390_s1 + $0x118] sm:$0xff]   ;;  %v2130_v5 = vld [vmem:[%s2391_s0 + $0x8] sm:$0xff]  ;;  %v1863_v6 = vld [vmem:[%s2390_s1 + $0x150] sm:$0xff]  }
  0x13   :  { %v1862_v7 = vld [vmem:[%s2390_s1 + $0x198] sm:$0xff]   ;;  %v1864_v8 = vld [vmem:[%s2390_s1 + $0x1d0] sm:$0xff]   ;;  %v1867_v10 = vld [vmem:[%s2390_s1 + $0x148] sm:$0xff]   ;;  %v2152_v12 = vrot.slane %v2130_v5, %v2050_v35 }
  0x14   :  { %1641 = vmatpush3.bf16.msra.mxu0 %v1827_v18  ;;  %1188 = vmatprep.mubr.bf16.mxu0 %v311_v46  ;;  %v321_v51 = vcombine.high %v311_v46, %v311_v46  ;;  %v318_v53 = vrot.slane %v290_v48, %v2050_v35  ;;  %v1865_v9 = vld [vmem:[%s2390_s1 + $0x110] sm:$0xff]   ;;  %v1868_v13 = vld [vmem:[%s2390_s1 + $0x1c8] sm:$0xff]   ;;  %v1871_v15 = vld [vmem:[%s2390_s1 + $0x140] sm:$0xff]   ;;  %v323_v46 = vcombine.high %v2130_v5, %v2130_v5 }
  0x15   :  { %1663 = vmatpush3.bf16.msra.mxu1 %v1828_v19  ;;  %1642 = vmatprep.subr.bf16.mxu0 %v1829_v20  ;;  %v1866_v11 = vld [vmem:[%s2390_s1 + $0x190] sm:$0xff]   ;;  %v1869_v14 = vld [vmem:[%s2390_s1 + $0x108] sm:$0xff]   ;;  %v338_v17 = vcombine.high %v2152_v12, %v2152_v12  ;;  %v1872_v18 = vld [vmem:[%s2390_s1 + $0x1c0] sm:$0xff]   ;;  %v304_v20 = vrot.slane %v2070_v45, %v2050_v35 }
  0x16   :  { %1664 = vmatprep.subr.bf16.mxu1 %v1830_v21  ;;  %1228 = vmatprep.mubr.bf16.mxu1 %v321_v51  ;;  %v322_v56 = vcombine.high %v318_v53, %v318_v53  ;;  %v1870_v16 = vld [vmem:[%s2390_s1 + $0x188] sm:$0xff]   ;;  %v1873_v19 = vld [vmem:[%s2390_s1 + $0x100] sm:$0xff]   ;;  %v1875_v21 = vld [vmem:[%s2390_s1 + $0x278] sm:$0xff]  }
  0x17   :  { %v1874_v22 = vld [vmem:[%s2390_s1 + $0x180] sm:$0xff]   ;;  %v360_v23 = vrot.slane %v338_v17, %v2050_v35  ;;  %v1876_v24 = vld [vmem:[%s2390_s1 + $0x2f8] sm:$0xff]   ;;  %v1880_v30 = vld [vmem:[%s2390_s1 + $0x2f0] sm:$0xff]  }
  0x18   :  { %1643 = vmatpush3.bf16.msra.mxu0 %v1831_v25  ;;  %v1877_v25 = vld [vmem:[%s2390_s1 + $0x238] sm:$0xff]   ;;  %v1886_v38 = vld [vmem:[%s2390_s1 + $0x2a8] sm:$0xff]   ;;  %v1888_v39 = vld [vmem:[%s2390_s1 + $0x2e0] sm:$0xff]  }
  0x19   :  { %1665 = vmatpush3.bf16.msra.mxu1 %v1832_v26  ;;  %1644 = vmatprep.subr.bf16.mxu0 %v1833_v27  ;;  %v320_v26 = vcombine.high %v304_v20, %v304_v20  ;;  %v1879_v27 = vld [vmem:[%s2390_s1 + $0x270] sm:$0xff]   ;;  %v370_v29 = vcombine.high %v360_v23, %v360_v23  ;;  %v1889_v40 = vld [vmem:[%s2390_s1 + $0x220] sm:$0xff]   ;;  %v1892_v43 = vld [vmem:[%s2390_s1 + $0x2d8] sm:$0xff]  }
  0x1a   :  { %1666 = vmatprep.subr.bf16.mxu1 %v1834_v28  ;;  %v1878_v28 = vld [vmem:[%s2390_s1 + $0x2b8] sm:$0xff]   ;;  %v1895_v45 = vld [vmem:[%s2390_s1 + $0x250] sm:$0xff]   ;;  %v1922_v17 = vld [vmem:[%s2390_s1 + $0x3a0] sm:$0xff]  }
  0x1b   :  { %v1896_v48 = vld [vmem:[%s2390_s1 + $0x2d0] sm:$0xff]  }
  0x1c   :  { %1645 = vmatpush3.bf16.msra.mxu0 %v1835_v31  ;;  %v1881_v31 = vld [vmem:[%s2390_s1 + $0x230] sm:$0xff]  }
  0x1d   :  { %1667 = vmatpush3.bf16.msra.mxu1 %v1836_v32  ;;  %1646 = vmatprep.subr.bf16.mxu0 %v1837_v33  ;;  %v1883_v32 = vld [vmem:[%s2390_s1 + $0x268] sm:$0xff]   ;;  %v1882_v33 = vld [vmem:[%s2390_s1 + $0x2b0] sm:$0xff]  }
  0x1e   :  { %1668 = vmatprep.subr.bf16.mxu1 %v1838_v34  ;;  %v1884_v34 = vld [vmem:[%s2390_s1 + $0x2e8] sm:$0xff]   ;;  %v1898_v51 = vld [vmem:[%s2390_s1 + $0x290] sm:$0xff]  }
  0x20   :  { %1647 = vmatpush3.bf16.msra.mxu0 %v1839_v36  ;;  %v1885_v36 = vld [vmem:[%s2390_s1 + $0x228] sm:$0xff]  }
  0x21   :  { %1669 = vmatpush3.bf16.msra.mxu1 %v1840_v37  ;;  %1676 = vmatprep.subr.bf16.mxu0 %v1843_v41  ;;  %v1887_v37 = vld [vmem:[%s2390_s1 + $0x260] sm:$0xff]   ;;  %v1891_v41 = vld [vmem:[%s2390_s1 + $0x258] sm:$0xff]  }
  0x22   :  { %1698 = vmatprep.subr.bf16.mxu1 %v1844_v42  ;;  %v1890_v42 = vld [vmem:[%s2390_s1 + $0x2a0] sm:$0xff]  }
  0x23   :  { %1189 = vmatmul.mubr.bf16.vlgmr.msra.gmra.mxu0 %v297_v44  ;;  %v1893_v44 = vld [vmem:[%s2390_s1 + $0x218] sm:$0xff]  }
  0x24   :  { %1677 = vmatpush3.bf16.msra.mxu0 %v1845_v47  ;;  %1229 = vmatmul.mubr.bf16.vlgmr.msra.gmra.mxu1 %v319_v49  ;;  %v1894_v47 = vld [vmem:[%s2390_s1 + $0x298] sm:$0xff]   ;;  %v1897_v49 = vld [vmem:[%s2390_s1 + $0x210] sm:$0xff]  }
  0x25   :  { %1678 = vmatprep.subr.bf16.mxu0 %v1847_v50  ;;  %1699 = vmatpush3.bf16.msra.mxu1 %v1846_v52  ;;  %v1899_v50 = vld [vmem:[%s2390_s1 + $0x248] sm:$0xff]   ;;  %v2258_v52 = vrot.slane %v323_v46, %v2050_v35 }
  0x26   :  { %1268 = vmatprep.mubr.bf16.mxu0 %v318_v53  ;;  %1700 = vmatprep.subr.bf16.mxu1 %v1848_v54  ;;  %v1900_v53 = vld [vmem:[%s2390_s1 + $0x2c8] sm:$0xff]  }
  0x27   :  { %1308 = vmatprep.mubr.bf16.mxu1 %v322_v56  ;;  %v1901_v54 = vld [vmem:[%s2390_s1 + $0x208] sm:$0xff]  }
  0x28   :  { %1679 = vmatpush3.bf16.msra.mxu0 %v1849_v55  ;;  %v1903_v55 = vld [vmem:[%s2390_s1 + $0x240] sm:$0xff]   ;;  %v1902_v56 = vld [vmem:[%s2390_s1 + $0x288] sm:$0xff]  }
  0x29   :  { %1680 = vmatprep.subr.bf16.mxu0 %v1851_v57  ;;  %1701 = vmatpush3.bf16.msra.mxu1 %v1850_v58  ;;  %v339_v57 = vcombine.high %v2258_v52, %v2258_v52  ;;  %v1904_v58 = vld [vmem:[%s2390_s1 + $0x2c0] sm:$0xff]  }
  0x2a   :  { %1702 = vmatprep.subr.bf16.mxu1 %v1852_v59  ;;  %v1905_v59 = vld [vmem:[%s2390_s1 + $0x200] sm:$0xff]  }
  0x2c   :  { %1681 = vmatpush3.bf16.msra.mxu0 %v1853_v60  ;;  %v346_v60 = vrot.slane %v2152_v12, %v2050_v35  ;;  %v1919_v12 = vld [vmem:[%s2390_s1 + $0x360] sm:$0xff]  }
  0x2d   :  { %1682 = vmatprep.subr.bf16.mxu0 %v1855_v61  ;;  %1703 = vmatpush3.bf16.msra.mxu1 %v1854_v62  ;;  %v1907_v61 = vld [vmem:[%s2390_s1 + $0x378] sm:$0xff]   ;;  %v1906_v62 = vld [vmem:[%s2390_s1 + $0x280] sm:$0xff]  }
  0x2e   :  { %1704 = vmatprep.subr.bf16.mxu1 %v1856_v63  ;;  %v367_v63 = vrot.slane %v339_v57, %v2050_v35 }
  0x30   :  { %1683 = vmatpush3.bf16.msra.mxu0 %v1857_v0  ;;  %v1908_v0 = vld [vmem:[%s2390_s1 + $0x3f8] sm:$0xff]   ;;  %v371_v5 = vcombine.high %v367_v63, %v367_v63 }
  0x31   :  { %1684 = vmatprep.subr.bf16.mxu0 %v1859_v1  ;;  %1705 = vmatpush3.bf16.msra.mxu1 %v1858_v2  ;;  %v1909_v1 = vld [vmem:[%s2390_s1 + $0x338] sm:$0xff]   ;;  %v368_v2 = vcombine.high %v346_v60, %v346_v60 }
  0x32   :  { %1706 = vmatprep.subr.bf16.mxu1 %v1860_v3  ;;  %v1911_v3 = vld [vmem:[%s2390_s1 + $0x370] sm:$0xff]  }
  0x34   :  { %1685 = vmatpush3.bf16.msra.mxu0 %v1861_v4  ;;  %v1910_v4 = vld [vmem:[%s2390_s1 + $0x3b8] sm:$0xff]  }
  0x35   :  { %1686 = vmatprep.subr.bf16.mxu0 %v1863_v6  ;;  %1707 = vmatpush3.bf16.msra.mxu1 %v1862_v7  ;;  %v1912_v6 = vld [vmem:[%s2390_s1 + $0x3f0] sm:$0xff]  }
  0x36   :  { %1708 = vmatprep.subr.bf16.mxu1 %v1864_v8  ;;  %v1913_v7 = vld [vmem:[%s2390_s1 + $0x330] sm:$0xff]   ;;  %v1915_v8 = vld [vmem:[%s2390_s1 + $0x368] sm:$0xff]  }
  0x38   :  { %1687 = vmatpush3.bf16.msra.mxu0 %v1865_v9  ;;  %v1914_v9 = vld [vmem:[%s2390_s1 + $0x3b0] sm:$0xff]  }
  0x39   :  { %1688 = vmatprep.subr.bf16.mxu0 %v1867_v10  ;;  %1709 = vmatpush3.bf16.msra.mxu1 %v1866_v11  ;;  %v1916_v10 = vld [vmem:[%s2390_s1 + $0x3e8] sm:$0xff]  }
  0x3a   :  { %1710 = vmatprep.subr.bf16.mxu1 %v1868_v13  ;;  %v1917_v11 = vld [vmem:[%s2390_s1 + $0x328] sm:$0xff]  }
  0x3b   :  { %v1918_v13 = vld [vmem:[%s2390_s1 + $0x3a8] sm:$0xff]  }
  0x3c   :  { %1689 = vmatpush3.bf16.msra.mxu0 %v1869_v14  ;;  %v1920_v14 = vld [vmem:[%s2390_s1 + $0x3e0] sm:$0xff]  }
  0x3d   :  { %1690 = vmatprep.subr.bf16.mxu0 %v1871_v15  ;;  %1711 = vmatpush3.bf16.msra.mxu1 %v1870_v16  ;;  %v1921_v15 = vld [vmem:[%s2390_s1 + $0x320] sm:$0xff]   ;;  %v1923_v16 = vld [vmem:[%s2390_s1 + $0x358] sm:$0xff]  }
  0x3e   :  { %1712 = vmatprep.subr.bf16.mxu1 %v1872_v18  ;;  %v1924_v18 = vld [vmem:[%s2390_s1 + $0x3d8] sm:$0xff]  }
  0x40   :  { %1691 = vmatpush3.bf16.msra.mxu0 %v1873_v19  ;;  %v1925_v19 = vld [vmem:[%s2390_s1 + $0x318] sm:$0xff]  }
  0x41   :  { %1720 = vmatprep.subr.bf16.mxu0 %v1875_v21  ;;  %1713 = vmatpush3.bf16.msra.mxu1 %v1874_v22  ;;  %v1926_v21 = vld [vmem:[%s2390_s1 + $0x398] sm:$0xff]   ;;  %v1928_v22 = vld [vmem:[%s2390_s1 + $0x3d0] sm:$0xff]  }
  0x42   :  { %1742 = vmatprep.subr.bf16.mxu1 %v1876_v24  ;;  %v1931_v24 = vld [vmem:[%s2390_s1 + $0x348] sm:$0xff]  }
  0x43   :  { %1269 = vmatmul.mubr.bf16.vlgmr.msra.gmra.mxu0 %v304_v20  ;;  %v1927_v20 = vld [vmem:[%s2390_s1 + $0x350] sm:$0xff]  }
  0x44   :  { %1721 = vmatpush3.bf16.msra.mxu0 %v1877_v25  ;;  %1348 = vmatprep.mubr.bf16.mxu0 %v360_v23  ;;  %v1929_v23 = vld [vmem:[%s2390_s1 + $0x310] sm:$0xff]  }
  0x45   :  { %1309 = vmatmul.mubr.bf16.vlgmr.msra.gmra.mxu1 %v320_v26  ;;  %1722 = vmatprep.subr.bf16.mxu0 %v1879_v27  ;;  %v1930_v25 = vld [vmem:[%s2390_s1 + $0x390] sm:$0xff]   ;;  %v1932_v26 = vld [vmem:[%s2390_s1 + $0x3c8] sm:$0xff]  }
  0x46   :  { %1743 = vmatpush3.bf16.msra.mxu1 %v1878_v28  ;;  %1388 = vmatprep.mubr.bf16.mxu1 %v370_v29  ;;  %v1933_v27 = vld [vmem:[%s2390_s1 + $0x308] sm:$0xff]   ;;  %v1935_v28 = vld [vmem:[%s2390_s1 + $0x340] sm:$0xff]  }
  0x47   :  { %1744 = vmatprep.subr.bf16.mxu1 %v1880_v30  ;;  %v1934_v29 = vld [vmem:[%s2390_s1 + $0x388] sm:$0xff]   ;;  %v1936_v30 = vld [vmem:[%s2390_s1 + $0x3c0] sm:$0xff]  }
  0x48   :  { %1723 = vmatpush3.bf16.msra.mxu0 %v1881_v31  ;;  %v1937_v31 = vld [vmem:[%s2390_s1 + $0x300] sm:$0xff]  }
  0x49   :  { %1724 = vmatprep.subr.bf16.mxu0 %v1883_v32  ;;  %v353_v32 = vrot.slane %v2258_v52, %v2050_v35 }
  0x4a   :  { %1745 = vmatpush3.bf16.msra.mxu1 %v1882_v33  ;;  %v1938_v33 = vld [vmem:[%s2390_s1 + $0x380] sm:$0xff]  }
  0x4b   :  { %1746 = vmatprep.subr.bf16.mxu1 %v1884_v34  ;;  %v369_v34 = vcombine.high %v353_v32, %v353_v32 }
  0x4c   :  { %1725 = vmatpush3.bf16.msra.mxu0 %v1885_v36 }
  0x4d   :  { %1726 = vmatprep.subr.bf16.mxu0 %v1887_v37 }
  0x4e   :  { %1747 = vmatpush3.bf16.msra.mxu1 %v1886_v38 }
  0x4f   :  { %1748 = vmatprep.subr.bf16.mxu1 %v1888_v39 }
  0x50   :  { %1727 = vmatpush3.bf16.msra.mxu0 %v1889_v40 }
  0x51   :  { %1728 = vmatprep.subr.bf16.mxu0 %v1891_v41 }
  0x52   :  { %1749 = vmatpush3.bf16.msra.mxu1 %v1890_v42 }
  0x53   :  { %1750 = vmatprep.subr.bf16.mxu1 %v1892_v43 }
  0x54   :  { %1729 = vmatpush3.bf16.msra.mxu0 %v1893_v44 }
  0x55   :  { %1730 = vmatprep.subr.bf16.mxu0 %v1895_v45 }
  0x56   :  { %1751 = vmatpush3.bf16.msra.mxu1 %v1894_v47 }
  0x57   :  { %1752 = vmatprep.subr.bf16.mxu1 %v1896_v48 }
  0x58   :  { %1731 = vmatpush3.bf16.msra.mxu0 %v1897_v49 }
  0x59   :  { %1732 = vmatprep.subr.bf16.mxu0 %v1899_v50 }
  0x5a   :  { %1753 = vmatpush3.bf16.msra.mxu1 %v1898_v51 }
  0x5b   :  { %1754 = vmatprep.subr.bf16.mxu1 %v1900_v53 }
  0x5c   :  { %1733 = vmatpush3.bf16.msra.mxu0 %v1901_v54 }
  0x5d   :  { %1734 = vmatprep.subr.bf16.mxu0 %v1903_v55 }
  0x5e   :  { %1755 = vmatpush3.bf16.msra.mxu1 %v1902_v56 }
  0x5f   :  { %1756 = vmatprep.subr.bf16.mxu1 %v1904_v58 }
  0x60   :  { %1735 = vmatpush3.bf16.msra.mxu0 %v1905_v59 }
  0x61   :  { %1764 = vmatprep.subr.bf16.mxu0 %v1907_v61 }
  0x62   :  { %1757 = vmatpush3.bf16.msra.mxu1 %v1906_v62 }
  0x63   :  { %1349 = vmatmul.mubr.bf16.vlgmr.msra.gmra.mxu0 %v346_v60  ;;  %1786 = vmatprep.subr.bf16.mxu1 %v1908_v0 }
  0x64   :  { %1765 = vmatpush3.bf16.msra.mxu0 %v1909_v1  ;;  %1428 = vmatprep.mubr.bf16.mxu0 %v367_v63 }
  0x65   :  { %1389 = vmatmul.mubr.bf16.vlgmr.msra.gmra.mxu1 %v368_v2  ;;  %1766 = vmatprep.subr.bf16.mxu0 %v1911_v3 }
  0x66   :  { %1787 = vmatpush3.bf16.msra.mxu1 %v1910_v4  ;;  %1468 = vmatprep.mubr.bf16.mxu1 %v371_v5 }
  0x67   :  { %1788 = vmatprep.subr.bf16.mxu1 %v1912_v6 }
  0x68   :  { %1767 = vmatpush3.bf16.msra.mxu0 %v1913_v7 }
  0x69   :  { %1768 = vmatprep.subr.bf16.mxu0 %v1915_v8 }
  0x6a   :  { %1789 = vmatpush3.bf16.msra.mxu1 %v1914_v9 }
  0x6b   :  { %1790 = vmatprep.subr.bf16.mxu1 %v1916_v10 }
  0x6c   :  { %1769 = vmatpush3.bf16.msra.mxu0 %v1917_v11 }
  0x6d   :  { %1770 = vmatprep.subr.bf16.mxu0 %v1919_v12 }
  0x6e   :  { %1791 = vmatpush3.bf16.msra.mxu1 %v1918_v13 }
  0x6f   :  { %1792 = vmatprep.subr.bf16.mxu1 %v1920_v14 }
  0x70   :  { %1771 = vmatpush3.bf16.msra.mxu0 %v1921_v15 }
  0x71   :  { %1772 = vmatprep.subr.bf16.mxu0 %v1923_v16 }
  0x72   :  { %1793 = vmatpush3.bf16.msra.mxu1 %v1922_v17 }
  0x73   :  { %1794 = vmatprep.subr.bf16.mxu1 %v1924_v18 }
  0x74   :  { %1773 = vmatpush3.bf16.msra.mxu0 %v1925_v19 }
  0x75   :  { %1774 = vmatprep.subr.bf16.mxu0 %v1927_v20 }
  0x76   :  { %1795 = vmatpush3.bf16.msra.mxu1 %v1926_v21 }
  0x77   :  { %1796 = vmatprep.subr.bf16.mxu1 %v1928_v22 }
  0x78   :  { %1775 = vmatpush3.bf16.msra.mxu0 %v1929_v23 }
  0x79   :  { %1776 = vmatprep.subr.bf16.mxu0 %v1931_v24 }
  0x7a   :  { %1797 = vmatpush3.bf16.msra.mxu1 %v1930_v25 }
  0x7b   :  { %1798 = vmatprep.subr.bf16.mxu1 %v1932_v26 }
  0x7c   :  { %1777 = vmatpush3.bf16.msra.mxu0 %v1933_v27 }
  0x7d   :  { %1778 = vmatprep.subr.bf16.mxu0 %v1935_v28 }
  0x7e   :  { %1799 = vmatpush3.bf16.msra.mxu1 %v1934_v29 }
  0x7f   :  { %1800 = vmatprep.subr.bf16.mxu1 %v1936_v30 }
  0x80   :  { %1779 = vmatpush3.bf16.msra.mxu0 %v1937_v31 }
  0x82   :  { %1801 = vmatpush3.bf16.msra.mxu1 %v1938_v33 }
  0x83   :  { %1429 = vmatmul.mubr.bf16.vlgmr.msra.gmra.mxu0 %v353_v32 }
  0x85   :  { %1469 = vmatmul.mubr.bf16.vlgmr.msra.gmra.mxu1 %v369_v34 }
  0xe3   :  { %v1648_v36 = vpop.f32.mrf.mxu0 }
  0xe4   :  { %v1670_v37 = vpop.f32.mrf.mxu1 }
  0xe5   :  { %v1649_v38 = vpop.f32.mrf.mxu0 }
  0xe6   :  { %v1650_v39 = vadd.f32 %v1649_v38, %v1648_v36  ;;  %v1671_v40 = vpop.f32.mrf.mxu1 }
  0xe7   :  { %v1651_v41 = vpop.f32.mrf.mxu0  ;;  %v1672_v42 = vadd.f32 %v1671_v40, %v1670_v37 }
  0xe8   :  { %v1673_v43 = vpop.f32.mrf.mxu1 }
  0xe9   :  { %v1652_v35 = vpop.f32.mrf.mxu0  ;;  %v1231_v44 = vadd.f32 %v1672_v42, %v1650_v39 }
  0xea   :  { %v1674_v45 = vpop.f32.mrf.mxu1 }
 0x103   :  { %v1692_v46 = vpop.f32.mrf.mxu0 }
 0x105   :  { %v1714_v47 = vpop.f32.mrf.mxu1  ;;  %v1693_v48 = vpop.f32.mrf.mxu0 }
 0x106   :  { %v1694_v62 = vadd.f32 %v1693_v48, %v1692_v46 }
 0x107   :  { %v1715_v49 = vpop.f32.mrf.mxu1  ;;  %v1695_v50 = vpop.f32.mrf.mxu0 }
 0x108   :  { %v1271_v63 = vadd.f32 %v1694_v62, %v1231_v44  ;;  %v1716_v0 = vadd.f32 %v1715_v49, %v1714_v47 }
 0x109   :  { %v1717_v51 = vpop.f32.mrf.mxu1  ;;  %v1696_v52 = vpop.f32.mrf.mxu0 }
 0x10a   :  { %v1311_v2 = vadd.f32 %v1716_v0, %v1271_v63 }
 0x10b   :  { %v1718_v53 = vpop.f32.mrf.mxu1 }
 0x123   :  { %v1736_v54 = vpop.f32.mrf.mxu0 }
 0x125   :  { %v1758_v55 = vpop.f32.mrf.mxu1  ;;  %v1737_v56 = vpop.f32.mrf.mxu0 }
 0x126   :  { %v1738_v1 = vadd.f32 %v1737_v56, %v1736_v54 }
 0x127   :  { %v1759_v57 = vpop.f32.mrf.mxu1  ;;  %v1739_v58 = vpop.f32.mrf.mxu0 }
 0x128   :  { %v1351_v3 = vadd.f32 %v1738_v1, %v1311_v2  ;;  %v1760_v4 = vadd.f32 %v1759_v57, %v1758_v55 }
 0x129   :  { %v1761_v59 = vpop.f32.mrf.mxu1  ;;  %v1740_v60 = vpop.f32.mrf.mxu0 }
 0x12a   :  { %v1391_v8 = vadd.f32 %v1760_v4, %v1351_v3 }
 0x12b   :  { %v1762_v61 = vpop.f32.mrf.mxu1 }
 0x143   :  { %v1780_v5 = vpop.f32.mrf.mxu0 }
 0x145   :  { %v1802_v6 = vpop.f32.mrf.mxu1  ;;  %v1781_v7 = vpop.f32.mrf.mxu0 }
 0x146   :  { %v1782_v9 = vadd.f32 %v1781_v7, %v1780_v5 }
 0x147   :  { %v1803_v10 = vpop.f32.mrf.mxu1  ;;  %v1783_v11 = vpop.f32.mrf.mxu0 }
 0x148   :  { %v1431_v12 = vadd.f32 %v1782_v9, %v1391_v8  ;;  %v1804_v13 = vadd.f32 %v1803_v10, %v1802_v6 }
 0x149   :  { %v1805_v14 = vpop.f32.mrf.mxu1  ;;  %v1784_v15 = vpop.f32.mrf.mxu0 }
 0x14a   :  { %v1471_v16 = vadd.f32 %v1804_v13, %v1431_v12 }
 0x14b   :  { %v1806_v17 = vpop.f32.mrf.mxu1 }
 0x14c   :  { %1476 = vst [vmem:[%s2392_s2] sm:$0x3] %v1471_v16  ;;  %v1478_v18 = vsel %vm1477_vm0, %v1471_v16, 0.0  ;;  %v1485_v19 = vmul.f32 %v1471_v16, %v1471_v16 }
 0x14d   :  { %v1479_v20 = vrot.slane %v1478_v18, 4 }
 0x14e   :  { %v1486_v21 = vsel %vm1477_vm0, %v1485_v19, 0.0 }
 0x14f   :  { %v1480_v22 = vadd.f32 %v1479_v20, %v1478_v18  ;;  %v1487_v23 = vrot.slane %v1486_v21, 4 }
 0x151   :  { %v1481_v24 = vrot.slane %v1480_v22, 2  ;;  %v1488_v25 = vadd.f32 %v1487_v23, %v1486_v21 }
 0x153   :  { %v1482_v26 = vadd.f32 %v1481_v24, %v1480_v22  ;;  %v1489_v27 = vrot.slane %v1488_v25, 2 }
 0x155   :  { %v1483_v28 = vrot.slane %v1482_v26, 1  ;;  %v1490_v29 = vadd.f32 %v1489_v27, %v1488_v25 }
 0x157   :  { %v1491_v30 = vrot.slane %v1490_v29, 1  ;;  %v1484_v31 = vadd.f32 %v1483_v28, %v1482_v26 }
 0x159   :  { %v1492_v32 = vadd.f32 %v1491_v30, %v1490_v29 }
 0x15b   :  { %v1494_v33 = vsel %vm1493_vm1, %v1484_v31, %v1492_v32 }
 0x15c   :  { %1495 = vst [vmem:[%s2393_s3] sm:$0x3] %v1494_v33 }

</bundles_post_ra>
